<compile_context>
chip_gen: v5e
topology: v5e:2x2
jax: 0.10.0
libtpu: 0.0.40
codegen_flags: <defaults>
</compile_context>

<pallas_src>
import functools

import jax
import jax.numpy as jnp
from jax.experimental import pallas as pl
from jax.experimental.pallas import tpu as pltpu

F32 = jnp.float32
BF16 = jnp.bfloat16
LN_EPS = 1e-5


# ------------------------------- small helpers -------------------------------

def _round_up(n, m):
    return ((n + m - 1) // m) * m


def _row_tile(n_rows, requested=None):
    """256-512-row tiles by default; pad n_rows instead of shrinking the tile."""
    if requested is not None:
        return requested
    return min(512, _round_up(n_rows, 8))


def _q_tile(qlen, requested=None):
    if requested is not None and qlen % requested == 0:
        return requested
    for t in (256, 128, 64, 32, 16, 8):
        if qlen % t == 0:
            return t
    return qlen


@functools.lru_cache(maxsize=None)
def _vmem_limit_bytes():
    """Generation-aware VMEM limit: ~96 MiB on v5e/v6e, ~48 MiB on v7x."""
    cap = 64 * 1024 * 1024                      # conservative fallback (v7x)
    try:
        cap = int(pltpu.get_tpu_info().vmem_capacity_bytes)
    except Exception:
        pass
    return min(cap * 3 // 4, 100 * 1024 * 1024)


@functools.lru_cache(maxsize=None)
def _roll_mode():
    """Probe pltpu.roll's direction once, eagerly (outside any jit trace).

    Returns "right" if positive shift moves elements toward higher lane indices
    (jnp.roll convention), "left" if the opposite, "concat" if the probe could
    not run (then a concatenate-based roll is used -- slower but always correct).
    """
    try:
        def probe(o_ref):
            x = jax.lax.broadcasted_iota(jnp.float32, (8, 128), 1)
            o_ref[...] = pltpu.roll(x, shift=1, axis=1)

        out = pl.pallas_call(
            probe, out_shape=jax.ShapeDtypeStruct((8, 128), jnp.float32))()
        v = float(jax.block_until_ready(out)[0, 0])
        if v == 127.0:
            return "right"
        if v == 1.0:
            return "left"
        return "concat"
    except Exception:
        return "concat"


def _roll_left(x, a, mode):
    """Circular LEFT roll by `a` along the last axis of a 2-D value."""
    n = x.shape[-1]
    if mode == "right":                          # pltpu.roll == jnp.roll semantics
        return pltpu.roll(x, shift=n - a, axis=1)
    if mode == "left":
        return pltpu.roll(x, shift=a, axis=1)
    return jnp.concatenate([x[:, a:], x[:, :a]], axis=1)   # safe fallback


def _resident(shape, single_buffer):
    """BlockSpec for an operand whose block never changes across the grid."""
    ndim = len(shape)
    idx = lambda *args: (0,) * ndim             # noqa: E731
    if single_buffer:
        # Single-buffer resident weights: halves their VMEM footprint (v7x).
        return pl.BlockSpec(shape, idx, pipeline_mode=pl.Buffered(1))
    return pl.BlockSpec(shape, idx)


# ------------------------------ Pallas kernels ------------------------------

def _linear_kernel(x_ref, wt_ref, o_ref):
    """out = x @ w^T for one row tile; bf16 MXU inputs, f32 accumulation."""
    x = x_ref[...].astype(BF16)
    o_ref[...] = jnp.dot(x, wt_ref[...],
                         preferred_element_type=jnp.float32).astype(o_ref.dtype)


def _attn_kernel(q_ref, kv_ref, rk_ref, rwb_ref, rrb_ref, o_ref,
                 *, n_head, d_head, qlen, roll_mode):
    """Fused relative-position attention for one (batch, query-tile) program.

    Per head: AC = (q*s + b_w*s) @ k^T, BD = (q*s + b_r*s) @ r_k^T (scale s is
    pre-folded into q / biases), in-kernel rel-shift of BD via pltpu.roll,
    in-kernel causal mask from iotas, softmax, prob @ V written straight into
    the head's lane slice of o_ref.  All intermediates stay in VMEM.
    """
    HD = n_head * d_head
    TQ = q_ref.shape[0]
    K = kv_ref.shape[0]                         # klen == qlen (mems=None path)

    qt = pl.program_id(1)
    row = qt * TQ + jax.lax.broadcasted_iota(jnp.int32, (TQ, 1), 0)   # global i
    col = jax.lax.broadcasted_iota(jnp.int32, (TQ, K), 1)
    masked = col > row                          # strict causal mask, no HBM DMA
    lshift = (qlen - 1) - row                   # per-row circular LEFT-roll amount
    nbits = (qlen - 1).bit_length()

    NEG = jnp.float32(-1e30)                    # finite fill -> no NaN rows
    dn = (((1,), (1,)), ((), ()))               # A @ B^T (contract d_head)

    rwb = rwb_ref[...]                          # [1, HD] f32, already * 1/sqrt(dh)
    rrb = rrb_ref[...]

    # TODO(synk): for very long K, stream the key axis with an online softmax
    # (flash style); the Q tiling here already bounds the [TQ,K] score tile.
    # TODO(synk): pair heads (128-lane slices) / batch the AC-BD dot_generals to
    # improve MXU fill of the d_head-deep contraction on v6e.
    for h in range(n_head):
        sl = slice(h * d_head, (h + 1) * d_head)
        q_h = q_ref[:, sl].astype(jnp.float32)                         # [TQ, DH]
        k_h = kv_ref[:, HD + h * d_head: HD + (h + 1) * d_head]        # [K, DH] bf16
        v_h = kv_ref[:, 2 * HD + h * d_head: 2 * HD + (h + 1) * d_head]
        rk_h = rk_ref[:, sl]                                           # [K, DH] bf16

        rwq = (q_h + rwb[:, sl]).astype(BF16)
        rrq = (q_h + rrb[:, sl]).astype(BF16)
        ac = jax.lax.dot_general(rwq, k_h, dn, preferred_element_type=jnp.float32)
        bd = jax.lax.dot_general(rrq, rk_h, dn, preferred_element_type=jnp.float32)

        # Transformer-XL rel-shift: BD'[i, j] = BD[i, (j + qlen-1-i) mod K];
        # wrapped entries appear only at j > i, which the causal mask kills.
        # log2(qlen)-stage barrel shifter: XLU rolls + per-row selects.
        for kb in range(nbits):
            a = 1 << kb
            rolled = _roll_left(bd, a, roll_mode)
            bd = jnp.where(((lshift >> kb) & 1) == 1, rolled, bd)
        # TODO(synk): a single strided pltpu.roll (stride=1, stride_axis=0) could
        # do the whole rel-shift in one XLU op; verify DynamicRotate semantics.

        s = jnp.where(masked, NEG, ac + bd)
        m = jnp.max(s, axis=-1, keepdims=True)
        e = jnp.exp(s - m)
        inv = pl.reciprocal(jnp.sum(e, axis=-1, keepdims=True), approx=True)
        p = (e * inv).astype(BF16)
        o_ref[:, sl] = jnp.dot(p, v_h,
                               preferred_element_type=jnp.float32).astype(o_ref.dtype)


def _post_kernel(av_ref, w_ref, wo_t_ref, g1_ref, b1_ref,
                 wff1_t_ref, bff1_ref, wff2_t_ref, bff2_ref,
                 g2_ref, b2_ref, o_ref):
    """o_net + residual + LayerNorm, then PositionwiseFF + residual + LayerNorm
    for one row tile (post-lnorm; dropout = identity)."""
    attn_out = jnp.dot(av_ref[...], wo_t_ref[...],
                       preferred_element_type=jnp.float32)
    x = w_ref[...] + attn_out
    mu = jnp.mean(x, axis=-1, keepdims=True)
    var = jnp.mean((x - mu) ** 2, axis=-1, keepdims=True)
    y = (x - mu) * jax.lax.rsqrt(var + LN_EPS) * g1_ref[...] + b1_ref[...]

    h = jnp.dot(y.astype(BF16), wff1_t_ref[...],
                preferred_element_type=jnp.float32) + bff1_ref[...]
    h = jnp.maximum(h, 0.0)
    core = jnp.dot(h.astype(BF16), wff2_t_ref[...],
                   preferred_element_type=jnp.float32) + bff2_ref[...]

    z = y + core
    mu2 = jnp.mean(z, axis=-1, keepdims=True)
    var2 = jnp.mean((z - mu2) ** 2, axis=-1, keepdims=True)
    o_ref[...] = (z - mu2) * jax.lax.rsqrt(var2 + LN_EPS) * g2_ref[...] + b2_ref[...]


# ------------------------------- glue (JAX) ---------------------------------

def _linear(x, wt, out_dtype, *, vmem, single_buffer, row_tile=None):
    """Row-tiled x @ w^T with the weight block resident (optionally 1-buffered)."""
    n, dm = x.shape
    nout = wt.shape[1]
    tr = _row_tile(n, row_tile)
    n_pad = _round_up(n, tr)
    xp = x if n_pad == n else jnp.pad(x, ((0, n_pad - n), (0, 0)))
    out = pl.pallas_call(
        _linear_kernel,
        grid=(n_pad // tr,),
        in_specs=[pl.BlockSpec((tr, dm), lambda i: (i, 0)),
                  _resident((dm, nout), single_buffer)],
        out_specs=pl.BlockSpec((tr, nout), lambda i: (i, 0)),
        out_shape=jax.ShapeDtypeStruct((n_pad, nout), out_dtype),
        compiler_params=pltpu.CompilerParams(
            dimension_semantics=("parallel",), vmem_limit_bytes=vmem),
    )(xp, wt)
    return out if n_pad == n else out[:n]


def prepare_params(p, d_head):
    """One-time weight prep: pre-transpose, pre-scale q columns by 1/sqrt(d_head),
    and cast matmul weights to bf16."""
    scale = 1.0 / (float(d_head) ** 0.5)
    wqkv_t = p['w_qkv'].T.astype(F32)                     # [DM, 3*HD]
    hd = wqkv_t.shape[1] // 3
    wqkv_t = wqkv_t.at[:, :hd].multiply(scale)            # fold scale into q
    return {
        'wqkv_t': wqkv_t.astype(BF16),
        'wr_t':   p['w_r'].T.astype(BF16),
        'wo_t':   p['w_o'].T.astype(BF16),
        'wff1_t': p['w_ff1'].T.astype(BF16),
        'wff2_t': p['w_ff2'].T.astype(BF16),
        'bff1':   p['b_ff1'].reshape(1, -1).astype(F32),
        'bff2':   p['b_ff2'].reshape(1, -1).astype(F32),
        'ln1_g':  p['ln1_g'].reshape(1, -1).astype(F32),
        'ln1_b':  p['ln1_b'].reshape(1, -1).astype(F32),
        'ln2_g':  p['ln2_g'].reshape(1, -1).astype(F32),
        'ln2_b':  p['ln2_b'].reshape(1, -1).astype(F32),
    }


def decoder_layer_forward(w, r, r_w_bias, r_r_bias, dec_attn_mask, pp,
                          *, row_tile=None, q_tile=None,
                          single_buffer_weights=True, roll_mode=None):
    """RelPartialLearnableDecoderLayer forward (mems=None, pre_lnorm=False,
    use_cache=False, strictly causal decoder mask)."""
    Q, B, DM = w.shape
    R = r.shape[0]
    H, DH = r_w_bias.shape
    HD = H * DH
    DI = pp['wff1_t'].shape[1]
    scale = 1.0 / (float(DH) ** 0.5)
    assert R == Q, "mems / past_key_values path not supported: rlen must equal qlen"
    if dec_attn_mask is not None:
        assert dec_attn_mask.shape == (Q, Q)
    # TODO(synk): only the standard strictly-causal mems=None mask is supported;
    # the mask is rebuilt in-kernel from iotas (no [Q,K] mask DMA).  3-D /
    # memory-extended masks need a masked path plus a non-circular rel-shift.

    mode = roll_mode if roll_mode is not None else _roll_mode()
    vmem = _vmem_limit_bytes()
    sb = single_buffer_weights

    n_rows = B * Q
    # Batch-major rows end-to-end; single small relayout at the layer boundary.
    w2d = jnp.transpose(w, (1, 0, 2)).reshape(n_rows, DM)
    rwb2d = (r_w_bias.reshape(1, HD) * scale).astype(F32)   # scale pre-folded
    rrb2d = (r_r_bias.reshape(1, HD) * scale).astype(F32)

    # --- qkv_net / r_net projections: row-tiled, resident weights -------------
    w_heads = _linear(w2d, pp['wqkv_t'], BF16, vmem=vmem, single_buffer=sb,
                      row_tile=row_tile)                     # [B*Q, 3*HD]
    r_head_k = _linear(r, pp['wr_t'], BF16, vmem=vmem, single_buffer=sb)  # [R, HD]

    # --- fused rel-attention: scores + rel_shift + mask + softmax + PV --------
    TQ = _q_tile(Q, q_tile)
    qkv_b = w_heads.reshape(B, Q, 3 * HD)                    # free (batch-major)
    av = pl.pallas_call(
        functools.partial(_attn_kernel, n_head=H, d_head=DH, qlen=Q,
                          roll_mode=mode),
        grid=(B, Q // TQ),
        in_specs=[
            pl.BlockSpec((None, TQ, 3 * HD), lambda b, qt: (b, qt, 0)),  # q rows
            pl.BlockSpec((None, Q, 3 * HD), lambda b, qt: (b, 0, 0)),    # k/v rows
            _resident((R, HD), sb),                                      # r_head_k
            _resident((1, HD), sb),                                      # r_w_bias
            _resident((1, HD), sb),                                      # r_r_bias
        ],
        out_specs=pl.BlockSpec((None, TQ, HD), lambda b, qt: (b, qt, 0)),
        out_shape=jax.ShapeDtypeStruct((B, Q, HD), BF16),
        compiler_params=pltpu.CompilerParams(
            dimension_semantics=("parallel", "parallel"),
            vmem_limit_bytes=vmem),
    )(qkv_b, qkv_b, r_head_k, rwb2d, rrb2d)

    # --- o_net + LN + PositionwiseFF + LN: row-tiled, resident weights --------
    av2d = av.reshape(n_rows, HD)                            # free, lane-dense
    TR = _row_tile(n_rows, row_tile)
    n_pad = _round_up(n_rows, TR)
    if n_pad != n_rows:
        av2d = jnp.pad(av2d, ((0, n_pad - n_rows), (0, 0)))
        w2d_p = jnp.pad(w2d, ((0, n_pad - n_rows), (0, 0)))
    else:
        w2d_p = w2d
    out2d = pl.pallas_call(
        _post_kernel,
        grid=(n_pad // TR,),
        in_specs=[
            pl.BlockSpec((TR, HD), lambda i: (i, 0)),
            pl.BlockSpec((TR, DM), lambda i: (i, 0)),
            _resident((HD, DM), sb),
            _resident((1, DM), sb),
            _resident((1, DM), sb),
            _resident((DM, DI), sb),
            _resident((1, DI), sb),
            _resident((DI, DM), sb),
            _resident((1, DM), sb),
            _resident((1, DM), sb),
            _resident((1, DM), sb),
        ],
        out_specs=pl.BlockSpec((TR, DM), lambda i: (i, 0)),
        out_shape=jax.ShapeDtypeStruct((n_pad, DM), F32),
        compiler_params=pltpu.CompilerParams(
            dimension_semantics=("parallel",), vmem_limit_bytes=vmem),
    )(av2d, w2d_p, pp['wo_t'], pp['ln1_g'], pp['ln1_b'],
      pp['wff1_t'], pp['bff1'], pp['wff2_t'], pp['bff2'],
      pp['ln2_g'], pp['ln2_b'])
    if n_pad != n_rows:
        out2d = out2d[:n_rows]

    out = jnp.transpose(out2d.reshape(B, Q, DM), (1, 0, 2))
    present_key_values = None                                # use_cache=False
    return out, present_key_values


# ---------------------------- pure-JAX reference -----------------------------

def _rel_shift_ref(x):
    B, H, Q, R = x.shape
    zero_pad = jnp.zeros((B, H, Q, 1), x.dtype)
    x_padded = jnp.concatenate([zero_pad, x], axis=3)
    x_padded = x_padded.reshape(B, H, R + 1, Q)
    return x_padded[:, :, 1:, :].reshape(B, H, Q, R)


def _layer_norm(x, g, b):
    mu = jnp.mean(x, axis=-1, keepdims=True)
    var = jnp.mean((x - mu) ** 2, axis=-1, keepdims=True)
    return (x - mu) / jnp.sqrt(var + LN_EPS) * g + b


def reference_forward(w, r, r_w_bias, r_r_bias, attn_mask, p):
    with jax.default_matmul_precision("highest"):
        Q, B, DM = w.shape
        R = r.shape[0]
        H, DH = r_w_bias.shape
        scale = 1.0 / (DH ** 0.5)
        w_heads = w @ p['w_qkv'].T
        r_head_k = r @ p['w_r'].T
        hq, hk, hv = jnp.split(w_heads, 3, axis=-1)
        hq = hq.reshape(Q, B, H, DH)
        hk = hk.reshape(Q, B, H, DH)
        hv = hv.reshape(Q, B, H, DH)
        rk = r_head_k.reshape(R, H, DH)
        AC = jnp.einsum('ibnd,jbnd->bnij', hq + r_w_bias, hk)
        BD = jnp.einsum('ibnd,jnd->bnij', hq + r_r_bias, rk)
        BD = _rel_shift_ref(BD)
        score = scale * (AC + BD)
        score = jnp.where(attn_mask[None, None] > 0, -jnp.inf, score)
        prob = jax.nn.softmax(score, axis=3)
        av = jnp.einsum('bnij,jbnd->ibnd', prob, hv).reshape(Q, B, H * DH)
        attn_out = av @ p['w_o'].T
        out1 = _layer_norm(w + attn_out, p['ln1_g'], p['ln1_b'])
        core = jax.nn.relu(out1 @ p['w_ff1'].T + p['b_ff1']) @ p['w_ff2'].T + p['b_ff2']
        return _layer_norm(out1 + core, p['ln2_g'], p['ln2_b'])


# ---------------------------------- params -----------------------------------

def init_params(key, n_head, d_model, d_head, d_inner):
    ks = jax.random.split(key, 7)
    s = 0.125
    return {
        'w_qkv': jax.random.normal(ks[0], (3 * n_head * d_head, d_model), F32) * s,
        'w_r':   jax.random.normal(ks[1], (n_head * d_head, d_model), F32) * s,
        'w_o':   jax.random.normal(ks[2], (d_model, n_head * d_head), F32) * s,
        'ln1_g': jnp.ones((d_model,), F32),
        'ln1_b': jnp.zeros((d_model,), F32),
        'w_ff1': jax.random.normal(ks[3], (d_inner, d_model), F32) * s,
        'b_ff1': jax.random.normal(ks[4], (d_inner,), F32) * 0.1,
        'w_ff2': jax.random.normal(ks[5], (d_model, d_inner), F32) * s,
        'b_ff2': jax.random.normal(ks[6], (d_model,), F32) * 0.1,
        'ln2_g': jnp.ones((d_model,), F32),
        'ln2_b': jnp.zeros((d_model,), F32),
    }


if __name__ == "__main__":
    n_head, d_model, d_head, d_inner = 2, 32, 8, 64
    qlen, bsz = 16, 2

    key = jax.random.PRNGKey(0)
    k1, k2, k3, k4, kp = jax.random.split(key, 5)
    dec_inp = jax.random.normal(k1, (qlen, bsz, d_model), F32)    # [qlen, bsz, d_model]
    r = jax.random.normal(k2, (qlen, d_model), F32)               # rlen == klen == qlen
    r_w_bias = jax.random.normal(k3, (n_head, d_head), F32) * 0.5
    r_r_bias = jax.random.normal(k4, (n_head, d_head), F32) * 0.5
    params = init_params(kp, n_head, d_model, d_head, d_inner)
    prepped = prepare_params(params, d_head)

    # standard causal mask: mask[i, j] = 1 where j > i  (torch.triu(..., diagonal=1))
    idx = jnp.arange(qlen)
    dec_attn_mask = (idx[None, :] > idx[:, None]).astype(F32)

    _roll_mode()      # probe pltpu.roll direction eagerly, before any jit trace

    ref = reference_forward(dec_inp, r, r_w_bias, r_r_bias, dec_attn_mask, params)

    def _run(**static_kwargs):
        fwd = jax.jit(functools.partial(decoder_layer_forward, **static_kwargs))
        out, present = fwd(dec_inp, r, r_w_bias, r_r_bias, dec_attn_mask, prepped)
        out = jax.block_until_ready(out)
        assert out.shape == (qlen, bsz, d_model) and present is None
        err = float(jnp.max(jnp.abs(out - ref)))
        assert bool(jnp.allclose(out, ref, atol=5e-2, rtol=5e-2)), f"max abs err {err}"
        return out

    attempts = [
        dict(single_buffer_weights=True),                       # pl.Buffered(1) weights
        dict(single_buffer_weights=False),                      # default double buffering
        dict(single_buffer_weights=False, roll_mode="concat"),  # no pltpu.roll (safe)
    ]
    out, last_exc = None, None
    for kw in attempts:
        try:
            out = _run(**kw)
            break
        except Exception as e:          # fall through to the next configuration
            last_exc = e
    if out is None:
        raise last_exc
    print("KERNEL_OK")
</pallas_src>

<mosaic_0001>
module attributes {stable_mosaic.version = 11 : i64} {
  func.func @_linear_kernel(%arg0: i32, %arg1: memref<16x32xf32, #tpu.memory_space<vmem>>, %arg2: memref<32x16xbf16, #tpu.memory_space<vmem>>, %arg3: memref<16x16xbf16, #tpu.memory_space<vmem>>) attributes {dimension_semantics = [#tpu.dimension_semantics<parallel>], iteration_bounds = array<i64: 1>, scalar_prefetch = 0 : i64, scratch_operands = 0 : i64, tpu.core_type = #tpu.core_type<tc>, window_params = [{transform_indices = @transform_0, window_bounds = array<i64: 16, 32>}, {pipeline_mode = #tpu.pipeline_mode<synchronous>, transform_indices = @transform_1, window_bounds = array<i64: 32, 16>}, {transform_indices = @transform_2, window_bounds = array<i64: 16, 16>}]} {
    %c0 = arith.constant 0 : index
    %c0_0 = arith.constant 0 : index
    %0 = vector.load %arg1[%c0, %c0_0] : memref<16x32xf32, #tpu.memory_space<vmem>>, vector<16x32xf32>
    %1 = arith.truncf %0 : vector<16x32xf32> to vector<16x32xbf16>
    %c0_1 = arith.constant 0 : index
    %c0_2 = arith.constant 0 : index
    %2 = vector.load %arg2[%c0_1, %c0_2] : memref<32x16xbf16, #tpu.memory_space<vmem>>, vector<32x16xbf16>
    %cst = arith.constant dense<0.000000e+00> : vector<16x16xf32>
    %3 = tpu.matmul %1, %2, %cst {dimension_numbers = #tpu.dot_dimension_numbers<[1], [0], [0], [1], [0, 0, 1, 1], [], []>} : vector<16x32xbf16>, vector<32x16xbf16>, vector<16x16xf32> -> vector<16x16xf32>
    %4 = arith.truncf %3 : vector<16x16xf32> to vector<16x16xbf16>
    %c0_3 = arith.constant 0 : index
    %c0_4 = arith.constant 0 : index
    %5 = vector.load %arg3[%c0_3, %c0_4] : memref<16x16xbf16, #tpu.memory_space<vmem>>, vector<16x16xbf16>
    tpu.vector_store %arg3[%c0_3, %c0_4], %4 {strides = array<i32>} : memref<16x16xbf16, #tpu.memory_space<vmem>>, vector<16x16xbf16>,
    return
  }
  func.func @transform_0(%arg0: i32) -> (i32, i32) {
    %c0_i32 = arith.constant 0 : i32
    %c0_i32_0 = arith.constant 0 : i32
    return %arg0, %c0_i32 : i32, i32
  }
  func.func @transform_1(%arg0: i32) -> (i32, i32) {
    %c0_i32 = arith.constant 0 : i32
    %c0_i32_0 = arith.constant 0 : i32
    %c0_i32_1 = arith.constant 0 : i32
    return %c0_i32, %c0_i32_0 : i32, i32
  }
  func.func @transform_2(%arg0: i32) -> (i32, i32) {
    %c0_i32 = arith.constant 0 : i32
    %c0_i32_0 = arith.constant 0 : i32
    return %arg0, %c0_i32 : i32, i32
  }
}

module attributes {stable_mosaic.version = 11 : i64} {
  func.func @_linear_kernel(%arg0: i32, %arg1: memref<32x32xf32, #tpu.memory_space<vmem>>, %arg2: memref<32x48xbf16, #tpu.memory_space<vmem>>, %arg3: memref<32x48xbf16, #tpu.memory_space<vmem>>) attributes {dimension_semantics = [#tpu.dimension_semantics<parallel>], iteration_bounds = array<i64: 1>, scalar_prefetch = 0 : i64, scratch_operands = 0 : i64, tpu.core_type = #tpu.core_type<tc>, window_params = [{transform_indices = @transform_0, window_bounds = array<i64: 32, 32>}, {pipeline_mode = #tpu.pipeline_mode<synchronous>, transform_indices = @transform_1, window_bounds = array<i64: 32, 48>}, {transform_indices = @transform_2, window_bounds = array<i64: 32, 48>}]} {
    %c0 = arith.constant 0 : index
    %c0_0 = arith.constant 0 : index
    %0 = vector.load %arg1[%c0, %c0_0] : memref<32x32xf32, #tpu.memory_space<vmem>>, vector<32x32xf32>
    %1 = arith.truncf %0 : vector<32x32xf32> to vector<32x32xbf16>
    %c0_1 = arith.constant 0 : index
    %c0_2 = arith.constant 0 : index
    %2 = vector.load %arg2[%c0_1, %c0_2] : memref<32x48xbf16, #tpu.memory_space<vmem>>, vector<32x48xbf16>
    %cst = arith.constant dense<0.000000e+00> : vector<32x48xf32>
    %3 = tpu.matmul %1, %2, %cst {dimension_numbers = #tpu.dot_dimension_numbers<[1], [0], [0], [1], [0, 0, 1, 1], [], []>} : vector<32x32xbf16>, vector<32x48xbf16>, vector<32x48xf32> -> vector<32x48xf32>
    %4 = arith.truncf %3 : vector<32x48xf32> to vector<32x48xbf16>
    %c0_3 = arith.constant 0 : index
    %c0_4 = arith.constant 0 : index
    %5 = vector.load %arg3[%c0_3, %c0_4] : memref<32x48xbf16, #tpu.memory_space<vmem>>, vector<32x48xbf16>
    tpu.vector_store %arg3[%c0_3, %c0_4], %4 {strides = array<i32>} : memref<32x48xbf16, #tpu.memory_space<vmem>>, vector<32x48xbf16>,
    return
  }
  func.func @transform_0(%arg0: i32) -> (i32, i32) {
    %c0_i32 = arith.constant 0 : i32
    %c0_i32_0 = arith.constant 0 : i32
    return %arg0, %c0_i32 : i32, i32
  }
  func.func @transform_1(%arg0: i32) -> (i32, i32) {
    %c0_i32 = arith.constant 0 : i32
    %c0_i32_0 = arith.constant 0 : i32
    %c0_i32_1 = arith.constant 0 : i32
    return %c0_i32, %c0_i32_0 : i32, i32
  }
  func.func @transform_2(%arg0: i32) -> (i32, i32) {
    %c0_i32 = arith.constant 0 : i32
    %c0_i32_0 = arith.constant 0 : i32
    return %arg0, %c0_i32 : i32, i32
  }
}

module attributes {stable_mosaic.version = 11 : i64} {
  func.func @_attn_kernel(%arg0: i32, %arg1: i32, %arg2: memref<1x16x48xbf16, #tpu.memory_space<vmem>>, %arg3: memref<1x16x48xbf16, #tpu.memory_space<vmem>>, %arg4: memref<16x16xbf16, #tpu.memory_space<vmem>>, %arg5: memref<1x16xf32, #tpu.memory_space<vmem>>, %arg6: memref<1x16xf32, #tpu.memory_space<vmem>>, %arg7: memref<1x16x16xbf16, #tpu.memory_space<vmem>>) attributes {dimension_semantics = [#tpu.dimension_semantics<parallel>, #tpu.dimension_semantics<parallel>], iteration_bounds = array<i64: 2, 1>, scalar_prefetch = 0 : i64, scratch_operands = 0 : i64, tpu.core_type = #tpu.core_type<tc>, window_params = [{transform_indices = @transform_0, window_bounds = array<i64: 1, 16, 48>}, {transform_indices = @transform_1, window_bounds = array<i64: 1, 16, 48>}, {pipeline_mode = #tpu.pipeline_mode<synchronous>, transform_indices = @transform_2, window_bounds = array<i64: 16, 16>}, {pipeline_mode = #tpu.pipeline_mode<synchronous>, transform_indices = @transform_3, window_bounds = array<i64: 1, 16>}, {pipeline_mode = #tpu.pipeline_mode<synchronous>, transform_indices = @transform_4, window_bounds = array<i64: 1, 16>}, {transform_indices = @transform_5, window_bounds = array<i64: 1, 16, 16>}]} {
    %c16_i32 = arith.constant 16 : i32
    %0 = arith.muli %arg1, %c16_i32 : i32
    %1 = tpu.iota {dimensions = array<i32: 0>} : vector<16x1xi32>
    %2 = vector.broadcast %0 : i32 to vector<16x1xi32>
    %3 = arith.addi %2, %1 : vector<16x1xi32>
    %4 = tpu.iota {dimensions = array<i32: 1>} : vector<16x16xi32>
    %5 = vector.broadcast %3 : vector<16x1xi32> to vector<16x16xi32>
    %6 = arith.cmpi sgt, %4, %5 : vector<16x16xi32>
    %c15_i32 = arith.constant 15 : i32
    %7 = vector.broadcast %c15_i32 : i32 to vector<16x1xi32>
    %8 = arith.subi %7, %3 : vector<16x1xi32>
    %c0 = arith.constant 0 : index
    %c0_0 = arith.constant 0 : index
    %9 = vector.load %arg5[%c0, %c0_0] : memref<1x16xf32, #tpu.memory_space<vmem>>, vector<1x16xf32>
    %c0_1 = arith.constant 0 : index
    %c0_2 = arith.constant 0 : index
    %10 = vector.load %arg6[%c0_1, %c0_2] : memref<1x16xf32, #tpu.memory_space<vmem>>, vector<1x16xf32>
    %c0_3 = arith.constant 0 : index
    %c0_4 = arith.constant 0 : index
    %c0_5 = arith.constant 0 : index
    %11 = vector.load %arg2[%c0_3, %c0_4, %c0_5] : memref<1x16x48xbf16, #tpu.memory_space<vmem>>, vector<1x16x8xbf16>
    %12 = vector.shape_cast %11 : vector<1x16x8xbf16> to vector<16x8xbf16>
    %13 = arith.extf %12 : vector<16x8xbf16> to vector<16x8xf32>
    %c0_6 = arith.constant 0 : index
    %c0_7 = arith.constant 0 : index
    %c16 = arith.constant 16 : index
    %14 = vector.load %arg3[%c0_6, %c0_7, %c16] : memref<1x16x48xbf16, #tpu.memory_space<vmem>>, vector<1x16x8xbf16>
    %15 = vector.shape_cast %14 : vector<1x16x8xbf16> to vector<16x8xbf16>
    %c0_8 = arith.constant 0 : index
    %c0_9 = arith.constant 0 : index
    %c32 = arith.constant 32 : index
    %16 = vector.load %arg3[%c0_8, %c0_9, %c32] : memref<1x16x48xbf16, #tpu.memory_space<vmem>>, vector<1x16x8xbf16>
    %17 = vector.shape_cast %16 : vector<1x16x8xbf16> to vector<16x8xbf16>
    %c0_10 = arith.constant 0 : index
    %c0_11 = arith.constant 0 : index
    %18 = vector.load %arg4[%c0_10, %c0_11] : memref<16x16xbf16, #tpu.memory_space<vmem>>, vector<16x8xbf16>
    %19 = vector.extract_strided_slice %9 {offsets = [0, 0], sizes = [1, 8], strides = [1, 1]} : vector<1x16xf32> to vector<1x8xf32>
    %20 = vector.broadcast %19 : vector<1x8xf32> to vector<16x8xf32>
    %21 = arith.addf %13, %20 : vector<16x8xf32>
    %22 = arith.truncf %21 : vector<16x8xf32> to vector<16x8xbf16>
    %23 = vector.extract_strided_slice %10 {offsets = [0, 0], sizes = [1, 8], strides = [1, 1]} : vector<1x16xf32> to vector<1x8xf32>
    %24 = vector.broadcast %23 : vector<1x8xf32> to vector<16x8xf32>
    %25 = arith.addf %13, %24 : vector<16x8xf32>
    %26 = arith.truncf %25 : vector<16x8xf32> to vector<16x8xbf16>
    %cst = arith.constant dense<0.000000e+00> : vector<16x16xf32>
    %27 = tpu.matmul %22, %15, %cst {dimension_numbers = #tpu.dot_dimension_numbers<[1], [1], [0], [0], [0, 0, 1, 0], [], []>} : vector<16x8xbf16>, vector<16x8xbf16>, vector<16x16xf32> -> vector<16x16xf32>
    %cst_12 = arith.constant dense<0.000000e+00> : vector<16x16xf32>
    %28 = tpu.matmul %26, %18, %cst_12 {dimension_numbers = #tpu.dot_dimension_numbers<[1], [1], [0], [0], [0, 0, 1, 0], [], []>} : vector<16x8xbf16>, vector<16x8xbf16>, vector<16x16xf32> -> vector<16x16xf32>
    %29 = vector.extract_strided_slice %28 {offsets = [0, 1], sizes = [16, 15], strides = [1, 1]} : vector<16x16xf32> to vector<16x15xf32>
    %30 = vector.extract_strided_slice %28 {offsets = [0, 0], sizes = [16, 1], strides = [1, 1]} : vector<16x16xf32> to vector<16x1xf32>
    %31 = tpu.concatenate %29, %30 in 1 : vector<16x15xf32>, vector<16x1xf32> -> vector<16x16xf32>
    %c0_i32 = arith.constant 0 : i32
    %32 = vector.broadcast %c0_i32 : i32 to vector<16x1xi32>
    %33 = arith.shrsi %8, %32 : vector<16x1xi32>
    %c1_i32 = arith.constant 1 : i32
    %34 = vector.broadcast %c1_i32 : i32 to vector<16x1xi32>
    %35 = arith.andi %33, %34 : vector<16x1xi32>
    %c1_i32_13 = arith.constant 1 : i32
    %36 = vector.broadcast %c1_i32_13 : i32 to vector<16x1xi32>
    %37 = arith.cmpi eq, %35, %36 : vector<16x1xi32>
    %38 = vector.shape_cast %37 : vector<16x1xi1> to vector<16x1xi1>
    %39 = vector.broadcast %38 : vector<16x1xi1> to vector<16x16xi1>
    %40 = arith.select %39, %31, %28 : vector<16x16xi1>, vector<16x16xf32>
    %41 = vector.extract_strided_slice %40 {offsets = [0, 2], sizes = [16, 14], strides = [1, 1]} : vector<16x16xf32> to vector<16x14xf32>
    %42 = vector.extract_strided_slice %40 {offsets = [0, 0], sizes = [16, 2], strides = [1, 1]} : vector<16x16xf32> to vector<16x2xf32>
    %43 = tpu.concatenate %41, %42 in 1 : vector<16x14xf32>, vector<16x2xf32> -> vector<16x16xf32>
    %c1_i32_14 = arith.constant 1 : i32
    %44 = vector.broadcast %c1_i32_14 : i32 to vector<16x1xi32>
    %45 = arith.shrsi %8, %44 : vector<16x1xi32>
    %c1_i32_15 = arith.constant 1 : i32
    %46 = vector.broadcast %c1_i32_15 : i32 to vector<16x1xi32>
    %47 = arith.andi %45, %46 : vector<16x1xi32>
    %c1_i32_16 = arith.constant 1 : i32
    %48 = vector.broadcast %c1_i32_16 : i32 to vector<16x1xi32>
    %49 = arith.cmpi eq, %47, %48 : vector<16x1xi32>
    %50 = vector.shape_cast %49 : vector<16x1xi1> to vector<16x1xi1>
    %51 = vector.broadcast %50 : vector<16x1xi1> to vector<16x16xi1>
    %52 = arith.select %51, %43, %40 : vector<16x16xi1>, vector<16x16xf32>
    %53 = vector.extract_strided_slice %52 {offsets = [0, 4], sizes = [16, 12], strides = [1, 1]} : vector<16x16xf32> to vector<16x12xf32>
    %54 = vector.extract_strided_slice %52 {offsets = [0, 0], sizes = [16, 4], strides = [1, 1]} : vector<16x16xf32> to vector<16x4xf32>
    %55 = tpu.concatenate %53, %54 in 1 : vector<16x12xf32>, vector<16x4xf32> -> vector<16x16xf32>
    %c2_i32 = arith.constant 2 : i32
    %56 = vector.broadcast %c2_i32 : i32 to vector<16x1xi32>
    %57 = arith.shrsi %8, %56 : vector<16x1xi32>
    %c1_i32_17 = arith.constant 1 : i32
    %58 = vector.broadcast %c1_i32_17 : i32 to vector<16x1xi32>
    %59 = arith.andi %57, %58 : vector<16x1xi32>
    %c1_i32_18 = arith.constant 1 : i32
    %60 = vector.broadcast %c1_i32_18 : i32 to vector<16x1xi32>
    %61 = arith.cmpi eq, %59, %60 : vector<16x1xi32>
    %62 = vector.shape_cast %61 : vector<16x1xi1> to vector<16x1xi1>
    %63 = vector.broadcast %62 : vector<16x1xi1> to vector<16x16xi1>
    %64 = arith.select %63, %55, %52 : vector<16x16xi1>, vector<16x16xf32>
    %65 = vector.extract_strided_slice %64 {offsets = [0, 8], sizes = [16, 8], strides = [1, 1]} : vector<16x16xf32> to vector<16x8xf32>
    %66 = vector.extract_strided_slice %64 {offsets = [0, 0], sizes = [16, 8], strides = [1, 1]} : vector<16x16xf32> to vector<16x8xf32>
    %67 = tpu.concatenate %65, %66 in 1 : vector<16x8xf32>, vector<16x8xf32> -> vector<16x16xf32>
    %c3_i32 = arith.constant 3 : i32
    %68 = vector.broadcast %c3_i32 : i32 to vector<16x1xi32>
    %69 = arith.shrsi %8, %68 : vector<16x1xi32>
    %c1_i32_19 = arith.constant 1 : i32
    %70 = vector.broadcast %c1_i32_19 : i32 to vector<16x1xi32>
    %71 = arith.andi %69, %70 : vector<16x1xi32>
    %c1_i32_20 = arith.constant 1 : i32
    %72 = vector.broadcast %c1_i32_20 : i32 to vector<16x1xi32>
    %73 = arith.cmpi eq, %71, %72 : vector<16x1xi32>
    %74 = vector.shape_cast %73 : vector<16x1xi1> to vector<16x1xi1>
    %75 = vector.broadcast %74 : vector<16x1xi1> to vector<16x16xi1>
    %76 = arith.select %75, %67, %64 : vector<16x16xi1>, vector<16x16xf32>
    %77 = arith.addf %27, %76 : vector<16x16xf32>
    %cst_21 = arith.constant -1.000000e+30 : f32
    %78 = vector.broadcast %cst_21 : f32 to vector<16x16xf32>
    %79 = arith.select %6, %78, %77 : vector<16x16xi1>, vector<16x16xf32>
    %cst_22 = arith.constant dense<0xFF800000> : vector<16xf32>
    %80 = vector.multi_reduction <maximumf>, %79, %cst_22 [1] : vector<16x16xf32> to vector<16xf32>
    %81 = vector.shape_cast %80 : vector<16xf32> to vector<16x1xf32>
    %82 = vector.broadcast %81 : vector<16x1xf32> to vector<16x16xf32>
    %83 = arith.subf %79, %82 : vector<16x16xf32>
    %84 = math.exp %83 : vector<16x16xf32>
    %cst_23 = arith.constant dense<0.000000e+00> : vector<16xf32>
    %85 = vector.multi_reduction <add>, %84, %cst_23 [1] : vector<16x16xf32> to vector<16xf32>
    %86 = vector.shape_cast %85 : vector<16xf32> to vector<16x1xf32>
    %87 = tpu.reciprocal %86 {approx = true} : vector<16x1xf32> -> vector<16x1xf32>
    %88 = vector.broadcast %87 : vector<16x1xf32> to vector<16x16xf32>
    %89 = arith.mulf %84, %88 : vector<16x16xf32>
    %90 = arith.truncf %89 : vector<16x16xf32> to vector<16x16xbf16>
    %cst_24 = arith.constant dense<0.000000e+00> : vector<16x8xf32>
    %91 = tpu.matmul %90, %17, %cst_24 {dimension_numbers = #tpu.dot_dimension_numbers<[1], [0], [0], [1], [0, 0, 1, 1], [], []>} : vector<16x16xbf16>, vector<16x8xbf16>, vector<16x8xf32> -> vector<16x8xf32>
    %92 = arith.truncf %91 : vector<16x8xf32> to vector<16x8xbf16>
    %c0_25 = arith.constant 0 : index
    %c0_26 = arith.constant 0 : index
    %c0_27 = arith.constant 0 : index
    %93 = vector.load %arg7[%c0_25, %c0_26, %c0_27] : memref<1x16x16xbf16, #tpu.memory_space<vmem>>, vector<1x16x8xbf16>
    %94 = vector.shape_cast %93 : vector<1x16x8xbf16> to vector<16x8xbf16>
    %95 = vector.shape_cast %92 : vector<16x8xbf16> to vector<1x16x8xbf16>
    tpu.vector_store %arg7[%c0_25, %c0_26, %c0_27], %95 {strides = array<i32>} : memref<1x16x16xbf16, #tpu.memory_space<vmem>>, vector<1x16x8xbf16>,
    %c0_28 = arith.constant 0 : index
    %c0_29 = arith.constant 0 : index
    %c8 = arith.constant 8 : index
    %96 = vector.load %arg2[%c0_28, %c0_29, %c8] : memref<1x16x48xbf16, #tpu.memory_space<vmem>>, vector<1x16x8xbf16>
    %97 = vector.shape_cast %96 : vector<1x16x8xbf16> to vector<16x8xbf16>
    %98 = arith.extf %97 : vector<16x8xbf16> to vector<16x8xf32>
    %c0_30 = arith.constant 0 : index
    %c0_31 = arith.constant 0 : index
    %c24 = arith.constant 24 : index
    %99 = vector.load %arg3[%c0_30, %c0_31, %c24] : memref<1x16x48xbf16, #tpu.memory_space<vmem>>, vector<1x16x8xbf16>
    %100 = vector.shape_cast %99 : vector<1x16x8xbf16> to vector<16x8xbf16>
    %c0_32 = arith.constant 0 : index
    %c0_33 = arith.constant 0 : index
    %c40 = arith.constant 40 : index
    %101 = vector.load %arg3[%c0_32, %c0_33, %c40] : memref<1x16x48xbf16, #tpu.memory_space<vmem>>, vector<1x16x8xbf16>
    %102 = vector.shape_cast %101 : vector<1x16x8xbf16> to vector<16x8xbf16>
    %c0_34 = arith.constant 0 : index
    %c8_35 = arith.constant 8 : index
    %103 = vector.load %arg4[%c0_34, %c8_35] : memref<16x16xbf16, #tpu.memory_space<vmem>>, vector<16x8xbf16>
    %104 = vector.extract_strided_slice %9 {offsets = [0, 8], sizes = [1, 8], strides = [1, 1]} : vector<1x16xf32> to vector<1x8xf32>
    %105 = vector.broadcast %104 : vector<1x8xf32> to vector<16x8xf32>
    %106 = arith.addf %98, %105 : vector<16x8xf32>
    %107 = arith.truncf %106 : vector<16x8xf32> to vector<16x8xbf16>
    %108 = vector.extract_strided_slice %10 {offsets = [0, 8], sizes = [1, 8], strides = [1, 1]} : vector<1x16xf32> to vector<1x8xf32>
    %109 = vector.broadcast %108 : vector<1x8xf32> to vector<16x8xf32>
    %110 = arith.addf %98, %109 : vector<16x8xf32>
    %111 = arith.truncf %110 : vector<16x8xf32> to vector<16x8xbf16>
    %cst_36 = arith.constant dense<0.000000e+00> : vector<16x16xf32>
    %112 = tpu.matmul %107, %100, %cst_36 {dimension_numbers = #tpu.dot_dimension_numbers<[1], [1], [0], [0], [0, 0, 1, 0], [], []>} : vector<16x8xbf16>, vector<16x8xbf16>, vector<16x16xf32> -> vector<16x16xf32>
    %cst_37 = arith.constant dense<0.000000e+00> : vector<16x16xf32>
    %113 = tpu.matmul %111, %103, %cst_37 {dimension_numbers = #tpu.dot_dimension_numbers<[1], [1], [0], [0], [0, 0, 1, 0], [], []>} : vector<16x8xbf16>, vector<16x8xbf16>, vector<16x16xf32> -> vector<16x16xf32>
    %114 = vector.extract_strided_slice %113 {offsets = [0, 1], sizes = [16, 15], strides = [1, 1]} : vector<16x16xf32> to vector<16x15xf32>
    %115 = vector.extract_strided_slice %113 {offsets = [0, 0], sizes = [16, 1], strides = [1, 1]} : vector<16x16xf32> to vector<16x1xf32>
    %116 = tpu.concatenate %114, %115 in 1 : vector<16x15xf32>, vector<16x1xf32> -> vector<16x16xf32>
    %c0_i32_38 = arith.constant 0 : i32
    %117 = vector.broadcast %c0_i32_38 : i32 to vector<16x1xi32>
    %118 = arith.shrsi %8, %117 : vector<16x1xi32>
    %c1_i32_39 = arith.constant 1 : i32
    %119 = vector.broadcast %c1_i32_39 : i32 to vector<16x1xi32>
    %120 = arith.andi %118, %119 : vector<16x1xi32>
    %c1_i32_40 = arith.constant 1 : i32
    %121 = vector.broadcast %c1_i32_40 : i32 to vector<16x1xi32>
    %122 = arith.cmpi eq, %120, %121 : vector<16x1xi32>
    %123 = vector.shape_cast %122 : vector<16x1xi1> to vector<16x1xi1>
    %124 = vector.broadcast %123 : vector<16x1xi1> to vector<16x16xi1>
    %125 = arith.select %124, %116, %113 : vector<16x16xi1>, vector<16x16xf32>
    %126 = vector.extract_strided_slice %125 {offsets = [0, 2], sizes = [16, 14], strides = [1, 1]} : vector<16x16xf32> to vector<16x14xf32>
    %127 = vector.extract_strided_slice %125 {offsets = [0, 0], sizes = [16, 2], strides = [1, 1]} : vector<16x16xf32> to vector<16x2xf32>
    %128 = tpu.concatenate %126, %127 in 1 : vector<16x14xf32>, vector<16x2xf32> -> vector<16x16xf32>
    %c1_i32_41 = arith.constant 1 : i32
    %129 = vector.broadcast %c1_i32_41 : i32 to vector<16x1xi32>
    %130 = arith.shrsi %8, %129 : vector<16x1xi32>
    %c1_i32_42 = arith.constant 1 : i32
    %131 = vector.broadcast %c1_i32_42 : i32 to vector<16x1xi32>
    %132 = arith.andi %130, %131 : vector<16x1xi32>
    %c1_i32_43 = arith.constant 1 : i32
    %133 = vector.broadcast %c1_i32_43 : i32 to vector<16x1xi32>
    %134 = arith.cmpi eq, %132, %133 : vector<16x1xi32>
    %135 = vector.shape_cast %134 : vector<16x1xi1> to vector<16x1xi1>
    %136 = vector.broadcast %135 : vector<16x1xi1> to vector<16x16xi1>
    %137 = arith.select %136, %128, %125 : vector<16x16xi1>, vector<16x16xf32>
    %138 = vector.extract_strided_slice %137 {offsets = [0, 4], sizes = [16, 12], strides = [1, 1]} : vector<16x16xf32> to vector<16x12xf32>
    %139 = vector.extract_strided_slice %137 {offsets = [0, 0], sizes = [16, 4], strides = [1, 1]} : vector<16x16xf32> to vector<16x4xf32>
    %140 = tpu.concatenate %138, %139 in 1 : vector<16x12xf32>, vector<16x4xf32> -> vector<16x16xf32>
    %c2_i32_44 = arith.constant 2 : i32
    %141 = vector.broadcast %c2_i32_44 : i32 to vector<16x1xi32>
    %142 = arith.shrsi %8, %141 : vector<16x1xi32>
    %c1_i32_45 = arith.constant 1 : i32
    %143 = vector.broadcast %c1_i32_45 : i32 to vector<16x1xi32>
    %144 = arith.andi %142, %143 : vector<16x1xi32>
    %c1_i32_46 = arith.constant 1 : i32
    %145 = vector.broadcast %c1_i32_46 : i32 to vector<16x1xi32>
    %146 = arith.cmpi eq, %144, %145 : vector<16x1xi32>
    %147 = vector.shape_cast %146 : vector<16x1xi1> to vector<16x1xi1>
    %148 = vector.broadcast %147 : vector<16x1xi1> to vector<16x16xi1>
    %149 = arith.select %148, %140, %137 : vector<16x16xi1>, vector<16x16xf32>
    %150 = vector.extract_strided_slice %149 {offsets = [0, 8], sizes = [16, 8], strides = [1, 1]} : vector<16x16xf32> to vector<16x8xf32>
    %151 = vector.extract_strided_slice %149 {offsets = [0, 0], sizes = [16, 8], strides = [1, 1]} : vector<16x16xf32> to vector<16x8xf32>
    %152 = tpu.concatenate %150, %151 in 1 : vector<16x8xf32>, vector<16x8xf32> -> vector<16x16xf32>
    %c3_i32_47 = arith.constant 3 : i32
    %153 = vector.broadcast %c3_i32_47 : i32 to vector<16x1xi32>
    %154 = arith.shrsi %8, %153 : vector<16x1xi32>
    %c1_i32_48 = arith.constant 1 : i32
    %155 = vector.broadcast %c1_i32_48 : i32 to vector<16x1xi32>
    %156 = arith.andi %154, %155 : vector<16x1xi32>
    %c1_i32_49 = arith.constant 1 : i32
    %157 = vector.broadcast %c1_i32_49 : i32 to vector<16x1xi32>
    %158 = arith.cmpi eq, %156, %157 : vector<16x1xi32>
    %159 = vector.shape_cast %158 : vector<16x1xi1> to vector<16x1xi1>
    %160 = vector.broadcast %159 : vector<16x1xi1> to vector<16x16xi1>
    %161 = arith.select %160, %152, %149 : vector<16x16xi1>, vector<16x16xf32>
    %162 = arith.addf %112, %161 : vector<16x16xf32>
    %cst_50 = arith.constant -1.000000e+30 : f32
    %163 = vector.broadcast %cst_50 : f32 to vector<16x16xf32>
    %164 = arith.select %6, %163, %162 : vector<16x16xi1>, vector<16x16xf32>
    %cst_51 = arith.constant dense<0xFF800000> : vector<16xf32>
    %165 = vector.multi_reduction <maximumf>, %164, %cst_51 [1] : vector<16x16xf32> to vector<16xf32>
    %166 = vector.shape_cast %165 : vector<16xf32> to vector<16x1xf32>
    %167 = vector.broadcast %166 : vector<16x1xf32> to vector<16x16xf32>
    %168 = arith.subf %164, %167 : vector<16x16xf32>
    %169 = math.exp %168 : vector<16x16xf32>
    %cst_52 = arith.constant dense<0.000000e+00> : vector<16xf32>
    %170 = vector.multi_reduction <add>, %169, %cst_52 [1] : vector<16x16xf32> to vector<16xf32>
    %171 = vector.shape_cast %170 : vector<16xf32> to vector<16x1xf32>
    %172 = tpu.reciprocal %171 {approx = true} : vector<16x1xf32> -> vector<16x1xf32>
    %173 = vector.broadcast %172 : vector<16x1xf32> to vector<16x16xf32>
    %174 = arith.mulf %169, %173 : vector<16x16xf32>
    %175 = arith.truncf %174 : vector<16x16xf32> to vector<16x16xbf16>
    %cst_53 = arith.constant dense<0.000000e+00> : vector<16x8xf32>
    %176 = tpu.matmul %175, %102, %cst_53 {dimension_numbers = #tpu.dot_dimension_numbers<[1], [0], [0], [1], [0, 0, 1, 1], [], []>} : vector<16x16xbf16>, vector<16x8xbf16>, vector<16x8xf32> -> vector<16x8xf32>
    %177 = arith.truncf %176 : vector<16x8xf32> to vector<16x8xbf16>
    %c0_54 = arith.constant 0 : index
    %c0_55 = arith.constant 0 : index
    %c8_56 = arith.constant 8 : index
    %178 = vector.load %arg7[%c0_54, %c0_55, %c8_56] : memref<1x16x16xbf16, #tpu.memory_space<vmem>>, vector<1x16x8xbf16>
    %179 = vector.shape_cast %178 : vector<1x16x8xbf16> to vector<16x8xbf16>
    %180 = vector.shape_cast %177 : vector<16x8xbf16> to vector<1x16x8xbf16>
    tpu.vector_store %arg7[%c0_54, %c0_55, %c8_56], %180 {strides = array<i32>} : memref<1x16x16xbf16, #tpu.memory_space<vmem>>, vector<1x16x8xbf16>,
    return
  }
  func.func @transform_0(%arg0: i32, %arg1: i32) -> (i32, i32, i32) {
    %c0_i32 = arith.constant 0 : i32
    %c0_i32_0 = arith.constant 0 : i32
    return %arg0, %arg1, %c0_i32 : i32, i32, i32
  }
  func.func @transform_1(%arg0: i32, %arg1: i32) -> (i32, i32, i32) {
    %c0_i32 = arith.constant 0 : i32
    %c0_i32_0 = arith.constant 0 : i32
    %c0_i32_1 = arith.constant 0 : i32
    return %arg0, %c0_i32, %c0_i32_0 : i32, i32, i32
  }
  func.func @transform_2(%arg0: i32, %arg1: i32) -> (i32, i32) {
    %c0_i32 = arith.constant 0 : i32
    %c0_i32_0 = arith.constant 0 : i32
    %c0_i32_1 = arith.constant 0 : i32
    return %c0_i32, %c0_i32_0 : i32, i32
  }
  func.func @transform_3(%arg0: i32, %arg1: i32) -> (i32, i32) {
    %c0_i32 = arith.constant 0 : i32
    %c0_i32_0 = arith.constant 0 : i32
    %c0_i32_1 = arith.constant 0 : i32
    return %c0_i32, %c0_i32_0 : i32, i32
  }
  func.func @transform_4(%arg0: i32, %arg1: i32) -> (i32, i32) {
    %c0_i32 = arith.constant 0 : i32
    %c0_i32_0 = arith.constant 0 : i32
    %c0_i32_1 = arith.constant 0 : i32
    return %c0_i32, %c0_i32_0 : i32, i32
  }
  func.func @transform_5(%arg0: i32, %arg1: i32) -> (i32, i32, i32) {
    %c0_i32 = arith.constant 0 : i32
    %c0_i32_0 = arith.constant 0 : i32
    return %arg0, %arg1, %c0_i32 : i32, i32, i32
  }
}

module attributes {stable_mosaic.version = 11 : i64} {
  func.func @_post_kernel(%arg0: i32, %arg1: memref<32x16xbf16, #tpu.memory_space<vmem>>, %arg2: memref<32x32xf32, #tpu.memory_space<vmem>>, %arg3: memref<16x32xbf16, #tpu.memory_space<vmem>>, %arg4: memref<1x32xf32, #tpu.memory_space<vmem>>, %arg5: memref<1x32xf32, #tpu.memory_space<vmem>>, %arg6: memref<32x64xbf16, #tpu.memory_space<vmem>>, %arg7: memref<1x64xf32, #tpu.memory_space<vmem>>, %arg8: memref<64x32xbf16, #tpu.memory_space<vmem>>, %arg9: memref<1x32xf32, #tpu.memory_space<vmem>>, %arg10: memref<1x32xf32, #tpu.memory_space<vmem>>, %arg11: memref<1x32xf32, #tpu.memory_space<vmem>>, %arg12: memref<32x32xf32, #tpu.memory_space<vmem>>) attributes {dimension_semantics = [#tpu.dimension_semantics<parallel>], iteration_bounds = array<i64: 1>, scalar_prefetch = 0 : i64, scratch_operands = 0 : i64, tpu.core_type = #tpu.core_type<tc>, window_params = [{transform_indices = @transform_0, window_bounds = array<i64: 32, 16>}, {transform_indices = @transform_1, window_bounds = array<i64: 32, 32>}, {pipeline_mode = #tpu.pipeline_mode<synchronous>, transform_indices = @transform_2, window_bounds = array<i64: 16, 32>}, {pipeline_mode = #tpu.pipeline_mode<synchronous>, transform_indices = @transform_3, window_bounds = array<i64: 1, 32>}, {pipeline_mode = #tpu.pipeline_mode<synchronous>, transform_indices = @transform_4, window_bounds = array<i64: 1, 32>}, {pipeline_mode = #tpu.pipeline_mode<synchronous>, transform_indices = @transform_5, window_bounds = array<i64: 32, 64>}, {pipeline_mode = #tpu.pipeline_mode<synchronous>, transform_indices = @transform_6, window_bounds = array<i64: 1, 64>}, {pipeline_mode = #tpu.pipeline_mode<synchronous>, transform_indices = @transform_7, window_bounds = array<i64: 64, 32>}, {pipeline_mode = #tpu.pipeline_mode<synchronous>, transform_indices = @transform_8, window_bounds = array<i64: 1, 32>}, {pipeline_mode = #tpu.pipeline_mode<synchronous>, transform_indices = @transform_9, window_bounds = array<i64: 1, 32>}, {pipeline_mode = #tpu.pipeline_mode<synchronous>, transform_indices = @transform_10, window_bounds = array<i64: 1, 32>}, {transform_indices = @transform_11, window_bounds = array<i64: 32, 32>}]} {
    %c0 = arith.constant 0 : index
    %c0_0 = arith.constant 0 : index
    %0 = vector.load %arg1[%c0, %c0_0] : memref<32x16xbf16, #tpu.memory_space<vmem>>, vector<32x16xbf16>
    %c0_1 = arith.constant 0 : index
    %c0_2 = arith.constant 0 : index
    %1 = vector.load %arg3[%c0_1, %c0_2] : memref<16x32xbf16, #tpu.memory_space<vmem>>, vector<16x32xbf16>
    %cst = arith.constant dense<0.000000e+00> : vector<32x32xf32>
    %2 = tpu.matmul %0, %1, %cst {dimension_numbers = #tpu.dot_dimension_numbers<[1], [0], [0], [1], [0, 0, 1, 1], [], []>} : vector<32x16xbf16>, vector<16x32xbf16>, vector<32x32xf32> -> vector<32x32xf32>
    %c0_3 = arith.constant 0 : index
    %c0_4 = arith.constant 0 : index
    %3 = vector.load %arg2[%c0_3, %c0_4] : memref<32x32xf32, #tpu.memory_space<vmem>>, vector<32x32xf32>
    %4 = arith.addf %3, %2 : vector<32x32xf32>
    %cst_5 = arith.constant dense<0.000000e+00> : vector<32xf32>
    %5 = vector.multi_reduction <add>, %4, %cst_5 [1] : vector<32x32xf32> to vector<32xf32>
    %6 = vector.shape_cast %5 : vector<32xf32> to vector<32x1xf32>
    %cst_6 = arith.constant 3.200000e+01 : f32
    %7 = vector.broadcast %cst_6 : f32 to vector<32x1xf32>
    %8 = arith.divf %6, %7 : vector<32x1xf32>
    %9 = vector.broadcast %8 : vector<32x1xf32> to vector<32x32xf32>
    %10 = arith.subf %4, %9 : vector<32x32xf32>
    %11 = arith.mulf %10, %10 : vector<32x32xf32>
    %cst_7 = arith.constant dense<0.000000e+00> : vector<32xf32>
    %12 = vector.multi_reduction <add>, %11, %cst_7 [1] : vector<32x32xf32> to vector<32xf32>
    %13 = vector.shape_cast %12 : vector<32xf32> to vector<32x1xf32>
    %cst_8 = arith.constant 3.200000e+01 : f32
    %14 = vector.broadcast %cst_8 : f32 to vector<32x1xf32>
    %15 = arith.divf %13, %14 : vector<32x1xf32>
    %16 = vector.broadcast %8 : vector<32x1xf32> to vector<32x32xf32>
    %17 = arith.subf %4, %16 : vector<32x32xf32>
    %cst_9 = arith.constant 9.99999974E-6 : f32
    %18 = vector.broadcast %cst_9 : f32 to vector<32x1xf32>
    %19 = arith.addf %15, %18 : vector<32x1xf32>
    %20 = math.rsqrt %19 : vector<32x1xf32>
    %21 = vector.broadcast %20 : vector<32x1xf32> to vector<32x32xf32>
    %22 = arith.mulf %17, %21 : vector<32x32xf32>
    %c0_10 = arith.constant 0 : index
    %c0_11 = arith.constant 0 : index
    %23 = vector.load %arg4[%c0_10, %c0_11] : memref<1x32xf32, #tpu.memory_space<vmem>>, vector<1x32xf32>
    %24 = vector.broadcast %23 : vector<1x32xf32> to vector<32x32xf32>
    %25 = arith.mulf %22, %24 : vector<32x32xf32>
    %c0_12 = arith.constant 0 : index
    %c0_13 = arith.constant 0 : index
    %26 = vector.load %arg5[%c0_12, %c0_13] : memref<1x32xf32, #tpu.memory_space<vmem>>, vector<1x32xf32>
    %27 = vector.broadcast %26 : vector<1x32xf32> to vector<32x32xf32>
    %28 = arith.addf %25, %27 : vector<32x32xf32>
    %29 = arith.truncf %28 : vector<32x32xf32> to vector<32x32xbf16>
    %c0_14 = arith.constant 0 : index
    %c0_15 = arith.constant 0 : index
    %30 = vector.load %arg6[%c0_14, %c0_15] : memref<32x64xbf16, #tpu.memory_space<vmem>>, vector<32x64xbf16>
    %cst_16 = arith.constant dense<0.000000e+00> : vector<32x64xf32>
    %31 = tpu.matmul %29, %30, %cst_16 {dimension_numbers = #tpu.dot_dimension_numbers<[1], [0], [0], [1], [0, 0, 1, 1], [], []>} : vector<32x32xbf16>, vector<32x64xbf16>, vector<32x64xf32> -> vector<32x64xf32>
    %c0_17 = arith.constant 0 : index
    %c0_18 = arith.constant 0 : index
    %32 = vector.load %arg7[%c0_17, %c0_18] : memref<1x64xf32, #tpu.memory_space<vmem>>, vector<1x64xf32>
    %33 = vector.broadcast %32 : vector<1x64xf32> to vector<32x64xf32>
    %34 = arith.addf %31, %33 : vector<32x64xf32>
    %cst_19 = arith.constant 0.000000e+00 : f32
    %35 = vector.broadcast %cst_19 : f32 to vector<32x64xf32>
    %36 = arith.maximumf %34, %35 : vector<32x64xf32>
    %37 = arith.truncf %36 : vector<32x64xf32> to vector<32x64xbf16>
    %c0_20 = arith.constant 0 : index
    %c0_21 = arith.constant 0 : index
    %38 = vector.load %arg8[%c0_20, %c0_21] : memref<64x32xbf16, #tpu.memory_space<vmem>>, vector<64x32xbf16>
    %cst_22 = arith.constant dense<0.000000e+00> : vector<32x32xf32>
    %39 = tpu.matmul %37, %38, %cst_22 {dimension_numbers = #tpu.dot_dimension_numbers<[1], [0], [0], [1], [0, 0, 1, 1], [], []>} : vector<32x64xbf16>, vector<64x32xbf16>, vector<32x32xf32> -> vector<32x32xf32>
    %c0_23 = arith.constant 0 : index
    %c0_24 = arith.constant 0 : index
    %40 = vector.load %arg9[%c0_23, %c0_24] : memref<1x32xf32, #tpu.memory_space<vmem>>, vector<1x32xf32>
    %41 = vector.broadcast %40 : vector<1x32xf32> to vector<32x32xf32>
    %42 = arith.addf %39, %41 : vector<32x32xf32>
    %43 = arith.addf %28, %42 : vector<32x32xf32>
    %cst_25 = arith.constant dense<0.000000e+00> : vector<32xf32>
    %44 = vector.multi_reduction <add>, %43, %cst_25 [1] : vector<32x32xf32> to vector<32xf32>
    %45 = vector.shape_cast %44 : vector<32xf32> to vector<32x1xf32>
    %cst_26 = arith.constant 3.200000e+01 : f32
    %46 = vector.broadcast %cst_26 : f32 to vector<32x1xf32>
    %47 = arith.divf %45, %46 : vector<32x1xf32>
    %48 = vector.broadcast %47 : vector<32x1xf32> to vector<32x32xf32>
    %49 = arith.subf %43, %48 : vector<32x32xf32>
    %50 = arith.mulf %49, %49 : vector<32x32xf32>
    %cst_27 = arith.constant dense<0.000000e+00> : vector<32xf32>
    %51 = vector.multi_reduction <add>, %50, %cst_27 [1] : vector<32x32xf32> to vector<32xf32>
    %52 = vector.shape_cast %51 : vector<32xf32> to vector<32x1xf32>
    %cst_28 = arith.constant 3.200000e+01 : f32
    %53 = vector.broadcast %cst_28 : f32 to vector<32x1xf32>
    %54 = arith.divf %52, %53 : vector<32x1xf32>
    %55 = vector.broadcast %47 : vector<32x1xf32> to vector<32x32xf32>
    %56 = arith.subf %43, %55 : vector<32x32xf32>
    %cst_29 = arith.constant 9.99999974E-6 : f32
    %57 = vector.broadcast %cst_29 : f32 to vector<32x1xf32>
    %58 = arith.addf %54, %57 : vector<32x1xf32>
    %59 = math.rsqrt %58 : vector<32x1xf32>
    %60 = vector.broadcast %59 : vector<32x1xf32> to vector<32x32xf32>
    %61 = arith.mulf %56, %60 : vector<32x32xf32>
    %c0_30 = arith.constant 0 : index
    %c0_31 = arith.constant 0 : index
    %62 = vector.load %arg10[%c0_30, %c0_31] : memref<1x32xf32, #tpu.memory_space<vmem>>, vector<1x32xf32>
    %63 = vector.broadcast %62 : vector<1x32xf32> to vector<32x32xf32>
    %64 = arith.mulf %61, %63 : vector<32x32xf32>
    %c0_32 = arith.constant 0 : index
    %c0_33 = arith.constant 0 : index
    %65 = vector.load %arg11[%c0_32, %c0_33] : memref<1x32xf32, #tpu.memory_space<vmem>>, vector<1x32xf32>
    %66 = vector.broadcast %65 : vector<1x32xf32> to vector<32x32xf32>
    %67 = arith.addf %64, %66 : vector<32x32xf32>
    %c0_34 = arith.constant 0 : index
    %c0_35 = arith.constant 0 : index
    %68 = vector.load %arg12[%c0_34, %c0_35] : memref<32x32xf32, #tpu.memory_space<vmem>>, vector<32x32xf32>
    tpu.vector_store %arg12[%c0_34, %c0_35], %67 {strides = array<i32>} : memref<32x32xf32, #tpu.memory_space<vmem>>, vector<32x32xf32>,
    return
  }
  func.func @transform_0(%arg0: i32) -> (i32, i32) {
    %c0_i32 = arith.constant 0 : i32
    %c0_i32_0 = arith.constant 0 : i32
    return %arg0, %c0_i32 : i32, i32
  }
  func.func @transform_1(%arg0: i32) -> (i32, i32) {
    %c0_i32 = arith.constant 0 : i32
    %c0_i32_0 = arith.constant 0 : i32
    return %arg0, %c0_i32 : i32, i32
  }
  func.func @transform_2(%arg0: i32) -> (i32, i32) {
    %c0_i32 = arith.constant 0 : i32
    %c0_i32_0 = arith.constant 0 : i32
    %c0_i32_1 = arith.constant 0 : i32
    return %c0_i32, %c0_i32_0 : i32, i32
  }
  func.func @transform_3(%arg0: i32) -> (i32, i32) {
    %c0_i32 = arith.constant 0 : i32
    %c0_i32_0 = arith.constant 0 : i32
    %c0_i32_1 = arith.constant 0 : i32
    return %c0_i32, %c0_i32_0 : i32, i32
  }
  func.func @transform_4(%arg0: i32) -> (i32, i32) {
    %c0_i32 = arith.constant 0 : i32
    %c0_i32_0 = arith.constant 0 : i32
    %c0_i32_1 = arith.constant 0 : i32
    return %c0_i32, %c0_i32_0 : i32, i32
  }
  func.func @transform_5(%arg0: i32) -> (i32, i32) {
    %c0_i32 = arith.constant 0 : i32
    %c0_i32_0 = arith.constant 0 : i32
    %c0_i32_1 = arith.constant 0 : i32
    return %c0_i32, %c0_i32_0 : i32, i32
  }
  func.func @transform_6(%arg0: i32) -> (i32, i32) {
    %c0_i32 = arith.constant 0 : i32
    %c0_i32_0 = arith.constant 0 : i32
    %c0_i32_1 = arith.constant 0 : i32
    return %c0_i32, %c0_i32_0 : i32, i32
  }
  func.func @transform_7(%arg0: i32) -> (i32, i32) {
    %c0_i32 = arith.constant 0 : i32
    %c0_i32_0 = arith.constant 0 : i32
    %c0_i32_1 = arith.constant 0 : i32
    return %c0_i32, %c0_i32_0 : i32, i32
  }
  func.func @transform_8(%arg0: i32) -> (i32, i32) {
    %c0_i32 = arith.constant 0 : i32
    %c0_i32_0 = arith.constant 0 : i32
    %c0_i32_1 = arith.constant 0 : i32
    return %c0_i32, %c0_i32_0 : i32, i32
  }
  func.func @transform_9(%arg0: i32) -> (i32, i32) {
    %c0_i32 = arith.constant 0 : i32
    %c0_i32_0 = arith.constant 0 : i32
    %c0_i32_1 = arith.constant 0 : i32
    return %c0_i32, %c0_i32_0 : i32, i32
  }
  func.func @transform_10(%arg0: i32) -> (i32, i32) {
    %c0_i32 = arith.constant 0 : i32
    %c0_i32_0 = arith.constant 0 : i32
    %c0_i32_1 = arith.constant 0 : i32
    return %c0_i32, %c0_i32_0 : i32, i32
  }
  func.func @transform_11(%arg0: i32) -> (i32, i32) {
    %c0_i32 = arith.constant 0 : i32
    %c0_i32_0 = arith.constant 0 : i32
    return %arg0, %c0_i32 : i32, i32
  }
}

module attributes {stable_mosaic.version = 11 : i64} {
  func.func @_linear_kernel(%arg0: i32, %arg1: memref<16x32xf32, #tpu.memory_space<vmem>>, %arg2: memref<32x16xbf16, #tpu.memory_space<vmem>>, %arg3: memref<16x16xbf16, #tpu.memory_space<vmem>>) attributes {dimension_semantics = [#tpu.dimension_semantics<parallel>], iteration_bounds = array<i64: 1>, scalar_prefetch = 0 : i64, scratch_operands = 0 : i64, tpu.core_type = #tpu.core_type<tc>, window_params = [{transform_indices = @transform_0, window_bounds = array<i64: 16, 32>}, {pipeline_mode = #tpu.pipeline_mode<synchronous>, transform_indices = @transform_1, window_bounds = array<i64: 32, 16>}, {transform_indices = @transform_2, window_bounds = array<i64: 16, 16>}]} {
    %c0 = arith.constant 0 : index
    %c0_0 = arith.constant 0 : index
    %0 = vector.load %arg1[%c0, %c0_0] : memref<16x32xf32, #tpu.memory_space<vmem>>, vector<16x32xf32>
    %1 = arith.truncf %0 : vector<16x32xf32> to vector<16x32xbf16>
    %c0_1 = arith.constant 0 : index
    %c0_2 = arith.constant 0 : index
    %2 = vector.load %arg2[%c0_1, %c0_2] : memref<32x16xbf16, #tpu.memory_space<vmem>>, vector<32x16xbf16>
    %cst = arith.constant dense<0.000000e+00> : vector<16x16xf32>
    %3 = tpu.matmul %1, %2, %cst {dimension_numbers = #tpu.dot_dimension_numbers<[1], [0], [0], [1], [0, 0, 1, 1], [], []>} : vector<16x32xbf16>, vector<32x16xbf16>, vector<16x16xf32> -> vector<16x16xf32>
    %4 = arith.truncf %3 : vector<16x16xf32> to vector<16x16xbf16>
    %c0_3 = arith.constant 0 : index
    %c0_4 = arith.constant 0 : index
    %5 = vector.load %arg3[%c0_3, %c0_4] : memref<16x16xbf16, #tpu.memory_space<vmem>>, vector<16x16xbf16>
    tpu.vector_store %arg3[%c0_3, %c0_4], %4 {strides = array<i32>} : memref<16x16xbf16, #tpu.memory_space<vmem>>, vector<16x16xbf16>,
    return
  }
  func.func @transform_0(%arg0: i32) -> (i32, i32) {
    %c0_i32 = arith.constant 0 : i32
    %c0_i32_0 = arith.constant 0 : i32
    return %arg0, %c0_i32 : i32, i32
  }
  func.func @transform_1(%arg0: i32) -> (i32, i32) {
    %c0_i32 = arith.constant 0 : i32
    %c0_i32_0 = arith.constant 0 : i32
    %c0_i32_1 = arith.constant 0 : i32
    return %c0_i32, %c0_i32_0 : i32, i32
  }
  func.func @transform_2(%arg0: i32) -> (i32, i32) {
    %c0_i32 = arith.constant 0 : i32
    %c0_i32_0 = arith.constant 0 : i32
    return %arg0, %c0_i32 : i32, i32
  }
}

module attributes {stable_mosaic.version = 11 : i64} {
  func.func @_linear_kernel(%arg0: i32, %arg1: memref<32x32xf32, #tpu.memory_space<vmem>>, %arg2: memref<32x48xbf16, #tpu.memory_space<vmem>>, %arg3: memref<32x48xbf16, #tpu.memory_space<vmem>>) attributes {dimension_semantics = [#tpu.dimension_semantics<parallel>], iteration_bounds = array<i64: 1>, scalar_prefetch = 0 : i64, scratch_operands = 0 : i64, tpu.core_type = #tpu.core_type<tc>, window_params = [{transform_indices = @transform_0, window_bounds = array<i64: 32, 32>}, {pipeline_mode = #tpu.pipeline_mode<synchronous>, transform_indices = @transform_1, window_bounds = array<i64: 32, 48>}, {transform_indices = @transform_2, window_bounds = array<i64: 32, 48>}]} {
    %c0 = arith.constant 0 : index
    %c0_0 = arith.constant 0 : index
    %0 = vector.load %arg1[%c0, %c0_0] : memref<32x32xf32, #tpu.memory_space<vmem>>, vector<32x32xf32>
    %1 = arith.truncf %0 : vector<32x32xf32> to vector<32x32xbf16>
    %c0_1 = arith.constant 0 : index
    %c0_2 = arith.constant 0 : index
    %2 = vector.load %arg2[%c0_1, %c0_2] : memref<32x48xbf16, #tpu.memory_space<vmem>>, vector<32x48xbf16>
    %cst = arith.constant dense<0.000000e+00> : vector<32x48xf32>
    %3 = tpu.matmul %1, %2, %cst {dimension_numbers = #tpu.dot_dimension_numbers<[1], [0], [0], [1], [0, 0, 1, 1], [], []>} : vector<32x32xbf16>, vector<32x48xbf16>, vector<32x48xf32> -> vector<32x48xf32>
    %4 = arith.truncf %3 : vector<32x48xf32> to vector<32x48xbf16>
    %c0_3 = arith.constant 0 : index
    %c0_4 = arith.constant 0 : index
    %5 = vector.load %arg3[%c0_3, %c0_4] : memref<32x48xbf16, #tpu.memory_space<vmem>>, vector<32x48xbf16>
    tpu.vector_store %arg3[%c0_3, %c0_4], %4 {strides = array<i32>} : memref<32x48xbf16, #tpu.memory_space<vmem>>, vector<32x48xbf16>,
    return
  }
  func.func @transform_0(%arg0: i32) -> (i32, i32) {
    %c0_i32 = arith.constant 0 : i32
    %c0_i32_0 = arith.constant 0 : i32
    return %arg0, %c0_i32 : i32, i32
  }
  func.func @transform_1(%arg0: i32) -> (i32, i32) {
    %c0_i32 = arith.constant 0 : i32
    %c0_i32_0 = arith.constant 0 : i32
    %c0_i32_1 = arith.constant 0 : i32
    return %c0_i32, %c0_i32_0 : i32, i32
  }
  func.func @transform_2(%arg0: i32) -> (i32, i32) {
    %c0_i32 = arith.constant 0 : i32
    %c0_i32_0 = arith.constant 0 : i32
    return %arg0, %c0_i32 : i32, i32
  }
}

module attributes {stable_mosaic.version = 11 : i64} {
  func.func @_attn_kernel(%arg0: i32, %arg1: i32, %arg2: memref<1x16x48xbf16, #tpu.memory_space<vmem>>, %arg3: memref<1x16x48xbf16, #tpu.memory_space<vmem>>, %arg4: memref<16x16xbf16, #tpu.memory_space<vmem>>, %arg5: memref<1x16xf32, #tpu.memory_space<vmem>>, %arg6: memref<1x16xf32, #tpu.memory_space<vmem>>, %arg7: memref<1x16x16xbf16, #tpu.memory_space<vmem>>) attributes {dimension_semantics = [#tpu.dimension_semantics<parallel>, #tpu.dimension_semantics<parallel>], iteration_bounds = array<i64: 2, 1>, scalar_prefetch = 0 : i64, scratch_operands = 0 : i64, tpu.core_type = #tpu.core_type<tc>, window_params = [{transform_indices = @transform_0, window_bounds = array<i64: 1, 16, 48>}, {transform_indices = @transform_1, window_bounds = array<i64: 1, 16, 48>}, {pipeline_mode = #tpu.pipeline_mode<synchronous>, transform_indices = @transform_2, window_bounds = array<i64: 16, 16>}, {pipeline_mode = #tpu.pipeline_mode<synchronous>, transform_indices = @transform_3, window_bounds = array<i64: 1, 16>}, {pipeline_mode = #tpu.pipeline_mode<synchronous>, transform_indices = @transform_4, window_bounds = array<i64: 1, 16>}, {transform_indices = @transform_5, window_bounds = array<i64: 1, 16, 16>}]} {
    %c16_i32 = arith.constant 16 : i32
    %0 = arith.muli %arg1, %c16_i32 : i32
    %1 = tpu.iota {dimensions = array<i32: 0>} : vector<16x1xi32>
    %2 = vector.broadcast %0 : i32 to vector<16x1xi32>
    %3 = arith.addi %2, %1 : vector<16x1xi32>
    %4 = tpu.iota {dimensions = array<i32: 1>} : vector<16x16xi32>
    %5 = vector.broadcast %3 : vector<16x1xi32> to vector<16x16xi32>
    %6 = arith.cmpi sgt, %4, %5 : vector<16x16xi32>
    %c15_i32 = arith.constant 15 : i32
    %7 = vector.broadcast %c15_i32 : i32 to vector<16x1xi32>
    %8 = arith.subi %7, %3 : vector<16x1xi32>
    %c0 = arith.constant 0 : index
    %c0_0 = arith.constant 0 : index
    %9 = vector.load %arg5[%c0, %c0_0] : memref<1x16xf32, #tpu.memory_space<vmem>>, vector<1x16xf32>
    %c0_1 = arith.constant 0 : index
    %c0_2 = arith.constant 0 : index
    %10 = vector.load %arg6[%c0_1, %c0_2] : memref<1x16xf32, #tpu.memory_space<vmem>>, vector<1x16xf32>
    %c0_3 = arith.constant 0 : index
    %c0_4 = arith.constant 0 : index
    %c0_5 = arith.constant 0 : index
    %11 = vector.load %arg2[%c0_3, %c0_4, %c0_5] : memref<1x16x48xbf16, #tpu.memory_space<vmem>>, vector<1x16x8xbf16>
    %12 = vector.shape_cast %11 : vector<1x16x8xbf16> to vector<16x8xbf16>
    %13 = arith.extf %12 : vector<16x8xbf16> to vector<16x8xf32>
    %c0_6 = arith.constant 0 : index
    %c0_7 = arith.constant 0 : index
    %c16 = arith.constant 16 : index
    %14 = vector.load %arg3[%c0_6, %c0_7, %c16] : memref<1x16x48xbf16, #tpu.memory_space<vmem>>, vector<1x16x8xbf16>
    %15 = vector.shape_cast %14 : vector<1x16x8xbf16> to vector<16x8xbf16>
    %c0_8 = arith.constant 0 : index
    %c0_9 = arith.constant 0 : index
    %c32 = arith.constant 32 : index
    %16 = vector.load %arg3[%c0_8, %c0_9, %c32] : memref<1x16x48xbf16, #tpu.memory_space<vmem>>, vector<1x16x8xbf16>
    %17 = vector.shape_cast %16 : vector<1x16x8xbf16> to vector<16x8xbf16>
    %c0_10 = arith.constant 0 : index
    %c0_11 = arith.constant 0 : index
    %18 = vector.load %arg4[%c0_10, %c0_11] : memref<16x16xbf16, #tpu.memory_space<vmem>>, vector<16x8xbf16>
    %19 = vector.extract_strided_slice %9 {offsets = [0, 0], sizes = [1, 8], strides = [1, 1]} : vector<1x16xf32> to vector<1x8xf32>
    %20 = vector.broadcast %19 : vector<1x8xf32> to vector<16x8xf32>
    %21 = arith.addf %13, %20 : vector<16x8xf32>
    %22 = arith.truncf %21 : vector<16x8xf32> to vector<16x8xbf16>
    %23 = vector.extract_strided_slice %10 {offsets = [0, 0], sizes = [1, 8], strides = [1, 1]} : vector<1x16xf32> to vector<1x8xf32>
    %24 = vector.broadcast %23 : vector<1x8xf32> to vector<16x8xf32>
    %25 = arith.addf %13, %24 : vector<16x8xf32>
    %26 = arith.truncf %25 : vector<16x8xf32> to vector<16x8xbf16>
    %cst = arith.constant dense<0.000000e+00> : vector<16x16xf32>
    %27 = tpu.matmul %22, %15, %cst {dimension_numbers = #tpu.dot_dimension_numbers<[1], [1], [0], [0], [0, 0, 1, 0], [], []>} : vector<16x8xbf16>, vector<16x8xbf16>, vector<16x16xf32> -> vector<16x16xf32>
    %cst_12 = arith.constant dense<0.000000e+00> : vector<16x16xf32>
    %28 = tpu.matmul %26, %18, %cst_12 {dimension_numbers = #tpu.dot_dimension_numbers<[1], [1], [0], [0], [0, 0, 1, 0], [], []>} : vector<16x8xbf16>, vector<16x8xbf16>, vector<16x16xf32> -> vector<16x16xf32>
    %29 = vector.extract_strided_slice %28 {offsets = [0, 1], sizes = [16, 15], strides = [1, 1]} : vector<16x16xf32> to vector<16x15xf32>
    %30 = vector.extract_strided_slice %28 {offsets = [0, 0], sizes = [16, 1], strides = [1, 1]} : vector<16x16xf32> to vector<16x1xf32>
    %31 = tpu.concatenate %29, %30 in 1 : vector<16x15xf32>, vector<16x1xf32> -> vector<16x16xf32>
    %c0_i32 = arith.constant 0 : i32
    %32 = vector.broadcast %c0_i32 : i32 to vector<16x1xi32>
    %33 = arith.shrsi %8, %32 : vector<16x1xi32>
    %c1_i32 = arith.constant 1 : i32
    %34 = vector.broadcast %c1_i32 : i32 to vector<16x1xi32>
    %35 = arith.andi %33, %34 : vector<16x1xi32>
    %c1_i32_13 = arith.constant 1 : i32
    %36 = vector.broadcast %c1_i32_13 : i32 to vector<16x1xi32>
    %37 = arith.cmpi eq, %35, %36 : vector<16x1xi32>
    %38 = vector.shape_cast %37 : vector<16x1xi1> to vector<16x1xi1>
    %39 = vector.broadcast %38 : vector<16x1xi1> to vector<16x16xi1>
    %40 = arith.select %39, %31, %28 : vector<16x16xi1>, vector<16x16xf32>
    %41 = vector.extract_strided_slice %40 {offsets = [0, 2], sizes = [16, 14], strides = [1, 1]} : vector<16x16xf32> to vector<16x14xf32>
    %42 = vector.extract_strided_slice %40 {offsets = [0, 0], sizes = [16, 2], strides = [1, 1]} : vector<16x16xf32> to vector<16x2xf32>
    %43 = tpu.concatenate %41, %42 in 1 : vector<16x14xf32>, vector<16x2xf32> -> vector<16x16xf32>
    %c1_i32_14 = arith.constant 1 : i32
    %44 = vector.broadcast %c1_i32_14 : i32 to vector<16x1xi32>
    %45 = arith.shrsi %8, %44 : vector<16x1xi32>
    %c1_i32_15 = arith.constant 1 : i32
    %46 = vector.broadcast %c1_i32_15 : i32 to vector<16x1xi32>
    %47 = arith.andi %45, %46 : vector<16x1xi32>
    %c1_i32_16 = arith.constant 1 : i32
    %48 = vector.broadcast %c1_i32_16 : i32 to vector<16x1xi32>
    %49 = arith.cmpi eq, %47, %48 : vector<16x1xi32>
    %50 = vector.shape_cast %49 : vector<16x1xi1> to vector<16x1xi1>
    %51 = vector.broadcast %50 : vector<16x1xi1> to vector<16x16xi1>
    %52 = arith.select %51, %43, %40 : vector<16x16xi1>, vector<16x16xf32>
    %53 = vector.extract_strided_slice %52 {offsets = [0, 4], sizes = [16, 12], strides = [1, 1]} : vector<16x16xf32> to vector<16x12xf32>
    %54 = vector.extract_strided_slice %52 {offsets = [0, 0], sizes = [16, 4], strides = [1, 1]} : vector<16x16xf32> to vector<16x4xf32>
    %55 = tpu.concatenate %53, %54 in 1 : vector<16x12xf32>, vector<16x4xf32> -> vector<16x16xf32>
    %c2_i32 = arith.constant 2 : i32
    %56 = vector.broadcast %c2_i32 : i32 to vector<16x1xi32>
    %57 = arith.shrsi %8, %56 : vector<16x1xi32>
    %c1_i32_17 = arith.constant 1 : i32
    %58 = vector.broadcast %c1_i32_17 : i32 to vector<16x1xi32>
    %59 = arith.andi %57, %58 : vector<16x1xi32>
    %c1_i32_18 = arith.constant 1 : i32
    %60 = vector.broadcast %c1_i32_18 : i32 to vector<16x1xi32>
    %61 = arith.cmpi eq, %59, %60 : vector<16x1xi32>
    %62 = vector.shape_cast %61 : vector<16x1xi1> to vector<16x1xi1>
    %63 = vector.broadcast %62 : vector<16x1xi1> to vector<16x16xi1>
    %64 = arith.select %63, %55, %52 : vector<16x16xi1>, vector<16x16xf32>
    %65 = vector.extract_strided_slice %64 {offsets = [0, 8], sizes = [16, 8], strides = [1, 1]} : vector<16x16xf32> to vector<16x8xf32>
    %66 = vector.extract_strided_slice %64 {offsets = [0, 0], sizes = [16, 8], strides = [1, 1]} : vector<16x16xf32> to vector<16x8xf32>
    %67 = tpu.concatenate %65, %66 in 1 : vector<16x8xf32>, vector<16x8xf32> -> vector<16x16xf32>
    %c3_i32 = arith.constant 3 : i32
    %68 = vector.broadcast %c3_i32 : i32 to vector<16x1xi32>
    %69 = arith.shrsi %8, %68 : vector<16x1xi32>
    %c1_i32_19 = arith.constant 1 : i32
    %70 = vector.broadcast %c1_i32_19 : i32 to vector<16x1xi32>
    %71 = arith.andi %69, %70 : vector<16x1xi32>
    %c1_i32_20 = arith.constant 1 : i32
    %72 = vector.broadcast %c1_i32_20 : i32 to vector<16x1xi32>
    %73 = arith.cmpi eq, %71, %72 : vector<16x1xi32>
    %74 = vector.shape_cast %73 : vector<16x1xi1> to vector<16x1xi1>
    %75 = vector.broadcast %74 : vector<16x1xi1> to vector<16x16xi1>
    %76 = arith.select %75, %67, %64 : vector<16x16xi1>, vector<16x16xf32>
    %77 = arith.addf %27, %76 : vector<16x16xf32>
    %cst_21 = arith.constant -1.000000e+30 : f32
    %78 = vector.broadcast %cst_21 : f32 to vector<16x16xf32>
    %79 = arith.select %6, %78, %77 : vector<16x16xi1>, vector<16x16xf32>
    %cst_22 = arith.constant dense<0xFF800000> : vector<16xf32>
    %80 = vector.multi_reduction <maximumf>, %79, %cst_22 [1] : vector<16x16xf32> to vector<16xf32>
    %81 = vector.shape_cast %80 : vector<16xf32> to vector<16x1xf32>
    %82 = vector.broadcast %81 : vector<16x1xf32> to vector<16x16xf32>
    %83 = arith.subf %79, %82 : vector<16x16xf32>
    %84 = math.exp %83 : vector<16x16xf32>
    %cst_23 = arith.constant dense<0.000000e+00> : vector<16xf32>
    %85 = vector.multi_reduction <add>, %84, %cst_23 [1] : vector<16x16xf32> to vector<16xf32>
    %86 = vector.shape_cast %85 : vector<16xf32> to vector<16x1xf32>
    %87 = tpu.reciprocal %86 {approx = true} : vector<16x1xf32> -> vector<16x1xf32>
    %88 = vector.broadcast %87 : vector<16x1xf32> to vector<16x16xf32>
    %89 = arith.mulf %84, %88 : vector<16x16xf32>
    %90 = arith.truncf %89 : vector<16x16xf32> to vector<16x16xbf16>
    %cst_24 = arith.constant dense<0.000000e+00> : vector<16x8xf32>
    %91 = tpu.matmul %90, %17, %cst_24 {dimension_numbers = #tpu.dot_dimension_numbers<[1], [0], [0], [1], [0, 0, 1, 1], [], []>} : vector<16x16xbf16>, vector<16x8xbf16>, vector<16x8xf32> -> vector<16x8xf32>
    %92 = arith.truncf %91 : vector<16x8xf32> to vector<16x8xbf16>
    %c0_25 = arith.constant 0 : index
    %c0_26 = arith.constant 0 : index
    %c0_27 = arith.constant 0 : index
    %93 = vector.load %arg7[%c0_25, %c0_26, %c0_27] : memref<1x16x16xbf16, #tpu.memory_space<vmem>>, vector<1x16x8xbf16>
    %94 = vector.shape_cast %93 : vector<1x16x8xbf16> to vector<16x8xbf16>
    %95 = vector.shape_cast %92 : vector<16x8xbf16> to vector<1x16x8xbf16>
    tpu.vector_store %arg7[%c0_25, %c0_26, %c0_27], %95 {strides = array<i32>} : memref<1x16x16xbf16, #tpu.memory_space<vmem>>, vector<1x16x8xbf16>,
    %c0_28 = arith.constant 0 : index
    %c0_29 = arith.constant 0 : index
    %c8 = arith.constant 8 : index
    %96 = vector.load %arg2[%c0_28, %c0_29, %c8] : memref<1x16x48xbf16, #tpu.memory_space<vmem>>, vector<1x16x8xbf16>
    %97 = vector.shape_cast %96 : vector<1x16x8xbf16> to vector<16x8xbf16>
    %98 = arith.extf %97 : vector<16x8xbf16> to vector<16x8xf32>
    %c0_30 = arith.constant 0 : index
    %c0_31 = arith.constant 0 : index
    %c24 = arith.constant 24 : index
    %99 = vector.load %arg3[%c0_30, %c0_31, %c24] : memref<1x16x48xbf16, #tpu.memory_space<vmem>>, vector<1x16x8xbf16>
    %100 = vector.shape_cast %99 : vector<1x16x8xbf16> to vector<16x8xbf16>
    %c0_32 = arith.constant 0 : index
    %c0_33 = arith.constant 0 : index
    %c40 = arith.constant 40 : index
    %101 = vector.load %arg3[%c0_32, %c0_33, %c40] : memref<1x16x48xbf16, #tpu.memory_space<vmem>>, vector<1x16x8xbf16>
    %102 = vector.shape_cast %101 : vector<1x16x8xbf16> to vector<16x8xbf16>
    %c0_34 = arith.constant 0 : index
    %c8_35 = arith.constant 8 : index
    %103 = vector.load %arg4[%c0_34, %c8_35] : memref<16x16xbf16, #tpu.memory_space<vmem>>, vector<16x8xbf16>
    %104 = vector.extract_strided_slice %9 {offsets = [0, 8], sizes = [1, 8], strides = [1, 1]} : vector<1x16xf32> to vector<1x8xf32>
    %105 = vector.broadcast %104 : vector<1x8xf32> to vector<16x8xf32>
    %106 = arith.addf %98, %105 : vector<16x8xf32>
    %107 = arith.truncf %106 : vector<16x8xf32> to vector<16x8xbf16>
    %108 = vector.extract_strided_slice %10 {offsets = [0, 8], sizes = [1, 8], strides = [1, 1]} : vector<1x16xf32> to vector<1x8xf32>
    %109 = vector.broadcast %108 : vector<1x8xf32> to vector<16x8xf32>
    %110 = arith.addf %98, %109 : vector<16x8xf32>
    %111 = arith.truncf %110 : vector<16x8xf32> to vector<16x8xbf16>
    %cst_36 = arith.constant dense<0.000000e+00> : vector<16x16xf32>
    %112 = tpu.matmul %107, %100, %cst_36 {dimension_numbers = #tpu.dot_dimension_numbers<[1], [1], [0], [0], [0, 0, 1, 0], [], []>} : vector<16x8xbf16>, vector<16x8xbf16>, vector<16x16xf32> -> vector<16x16xf32>
    %cst_37 = arith.constant dense<0.000000e+00> : vector<16x16xf32>
    %113 = tpu.matmul %111, %103, %cst_37 {dimension_numbers = #tpu.dot_dimension_numbers<[1], [1], [0], [0], [0, 0, 1, 0], [], []>} : vector<16x8xbf16>, vector<16x8xbf16>, vector<16x16xf32> -> vector<16x16xf32>
    %114 = vector.extract_strided_slice %113 {offsets = [0, 1], sizes = [16, 15], strides = [1, 1]} : vector<16x16xf32> to vector<16x15xf32>
    %115 = vector.extract_strided_slice %113 {offsets = [0, 0], sizes = [16, 1], strides = [1, 1]} : vector<16x16xf32> to vector<16x1xf32>
    %116 = tpu.concatenate %114, %115 in 1 : vector<16x15xf32>, vector<16x1xf32> -> vector<16x16xf32>
    %c0_i32_38 = arith.constant 0 : i32
    %117 = vector.broadcast %c0_i32_38 : i32 to vector<16x1xi32>
    %118 = arith.shrsi %8, %117 : vector<16x1xi32>
    %c1_i32_39 = arith.constant 1 : i32
    %119 = vector.broadcast %c1_i32_39 : i32 to vector<16x1xi32>
    %120 = arith.andi %118, %119 : vector<16x1xi32>
    %c1_i32_40 = arith.constant 1 : i32
    %121 = vector.broadcast %c1_i32_40 : i32 to vector<16x1xi32>
    %122 = arith.cmpi eq, %120, %121 : vector<16x1xi32>
    %123 = vector.shape_cast %122 : vector<16x1xi1> to vector<16x1xi1>
    %124 = vector.broadcast %123 : vector<16x1xi1> to vector<16x16xi1>
    %125 = arith.select %124, %116, %113 : vector<16x16xi1>, vector<16x16xf32>
    %126 = vector.extract_strided_slice %125 {offsets = [0, 2], sizes = [16, 14], strides = [1, 1]} : vector<16x16xf32> to vector<16x14xf32>
    %127 = vector.extract_strided_slice %125 {offsets = [0, 0], sizes = [16, 2], strides = [1, 1]} : vector<16x16xf32> to vector<16x2xf32>
    %128 = tpu.concatenate %126, %127 in 1 : vector<16x14xf32>, vector<16x2xf32> -> vector<16x16xf32>
    %c1_i32_41 = arith.constant 1 : i32
    %129 = vector.broadcast %c1_i32_41 : i32 to vector<16x1xi32>
    %130 = arith.shrsi %8, %129 : vector<16x1xi32>
    %c1_i32_42 = arith.constant 1 : i32
    %131 = vector.broadcast %c1_i32_42 : i32 to vector<16x1xi32>
    %132 = arith.andi %130, %131 : vector<16x1xi32>
    %c1_i32_43 = arith.constant 1 : i32
    %133 = vector.broadcast %c1_i32_43 : i32 to vector<16x1xi32>
    %134 = arith.cmpi eq, %132, %133 : vector<16x1xi32>
    %135 = vector.shape_cast %134 : vector<16x1xi1> to vector<16x1xi1>
    %136 = vector.broadcast %135 : vector<16x1xi1> to vector<16x16xi1>
    %137 = arith.select %136, %128, %125 : vector<16x16xi1>, vector<16x16xf32>
    %138 = vector.extract_strided_slice %137 {offsets = [0, 4], sizes = [16, 12], strides = [1, 1]} : vector<16x16xf32> to vector<16x12xf32>
    %139 = vector.extract_strided_slice %137 {offsets = [0, 0], sizes = [16, 4], strides = [1, 1]} : vector<16x16xf32> to vector<16x4xf32>
    %140 = tpu.concatenate %138, %139 in 1 : vector<16x12xf32>, vector<16x4xf32> -> vector<16x16xf32>
    %c2_i32_44 = arith.constant 2 : i32
    %141 = vector.broadcast %c2_i32_44 : i32 to vector<16x1xi32>
    %142 = arith.shrsi %8, %141 : vector<16x1xi32>
    %c1_i32_45 = arith.constant 1 : i32
    %143 = vector.broadcast %c1_i32_45 : i32 to vector<16x1xi32>
    %144 = arith.andi %142, %143 : vector<16x1xi32>
    %c1_i32_46 = arith.constant 1 : i32
    %145 = vector.broadcast %c1_i32_46 : i32 to vector<16x1xi32>
    %146 = arith.cmpi eq, %144, %145 : vector<16x1xi32>
    %147 = vector.shape_cast %146 : vector<16x1xi1> to vector<16x1xi1>
    %148 = vector.broadcast %147 : vector<16x1xi1> to vector<16x16xi1>
    %149 = arith.select %148, %140, %137 : vector<16x16xi1>, vector<16x16xf32>
    %150 = vector.extract_strided_slice %149 {offsets = [0, 8], sizes = [16, 8], strides = [1, 1]} : vector<16x16xf32> to vector<16x8xf32>
    %151 = vector.extract_strided_slice %149 {offsets = [0, 0], sizes = [16, 8], strides = [1, 1]} : vector<16x16xf32> to vector<16x8xf32>
    %152 = tpu.concatenate %150, %151 in 1 : vector<16x8xf32>, vector<16x8xf32> -> vector<16x16xf32>
    %c3_i32_47 = arith.constant 3 : i32
    %153 = vector.broadcast %c3_i32_47 : i32 to vector<16x1xi32>
    %154 = arith.shrsi %8, %153 : vector<16x1xi32>
    %c1_i32_48 = arith.constant 1 : i32
    %155 = vector.broadcast %c1_i32_48 : i32 to vector<16x1xi32>
    %156 = arith.andi %154, %155 : vector<16x1xi32>
    %c1_i32_49 = arith.constant 1 : i32
    %157 = vector.broadcast %c1_i32_49 : i32 to vector<16x1xi32>
    %158 = arith.cmpi eq, %156, %157 : vector<16x1xi32>
    %159 = vector.shape_cast %158 : vector<16x1xi1> to vector<16x1xi1>
    %160 = vector.broadcast %159 : vector<16x1xi1> to vector<16x16xi1>
    %161 = arith.select %160, %152, %149 : vector<16x16xi1>, vector<16x16xf32>
    %162 = arith.addf %112, %161 : vector<16x16xf32>
    %cst_50 = arith.constant -1.000000e+30 : f32
    %163 = vector.broadcast %cst_50 : f32 to vector<16x16xf32>
    %164 = arith.select %6, %163, %162 : vector<16x16xi1>, vector<16x16xf32>
    %cst_51 = arith.constant dense<0xFF800000> : vector<16xf32>
    %165 = vector.multi_reduction <maximumf>, %164, %cst_51 [1] : vector<16x16xf32> to vector<16xf32>
    %166 = vector.shape_cast %165 : vector<16xf32> to vector<16x1xf32>
    %167 = vector.broadcast %166 : vector<16x1xf32> to vector<16x16xf32>
    %168 = arith.subf %164, %167 : vector<16x16xf32>
    %169 = math.exp %168 : vector<16x16xf32>
    %cst_52 = arith.constant dense<0.000000e+00> : vector<16xf32>
    %170 = vector.multi_reduction <add>, %169, %cst_52 [1] : vector<16x16xf32> to vector<16xf32>
    %171 = vector.shape_cast %170 : vector<16xf32> to vector<16x1xf32>
    %172 = tpu.reciprocal %171 {approx = true} : vector<16x1xf32> -> vector<16x1xf32>
    %173 = vector.broadcast %172 : vector<16x1xf32> to vector<16x16xf32>
    %174 = arith.mulf %169, %173 : vector<16x16xf32>
    %175 = arith.truncf %174 : vector<16x16xf32> to vector<16x16xbf16>
    %cst_53 = arith.constant dense<0.000000e+00> : vector<16x8xf32>
    %176 = tpu.matmul %175, %102, %cst_53 {dimension_numbers = #tpu.dot_dimension_numbers<[1], [0], [0], [1], [0, 0, 1, 1], [], []>} : vector<16x16xbf16>, vector<16x8xbf16>, vector<16x8xf32> -> vector<16x8xf32>
    %177 = arith.truncf %176 : vector<16x8xf32> to vector<16x8xbf16>
    %c0_54 = arith.constant 0 : index
    %c0_55 = arith.constant 0 : index
    %c8_56 = arith.constant 8 : index
    %178 = vector.load %arg7[%c0_54, %c0_55, %c8_56] : memref<1x16x16xbf16, #tpu.memory_space<vmem>>, vector<1x16x8xbf16>
    %179 = vector.shape_cast %178 : vector<1x16x8xbf16> to vector<16x8xbf16>
    %180 = vector.shape_cast %177 : vector<16x8xbf16> to vector<1x16x8xbf16>
    tpu.vector_store %arg7[%c0_54, %c0_55, %c8_56], %180 {strides = array<i32>} : memref<1x16x16xbf16, #tpu.memory_space<vmem>>, vector<1x16x8xbf16>,
    return
  }
  func.func @transform_0(%arg0: i32, %arg1: i32) -> (i32, i32, i32) {
    %c0_i32 = arith.constant 0 : i32
    %c0_i32_0 = arith.constant 0 : i32
    return %arg0, %arg1, %c0_i32 : i32, i32, i32
  }
  func.func @transform_1(%arg0: i32, %arg1: i32) -> (i32, i32, i32) {
    %c0_i32 = arith.constant 0 : i32
    %c0_i32_0 = arith.constant 0 : i32
    %c0_i32_1 = arith.constant 0 : i32
    return %arg0, %c0_i32, %c0_i32_0 : i32, i32, i32
  }
  func.func @transform_2(%arg0: i32, %arg1: i32) -> (i32, i32) {
    %c0_i32 = arith.constant 0 : i32
    %c0_i32_0 = arith.constant 0 : i32
    %c0_i32_1 = arith.constant 0 : i32
    return %c0_i32, %c0_i32_0 : i32, i32
  }
  func.func @transform_3(%arg0: i32, %arg1: i32) -> (i32, i32) {
    %c0_i32 = arith.constant 0 : i32
    %c0_i32_0 = arith.constant 0 : i32
    %c0_i32_1 = arith.constant 0 : i32
    return %c0_i32, %c0_i32_0 : i32, i32
  }
  func.func @transform_4(%arg0: i32, %arg1: i32) -> (i32, i32) {
    %c0_i32 = arith.constant 0 : i32
    %c0_i32_0 = arith.constant 0 : i32
    %c0_i32_1 = arith.constant 0 : i32
    return %c0_i32, %c0_i32_0 : i32, i32
  }
  func.func @transform_5(%arg0: i32, %arg1: i32) -> (i32, i32, i32) {
    %c0_i32 = arith.constant 0 : i32
    %c0_i32_0 = arith.constant 0 : i32
    return %arg0, %arg1, %c0_i32 : i32, i32, i32
  }
}

module attributes {stable_mosaic.version = 11 : i64} {
  func.func @_post_kernel(%arg0: i32, %arg1: memref<32x16xbf16, #tpu.memory_space<vmem>>, %arg2: memref<32x32xf32, #tpu.memory_space<vmem>>, %arg3: memref<16x32xbf16, #tpu.memory_space<vmem>>, %arg4: memref<1x32xf32, #tpu.memory_space<vmem>>, %arg5: memref<1x32xf32, #tpu.memory_space<vmem>>, %arg6: memref<32x64xbf16, #tpu.memory_space<vmem>>, %arg7: memref<1x64xf32, #tpu.memory_space<vmem>>, %arg8: memref<64x32xbf16, #tpu.memory_space<vmem>>, %arg9: memref<1x32xf32, #tpu.memory_space<vmem>>, %arg10: memref<1x32xf32, #tpu.memory_space<vmem>>, %arg11: memref<1x32xf32, #tpu.memory_space<vmem>>, %arg12: memref<32x32xf32, #tpu.memory_space<vmem>>) attributes {dimension_semantics = [#tpu.dimension_semantics<parallel>], iteration_bounds = array<i64: 1>, scalar_prefetch = 0 : i64, scratch_operands = 0 : i64, tpu.core_type = #tpu.core_type<tc>, window_params = [{transform_indices = @transform_0, window_bounds = array<i64: 32, 16>}, {transform_indices = @transform_1, window_bounds = array<i64: 32, 32>}, {pipeline_mode = #tpu.pipeline_mode<synchronous>, transform_indices = @transform_2, window_bounds = array<i64: 16, 32>}, {pipeline_mode = #tpu.pipeline_mode<synchronous>, transform_indices = @transform_3, window_bounds = array<i64: 1, 32>}, {pipeline_mode = #tpu.pipeline_mode<synchronous>, transform_indices = @transform_4, window_bounds = array<i64: 1, 32>}, {pipeline_mode = #tpu.pipeline_mode<synchronous>, transform_indices = @transform_5, window_bounds = array<i64: 32, 64>}, {pipeline_mode = #tpu.pipeline_mode<synchronous>, transform_indices = @transform_6, window_bounds = array<i64: 1, 64>}, {pipeline_mode = #tpu.pipeline_mode<synchronous>, transform_indices = @transform_7, window_bounds = array<i64: 64, 32>}, {pipeline_mode = #tpu.pipeline_mode<synchronous>, transform_indices = @transform_8, window_bounds = array<i64: 1, 32>}, {pipeline_mode = #tpu.pipeline_mode<synchronous>, transform_indices = @transform_9, window_bounds = array<i64: 1, 32>}, {pipeline_mode = #tpu.pipeline_mode<synchronous>, transform_indices = @transform_10, window_bounds = array<i64: 1, 32>}, {transform_indices = @transform_11, window_bounds = array<i64: 32, 32>}]} {
    %c0 = arith.constant 0 : index
    %c0_0 = arith.constant 0 : index
    %0 = vector.load %arg1[%c0, %c0_0] : memref<32x16xbf16, #tpu.memory_space<vmem>>, vector<32x16xbf16>
    %c0_1 = arith.constant 0 : index
    %c0_2 = arith.constant 0 : index
    %1 = vector.load %arg3[%c0_1, %c0_2] : memref<16x32xbf16, #tpu.memory_space<vmem>>, vector<16x32xbf16>
    %cst = arith.constant dense<0.000000e+00> : vector<32x32xf32>
    %2 = tpu.matmul %0, %1, %cst {dimension_numbers = #tpu.dot_dimension_numbers<[1], [0], [0], [1], [0, 0, 1, 1], [], []>} : vector<32x16xbf16>, vector<16x32xbf16>, vector<32x32xf32> -> vector<32x32xf32>
    %c0_3 = arith.constant 0 : index
    %c0_4 = arith.constant 0 : index
    %3 = vector.load %arg2[%c0_3, %c0_4] : memref<32x32xf32, #tpu.memory_space<vmem>>, vector<32x32xf32>
    %4 = arith.addf %3, %2 : vector<32x32xf32>
    %cst_5 = arith.constant dense<0.000000e+00> : vector<32xf32>
    %5 = vector.multi_reduction <add>, %4, %cst_5 [1] : vector<32x32xf32> to vector<32xf32>
    %6 = vector.shape_cast %5 : vector<32xf32> to vector<32x1xf32>
    %cst_6 = arith.constant 3.200000e+01 : f32
    %7 = vector.broadcast %cst_6 : f32 to vector<32x1xf32>
    %8 = arith.divf %6, %7 : vector<32x1xf32>
    %9 = vector.broadcast %8 : vector<32x1xf32> to vector<32x32xf32>
    %10 = arith.subf %4, %9 : vector<32x32xf32>
    %11 = arith.mulf %10, %10 : vector<32x32xf32>
    %cst_7 = arith.constant dense<0.000000e+00> : vector<32xf32>
    %12 = vector.multi_reduction <add>, %11, %cst_7 [1] : vector<32x32xf32> to vector<32xf32>
    %13 = vector.shape_cast %12 : vector<32xf32> to vector<32x1xf32>
    %cst_8 = arith.constant 3.200000e+01 : f32
    %14 = vector.broadcast %cst_8 : f32 to vector<32x1xf32>
    %15 = arith.divf %13, %14 : vector<32x1xf32>
    %16 = vector.broadcast %8 : vector<32x1xf32> to vector<32x32xf32>
    %17 = arith.subf %4, %16 : vector<32x32xf32>
    %cst_9 = arith.constant 9.99999974E-6 : f32
    %18 = vector.broadcast %cst_9 : f32 to vector<32x1xf32>
    %19 = arith.addf %15, %18 : vector<32x1xf32>
    %20 = math.rsqrt %19 : vector<32x1xf32>
    %21 = vector.broadcast %20 : vector<32x1xf32> to vector<32x32xf32>
    %22 = arith.mulf %17, %21 : vector<32x32xf32>
    %c0_10 = arith.constant 0 : index
    %c0_11 = arith.constant 0 : index
    %23 = vector.load %arg4[%c0_10, %c0_11] : memref<1x32xf32, #tpu.memory_space<vmem>>, vector<1x32xf32>
    %24 = vector.broadcast %23 : vector<1x32xf32> to vector<32x32xf32>
    %25 = arith.mulf %22, %24 : vector<32x32xf32>
    %c0_12 = arith.constant 0 : index
    %c0_13 = arith.constant 0 : index
    %26 = vector.load %arg5[%c0_12, %c0_13] : memref<1x32xf32, #tpu.memory_space<vmem>>, vector<1x32xf32>
    %27 = vector.broadcast %26 : vector<1x32xf32> to vector<32x32xf32>
    %28 = arith.addf %25, %27 : vector<32x32xf32>
    %29 = arith.truncf %28 : vector<32x32xf32> to vector<32x32xbf16>
    %c0_14 = arith.constant 0 : index
    %c0_15 = arith.constant 0 : index
    %30 = vector.load %arg6[%c0_14, %c0_15] : memref<32x64xbf16, #tpu.memory_space<vmem>>, vector<32x64xbf16>
    %cst_16 = arith.constant dense<0.000000e+00> : vector<32x64xf32>
    %31 = tpu.matmul %29, %30, %cst_16 {dimension_numbers = #tpu.dot_dimension_numbers<[1], [0], [0], [1], [0, 0, 1, 1], [], []>} : vector<32x32xbf16>, vector<32x64xbf16>, vector<32x64xf32> -> vector<32x64xf32>
    %c0_17 = arith.constant 0 : index
    %c0_18 = arith.constant 0 : index
    %32 = vector.load %arg7[%c0_17, %c0_18] : memref<1x64xf32, #tpu.memory_space<vmem>>, vector<1x64xf32>
    %33 = vector.broadcast %32 : vector<1x64xf32> to vector<32x64xf32>
    %34 = arith.addf %31, %33 : vector<32x64xf32>
    %cst_19 = arith.constant 0.000000e+00 : f32
    %35 = vector.broadcast %cst_19 : f32 to vector<32x64xf32>
    %36 = arith.maximumf %34, %35 : vector<32x64xf32>
    %37 = arith.truncf %36 : vector<32x64xf32> to vector<32x64xbf16>
    %c0_20 = arith.constant 0 : index
    %c0_21 = arith.constant 0 : index
    %38 = vector.load %arg8[%c0_20, %c0_21] : memref<64x32xbf16, #tpu.memory_space<vmem>>, vector<64x32xbf16>
    %cst_22 = arith.constant dense<0.000000e+00> : vector<32x32xf32>
    %39 = tpu.matmul %37, %38, %cst_22 {dimension_numbers = #tpu.dot_dimension_numbers<[1], [0], [0], [1], [0, 0, 1, 1], [], []>} : vector<32x64xbf16>, vector<64x32xbf16>, vector<32x32xf32> -> vector<32x32xf32>
    %c0_23 = arith.constant 0 : index
    %c0_24 = arith.constant 0 : index
    %40 = vector.load %arg9[%c0_23, %c0_24] : memref<1x32xf32, #tpu.memory_space<vmem>>, vector<1x32xf32>
    %41 = vector.broadcast %40 : vector<1x32xf32> to vector<32x32xf32>
    %42 = arith.addf %39, %41 : vector<32x32xf32>
    %43 = arith.addf %28, %42 : vector<32x32xf32>
    %cst_25 = arith.constant dense<0.000000e+00> : vector<32xf32>
    %44 = vector.multi_reduction <add>, %43, %cst_25 [1] : vector<32x32xf32> to vector<32xf32>
    %45 = vector.shape_cast %44 : vector<32xf32> to vector<32x1xf32>
    %cst_26 = arith.constant 3.200000e+01 : f32
    %46 = vector.broadcast %cst_26 : f32 to vector<32x1xf32>
    %47 = arith.divf %45, %46 : vector<32x1xf32>
    %48 = vector.broadcast %47 : vector<32x1xf32> to vector<32x32xf32>
    %49 = arith.subf %43, %48 : vector<32x32xf32>
    %50 = arith.mulf %49, %49 : vector<32x32xf32>
    %cst_27 = arith.constant dense<0.000000e+00> : vector<32xf32>
    %51 = vector.multi_reduction <add>, %50, %cst_27 [1] : vector<32x32xf32> to vector<32xf32>
    %52 = vector.shape_cast %51 : vector<32xf32> to vector<32x1xf32>
    %cst_28 = arith.constant 3.200000e+01 : f32
    %53 = vector.broadcast %cst_28 : f32 to vector<32x1xf32>
    %54 = arith.divf %52, %53 : vector<32x1xf32>
    %55 = vector.broadcast %47 : vector<32x1xf32> to vector<32x32xf32>
    %56 = arith.subf %43, %55 : vector<32x32xf32>
    %cst_29 = arith.constant 9.99999974E-6 : f32
    %57 = vector.broadcast %cst_29 : f32 to vector<32x1xf32>
    %58 = arith.addf %54, %57 : vector<32x1xf32>
    %59 = math.rsqrt %58 : vector<32x1xf32>
    %60 = vector.broadcast %59 : vector<32x1xf32> to vector<32x32xf32>
    %61 = arith.mulf %56, %60 : vector<32x32xf32>
    %c0_30 = arith.constant 0 : index
    %c0_31 = arith.constant 0 : index
    %62 = vector.load %arg10[%c0_30, %c0_31] : memref<1x32xf32, #tpu.memory_space<vmem>>, vector<1x32xf32>
    %63 = vector.broadcast %62 : vector<1x32xf32> to vector<32x32xf32>
    %64 = arith.mulf %61, %63 : vector<32x32xf32>
    %c0_32 = arith.constant 0 : index
    %c0_33 = arith.constant 0 : index
    %65 = vector.load %arg11[%c0_32, %c0_33] : memref<1x32xf32, #tpu.memory_space<vmem>>, vector<1x32xf32>
    %66 = vector.broadcast %65 : vector<1x32xf32> to vector<32x32xf32>
    %67 = arith.addf %64, %66 : vector<32x32xf32>
    %c0_34 = arith.constant 0 : index
    %c0_35 = arith.constant 0 : index
    %68 = vector.load %arg12[%c0_34, %c0_35] : memref<32x32xf32, #tpu.memory_space<vmem>>, vector<32x32xf32>
    tpu.vector_store %arg12[%c0_34, %c0_35], %67 {strides = array<i32>} : memref<32x32xf32, #tpu.memory_space<vmem>>, vector<32x32xf32>,
    return
  }
  func.func @transform_0(%arg0: i32) -> (i32, i32) {
    %c0_i32 = arith.constant 0 : i32
    %c0_i32_0 = arith.constant 0 : i32
    return %arg0, %c0_i32 : i32, i32
  }
  func.func @transform_1(%arg0: i32) -> (i32, i32) {
    %c0_i32 = arith.constant 0 : i32
    %c0_i32_0 = arith.constant 0 : i32
    return %arg0, %c0_i32 : i32, i32
  }
  func.func @transform_2(%arg0: i32) -> (i32, i32) {
    %c0_i32 = arith.constant 0 : i32
    %c0_i32_0 = arith.constant 0 : i32
    %c0_i32_1 = arith.constant 0 : i32
    return %c0_i32, %c0_i32_0 : i32, i32
  }
  func.func @transform_3(%arg0: i32) -> (i32, i32) {
    %c0_i32 = arith.constant 0 : i32
    %c0_i32_0 = arith.constant 0 : i32
    %c0_i32_1 = arith.constant 0 : i32
    return %c0_i32, %c0_i32_0 : i32, i32
  }
  func.func @transform_4(%arg0: i32) -> (i32, i32) {
    %c0_i32 = arith.constant 0 : i32
    %c0_i32_0 = arith.constant 0 : i32
    %c0_i32_1 = arith.constant 0 : i32
    return %c0_i32, %c0_i32_0 : i32, i32
  }
  func.func @transform_5(%arg0: i32) -> (i32, i32) {
    %c0_i32 = arith.constant 0 : i32
    %c0_i32_0 = arith.constant 0 : i32
    %c0_i32_1 = arith.constant 0 : i32
    return %c0_i32, %c0_i32_0 : i32, i32
  }
  func.func @transform_6(%arg0: i32) -> (i32, i32) {
    %c0_i32 = arith.constant 0 : i32
    %c0_i32_0 = arith.constant 0 : i32
    %c0_i32_1 = arith.constant 0 : i32
    return %c0_i32, %c0_i32_0 : i32, i32
  }
  func.func @transform_7(%arg0: i32) -> (i32, i32) {
    %c0_i32 = arith.constant 0 : i32
    %c0_i32_0 = arith.constant 0 : i32
    %c0_i32_1 = arith.constant 0 : i32
    return %c0_i32, %c0_i32_0 : i32, i32
  }
  func.func @transform_8(%arg0: i32) -> (i32, i32) {
    %c0_i32 = arith.constant 0 : i32
    %c0_i32_0 = arith.constant 0 : i32
    %c0_i32_1 = arith.constant 0 : i32
    return %c0_i32, %c0_i32_0 : i32, i32
  }
  func.func @transform_9(%arg0: i32) -> (i32, i32) {
    %c0_i32 = arith.constant 0 : i32
    %c0_i32_0 = arith.constant 0 : i32
    %c0_i32_1 = arith.constant 0 : i32
    return %c0_i32, %c0_i32_0 : i32, i32
  }
  func.func @transform_10(%arg0: i32) -> (i32, i32) {
    %c0_i32 = arith.constant 0 : i32
    %c0_i32_0 = arith.constant 0 : i32
    %c0_i32_1 = arith.constant 0 : i32
    return %c0_i32, %c0_i32_0 : i32, i32
  }
  func.func @transform_11(%arg0: i32) -> (i32, i32) {
    %c0_i32 = arith.constant 0 : i32
    %c0_i32_0 = arith.constant 0 : i32
    return %arg0, %c0_i32 : i32, i32
  }
}

module attributes {stable_mosaic.version = 11 : i64} {
  func.func @_linear_kernel(%arg0: i32, %arg1: memref<32x32xf32, #tpu.memory_space<vmem>>, %arg2: memref<32x48xbf16, #tpu.memory_space<vmem>>, %arg3: memref<32x48xbf16, #tpu.memory_space<vmem>>) attributes {dimension_semantics = [#tpu.dimension_semantics<parallel>], iteration_bounds = array<i64: 1>, scalar_prefetch = 0 : i64, scratch_operands = 0 : i64, tpu.core_type = #tpu.core_type<tc>, window_params = [{transform_indices = @transform_0, window_bounds = array<i64: 32, 32>}, {pipeline_mode = #tpu.pipeline_mode<synchronous>, transform_indices = @transform_1, window_bounds = array<i64: 32, 48>}, {transform_indices = @transform_2, window_bounds = array<i64: 32, 48>}]} {
    %c0 = arith.constant 0 : index
    %c0_0 = arith.constant 0 : index
    %0 = vector.load %arg1[%c0, %c0_0] : memref<32x32xf32, #tpu.memory_space<vmem>>, vector<32x32xf32>
    %1 = arith.truncf %0 : vector<32x32xf32> to vector<32x32xbf16>
    %c0_1 = arith.constant 0 : index
    %c0_2 = arith.constant 0 : index
    %2 = vector.load %arg2[%c0_1, %c0_2] : memref<32x48xbf16, #tpu.memory_space<vmem>>, vector<32x48xbf16>
    %cst = arith.constant dense<0.000000e+00> : vector<32x48xf32>
    %3 = tpu.matmul %1, %2, %cst {dimension_numbers = #tpu.dot_dimension_numbers<[1], [0], [0], [1], [0, 0, 1, 1], [], []>} : vector<32x32xbf16>, vector<32x48xbf16>, vector<32x48xf32> -> vector<32x48xf32>
    %4 = arith.truncf %3 : vector<32x48xf32> to vector<32x48xbf16>
    %c0_3 = arith.constant 0 : index
    %c0_4 = arith.constant 0 : index
    %5 = vector.load %arg3[%c0_3, %c0_4] : memref<32x48xbf16, #tpu.memory_space<vmem>>, vector<32x48xbf16>
    tpu.vector_store %arg3[%c0_3, %c0_4], %4 {strides = array<i32>} : memref<32x48xbf16, #tpu.memory_space<vmem>>, vector<32x48xbf16>,
    return
  }
  func.func @transform_0(%arg0: i32) -> (i32, i32) {
    %c0_i32 = arith.constant 0 : i32
    %c0_i32_0 = arith.constant 0 : i32
    return %arg0, %c0_i32 : i32, i32
  }
  func.func @transform_1(%arg0: i32) -> (i32, i32) {
    %c0_i32 = arith.constant 0 : i32
    %c0_i32_0 = arith.constant 0 : i32
    %c0_i32_1 = arith.constant 0 : i32
    return %c0_i32, %c0_i32_0 : i32, i32
  }
  func.func @transform_2(%arg0: i32) -> (i32, i32) {
    %c0_i32 = arith.constant 0 : i32
    %c0_i32_0 = arith.constant 0 : i32
    return %arg0, %c0_i32 : i32, i32
  }
}

module attributes {stable_mosaic.version = 11 : i64} {
  func.func @_linear_kernel(%arg0: i32, %arg1: memref<16x32xf32, #tpu.memory_space<vmem>>, %arg2: memref<32x16xbf16, #tpu.memory_space<vmem>>, %arg3: memref<16x16xbf16, #tpu.memory_space<vmem>>) attributes {dimension_semantics = [#tpu.dimension_semantics<parallel>], iteration_bounds = array<i64: 1>, scalar_prefetch = 0 : i64, scratch_operands = 0 : i64, tpu.core_type = #tpu.core_type<tc>, window_params = [{transform_indices = @transform_0, window_bounds = array<i64: 16, 32>}, {pipeline_mode = #tpu.pipeline_mode<synchronous>, transform_indices = @transform_1, window_bounds = array<i64: 32, 16>}, {transform_indices = @transform_2, window_bounds = array<i64: 16, 16>}]} {
    %c0 = arith.constant 0 : index
    %c0_0 = arith.constant 0 : index
    %0 = vector.load %arg1[%c0, %c0_0] : memref<16x32xf32, #tpu.memory_space<vmem>>, vector<16x32xf32>
    %1 = arith.truncf %0 : vector<16x32xf32> to vector<16x32xbf16>
    %c0_1 = arith.constant 0 : index
    %c0_2 = arith.constant 0 : index
    %2 = vector.load %arg2[%c0_1, %c0_2] : memref<32x16xbf16, #tpu.memory_space<vmem>>, vector<32x16xbf16>
    %cst = arith.constant dense<0.000000e+00> : vector<16x16xf32>
    %3 = tpu.matmul %1, %2, %cst {dimension_numbers = #tpu.dot_dimension_numbers<[1], [0], [0], [1], [0, 0, 1, 1], [], []>} : vector<16x32xbf16>, vector<32x16xbf16>, vector<16x16xf32> -> vector<16x16xf32>
    %4 = arith.truncf %3 : vector<16x16xf32> to vector<16x16xbf16>
    %c0_3 = arith.constant 0 : index
    %c0_4 = arith.constant 0 : index
    %5 = vector.load %arg3[%c0_3, %c0_4] : memref<16x16xbf16, #tpu.memory_space<vmem>>, vector<16x16xbf16>
    tpu.vector_store %arg3[%c0_3, %c0_4], %4 {strides = array<i32>} : memref<16x16xbf16, #tpu.memory_space<vmem>>, vector<16x16xbf16>,
    return
  }
  func.func @transform_0(%arg0: i32) -> (i32, i32) {
    %c0_i32 = arith.constant 0 : i32
    %c0_i32_0 = arith.constant 0 : i32
    return %arg0, %c0_i32 : i32, i32
  }
  func.func @transform_1(%arg0: i32) -> (i32, i32) {
    %c0_i32 = arith.constant 0 : i32
    %c0_i32_0 = arith.constant 0 : i32
    %c0_i32_1 = arith.constant 0 : i32
    return %c0_i32, %c0_i32_0 : i32, i32
  }
  func.func @transform_2(%arg0: i32) -> (i32, i32) {
    %c0_i32 = arith.constant 0 : i32
    %c0_i32_0 = arith.constant 0 : i32
    return %arg0, %c0_i32 : i32, i32
  }
}

module attributes {stable_mosaic.version = 11 : i64} {
  func.func @_attn_kernel(%arg0: i32, %arg1: i32, %arg2: memref<1x16x48xbf16, #tpu.memory_space<vmem>>, %arg3: memref<1x16x48xbf16, #tpu.memory_space<vmem>>, %arg4: memref<16x16xbf16, #tpu.memory_space<vmem>>, %arg5: memref<1x16xf32, #tpu.memory_space<vmem>>, %arg6: memref<1x16xf32, #tpu.memory_space<vmem>>, %arg7: memref<1x16x16xbf16, #tpu.memory_space<vmem>>) attributes {dimension_semantics = [#tpu.dimension_semantics<parallel>, #tpu.dimension_semantics<parallel>], iteration_bounds = array<i64: 2, 1>, scalar_prefetch = 0 : i64, scratch_operands = 0 : i64, tpu.core_type = #tpu.core_type<tc>, window_params = [{transform_indices = @transform_0, window_bounds = array<i64: 1, 16, 48>}, {transform_indices = @transform_1, window_bounds = array<i64: 1, 16, 48>}, {pipeline_mode = #tpu.pipeline_mode<synchronous>, transform_indices = @transform_2, window_bounds = array<i64: 16, 16>}, {pipeline_mode = #tpu.pipeline_mode<synchronous>, transform_indices = @transform_3, window_bounds = array<i64: 1, 16>}, {pipeline_mode = #tpu.pipeline_mode<synchronous>, transform_indices = @transform_4, window_bounds = array<i64: 1, 16>}, {transform_indices = @transform_5, window_bounds = array<i64: 1, 16, 16>}]} {
    %c16_i32 = arith.constant 16 : i32
    %0 = arith.muli %arg1, %c16_i32 : i32
    %1 = tpu.iota {dimensions = array<i32: 0>} : vector<16x1xi32>
    %2 = vector.broadcast %0 : i32 to vector<16x1xi32>
    %3 = arith.addi %2, %1 : vector<16x1xi32>
    %4 = tpu.iota {dimensions = array<i32: 1>} : vector<16x16xi32>
    %5 = vector.broadcast %3 : vector<16x1xi32> to vector<16x16xi32>
    %6 = arith.cmpi sgt, %4, %5 : vector<16x16xi32>
    %c15_i32 = arith.constant 15 : i32
    %7 = vector.broadcast %c15_i32 : i32 to vector<16x1xi32>
    %8 = arith.subi %7, %3 : vector<16x1xi32>
    %c0 = arith.constant 0 : index
    %c0_0 = arith.constant 0 : index
    %9 = vector.load %arg5[%c0, %c0_0] : memref<1x16xf32, #tpu.memory_space<vmem>>, vector<1x16xf32>
    %c0_1 = arith.constant 0 : index
    %c0_2 = arith.constant 0 : index
    %10 = vector.load %arg6[%c0_1, %c0_2] : memref<1x16xf32, #tpu.memory_space<vmem>>, vector<1x16xf32>
    %c0_3 = arith.constant 0 : index
    %c0_4 = arith.constant 0 : index
    %c0_5 = arith.constant 0 : index
    %11 = vector.load %arg2[%c0_3, %c0_4, %c0_5] : memref<1x16x48xbf16, #tpu.memory_space<vmem>>, vector<1x16x8xbf16>
    %12 = vector.shape_cast %11 : vector<1x16x8xbf16> to vector<16x8xbf16>
    %13 = arith.extf %12 : vector<16x8xbf16> to vector<16x8xf32>
    %c0_6 = arith.constant 0 : index
    %c0_7 = arith.constant 0 : index
    %c16 = arith.constant 16 : index
    %14 = vector.load %arg3[%c0_6, %c0_7, %c16] : memref<1x16x48xbf16, #tpu.memory_space<vmem>>, vector<1x16x8xbf16>
    %15 = vector.shape_cast %14 : vector<1x16x8xbf16> to vector<16x8xbf16>
    %c0_8 = arith.constant 0 : index
    %c0_9 = arith.constant 0 : index
    %c32 = arith.constant 32 : index
    %16 = vector.load %arg3[%c0_8, %c0_9, %c32] : memref<1x16x48xbf16, #tpu.memory_space<vmem>>, vector<1x16x8xbf16>
    %17 = vector.shape_cast %16 : vector<1x16x8xbf16> to vector<16x8xbf16>
    %c0_10 = arith.constant 0 : index
    %c0_11 = arith.constant 0 : index
    %18 = vector.load %arg4[%c0_10, %c0_11] : memref<16x16xbf16, #tpu.memory_space<vmem>>, vector<16x8xbf16>
    %19 = vector.extract_strided_slice %9 {offsets = [0, 0], sizes = [1, 8], strides = [1, 1]} : vector<1x16xf32> to vector<1x8xf32>
    %20 = vector.broadcast %19 : vector<1x8xf32> to vector<16x8xf32>
    %21 = arith.addf %13, %20 : vector<16x8xf32>
    %22 = arith.truncf %21 : vector<16x8xf32> to vector<16x8xbf16>
    %23 = vector.extract_strided_slice %10 {offsets = [0, 0], sizes = [1, 8], strides = [1, 1]} : vector<1x16xf32> to vector<1x8xf32>
    %24 = vector.broadcast %23 : vector<1x8xf32> to vector<16x8xf32>
    %25 = arith.addf %13, %24 : vector<16x8xf32>
    %26 = arith.truncf %25 : vector<16x8xf32> to vector<16x8xbf16>
    %cst = arith.constant dense<0.000000e+00> : vector<16x16xf32>
    %27 = tpu.matmul %22, %15, %cst {dimension_numbers = #tpu.dot_dimension_numbers<[1], [1], [0], [0], [0, 0, 1, 0], [], []>} : vector<16x8xbf16>, vector<16x8xbf16>, vector<16x16xf32> -> vector<16x16xf32>
    %cst_12 = arith.constant dense<0.000000e+00> : vector<16x16xf32>
    %28 = tpu.matmul %26, %18, %cst_12 {dimension_numbers = #tpu.dot_dimension_numbers<[1], [1], [0], [0], [0, 0, 1, 0], [], []>} : vector<16x8xbf16>, vector<16x8xbf16>, vector<16x16xf32> -> vector<16x16xf32>
    %29 = vector.extract_strided_slice %28 {offsets = [0, 1], sizes = [16, 15], strides = [1, 1]} : vector<16x16xf32> to vector<16x15xf32>
    %30 = vector.extract_strided_slice %28 {offsets = [0, 0], sizes = [16, 1], strides = [1, 1]} : vector<16x16xf32> to vector<16x1xf32>
    %31 = tpu.concatenate %29, %30 in 1 : vector<16x15xf32>, vector<16x1xf32> -> vector<16x16xf32>
    %c0_i32 = arith.constant 0 : i32
    %32 = vector.broadcast %c0_i32 : i32 to vector<16x1xi32>
    %33 = arith.shrsi %8, %32 : vector<16x1xi32>
    %c1_i32 = arith.constant 1 : i32
    %34 = vector.broadcast %c1_i32 : i32 to vector<16x1xi32>
    %35 = arith.andi %33, %34 : vector<16x1xi32>
    %c1_i32_13 = arith.constant 1 : i32
    %36 = vector.broadcast %c1_i32_13 : i32 to vector<16x1xi32>
    %37 = arith.cmpi eq, %35, %36 : vector<16x1xi32>
    %38 = vector.shape_cast %37 : vector<16x1xi1> to vector<16x1xi1>
    %39 = vector.broadcast %38 : vector<16x1xi1> to vector<16x16xi1>
    %40 = arith.select %39, %31, %28 : vector<16x16xi1>, vector<16x16xf32>
    %41 = vector.extract_strided_slice %40 {offsets = [0, 2], sizes = [16, 14], strides = [1, 1]} : vector<16x16xf32> to vector<16x14xf32>
    %42 = vector.extract_strided_slice %40 {offsets = [0, 0], sizes = [16, 2], strides = [1, 1]} : vector<16x16xf32> to vector<16x2xf32>
    %43 = tpu.concatenate %41, %42 in 1 : vector<16x14xf32>, vector<16x2xf32> -> vector<16x16xf32>
    %c1_i32_14 = arith.constant 1 : i32
    %44 = vector.broadcast %c1_i32_14 : i32 to vector<16x1xi32>
    %45 = arith.shrsi %8, %44 : vector<16x1xi32>
    %c1_i32_15 = arith.constant 1 : i32
    %46 = vector.broadcast %c1_i32_15 : i32 to vector<16x1xi32>
    %47 = arith.andi %45, %46 : vector<16x1xi32>
    %c1_i32_16 = arith.constant 1 : i32
    %48 = vector.broadcast %c1_i32_16 : i32 to vector<16x1xi32>
    %49 = arith.cmpi eq, %47, %48 : vector<16x1xi32>
    %50 = vector.shape_cast %49 : vector<16x1xi1> to vector<16x1xi1>
    %51 = vector.broadcast %50 : vector<16x1xi1> to vector<16x16xi1>
    %52 = arith.select %51, %43, %40 : vector<16x16xi1>, vector<16x16xf32>
    %53 = vector.extract_strided_slice %52 {offsets = [0, 4], sizes = [16, 12], strides = [1, 1]} : vector<16x16xf32> to vector<16x12xf32>
    %54 = vector.extract_strided_slice %52 {offsets = [0, 0], sizes = [16, 4], strides = [1, 1]} : vector<16x16xf32> to vector<16x4xf32>
    %55 = tpu.concatenate %53, %54 in 1 : vector<16x12xf32>, vector<16x4xf32> -> vector<16x16xf32>
    %c2_i32 = arith.constant 2 : i32
    %56 = vector.broadcast %c2_i32 : i32 to vector<16x1xi32>
    %57 = arith.shrsi %8, %56 : vector<16x1xi32>
    %c1_i32_17 = arith.constant 1 : i32
    %58 = vector.broadcast %c1_i32_17 : i32 to vector<16x1xi32>
    %59 = arith.andi %57, %58 : vector<16x1xi32>
    %c1_i32_18 = arith.constant 1 : i32
    %60 = vector.broadcast %c1_i32_18 : i32 to vector<16x1xi32>
    %61 = arith.cmpi eq, %59, %60 : vector<16x1xi32>
    %62 = vector.shape_cast %61 : vector<16x1xi1> to vector<16x1xi1>
    %63 = vector.broadcast %62 : vector<16x1xi1> to vector<16x16xi1>
    %64 = arith.select %63, %55, %52 : vector<16x16xi1>, vector<16x16xf32>
    %65 = vector.extract_strided_slice %64 {offsets = [0, 8], sizes = [16, 8], strides = [1, 1]} : vector<16x16xf32> to vector<16x8xf32>
    %66 = vector.extract_strided_slice %64 {offsets = [0, 0], sizes = [16, 8], strides = [1, 1]} : vector<16x16xf32> to vector<16x8xf32>
    %67 = tpu.concatenate %65, %66 in 1 : vector<16x8xf32>, vector<16x8xf32> -> vector<16x16xf32>
    %c3_i32 = arith.constant 3 : i32
    %68 = vector.broadcast %c3_i32 : i32 to vector<16x1xi32>
    %69 = arith.shrsi %8, %68 : vector<16x1xi32>
    %c1_i32_19 = arith.constant 1 : i32
    %70 = vector.broadcast %c1_i32_19 : i32 to vector<16x1xi32>
    %71 = arith.andi %69, %70 : vector<16x1xi32>
    %c1_i32_20 = arith.constant 1 : i32
    %72 = vector.broadcast %c1_i32_20 : i32 to vector<16x1xi32>
    %73 = arith.cmpi eq, %71, %72 : vector<16x1xi32>
    %74 = vector.shape_cast %73 : vector<16x1xi1> to vector<16x1xi1>
    %75 = vector.broadcast %74 : vector<16x1xi1> to vector<16x16xi1>
    %76 = arith.select %75, %67, %64 : vector<16x16xi1>, vector<16x16xf32>
    %77 = arith.addf %27, %76 : vector<16x16xf32>
    %cst_21 = arith.constant -1.000000e+30 : f32
    %78 = vector.broadcast %cst_21 : f32 to vector<16x16xf32>
    %79 = arith.select %6, %78, %77 : vector<16x16xi1>, vector<16x16xf32>
    %cst_22 = arith.constant dense<0xFF800000> : vector<16xf32>
    %80 = vector.multi_reduction <maximumf>, %79, %cst_22 [1] : vector<16x16xf32> to vector<16xf32>
    %81 = vector.shape_cast %80 : vector<16xf32> to vector<16x1xf32>
    %82 = vector.broadcast %81 : vector<16x1xf32> to vector<16x16xf32>
    %83 = arith.subf %79, %82 : vector<16x16xf32>
    %84 = math.exp %83 : vector<16x16xf32>
    %cst_23 = arith.constant dense<0.000000e+00> : vector<16xf32>
    %85 = vector.multi_reduction <add>, %84, %cst_23 [1] : vector<16x16xf32> to vector<16xf32>
    %86 = vector.shape_cast %85 : vector<16xf32> to vector<16x1xf32>
    %87 = tpu.reciprocal %86 {approx = true} : vector<16x1xf32> -> vector<16x1xf32>
    %88 = vector.broadcast %87 : vector<16x1xf32> to vector<16x16xf32>
    %89 = arith.mulf %84, %88 : vector<16x16xf32>
    %90 = arith.truncf %89 : vector<16x16xf32> to vector<16x16xbf16>
    %cst_24 = arith.constant dense<0.000000e+00> : vector<16x8xf32>
    %91 = tpu.matmul %90, %17, %cst_24 {dimension_numbers = #tpu.dot_dimension_numbers<[1], [0], [0], [1], [0, 0, 1, 1], [], []>} : vector<16x16xbf16>, vector<16x8xbf16>, vector<16x8xf32> -> vector<16x8xf32>
    %92 = arith.truncf %91 : vector<16x8xf32> to vector<16x8xbf16>
    %c0_25 = arith.constant 0 : index
    %c0_26 = arith.constant 0 : index
    %c0_27 = arith.constant 0 : index
    %93 = vector.load %arg7[%c0_25, %c0_26, %c0_27] : memref<1x16x16xbf16, #tpu.memory_space<vmem>>, vector<1x16x8xbf16>
    %94 = vector.shape_cast %93 : vector<1x16x8xbf16> to vector<16x8xbf16>
    %95 = vector.shape_cast %92 : vector<16x8xbf16> to vector<1x16x8xbf16>
    tpu.vector_store %arg7[%c0_25, %c0_26, %c0_27], %95 {strides = array<i32>} : memref<1x16x16xbf16, #tpu.memory_space<vmem>>, vector<1x16x8xbf16>,
    %c0_28 = arith.constant 0 : index
    %c0_29 = arith.constant 0 : index
    %c8 = arith.constant 8 : index
    %96 = vector.load %arg2[%c0_28, %c0_29, %c8] : memref<1x16x48xbf16, #tpu.memory_space<vmem>>, vector<1x16x8xbf16>
    %97 = vector.shape_cast %96 : vector<1x16x8xbf16> to vector<16x8xbf16>
    %98 = arith.extf %97 : vector<16x8xbf16> to vector<16x8xf32>
    %c0_30 = arith.constant 0 : index
    %c0_31 = arith.constant 0 : index
    %c24 = arith.constant 24 : index
    %99 = vector.load %arg3[%c0_30, %c0_31, %c24] : memref<1x16x48xbf16, #tpu.memory_space<vmem>>, vector<1x16x8xbf16>
    %100 = vector.shape_cast %99 : vector<1x16x8xbf16> to vector<16x8xbf16>
    %c0_32 = arith.constant 0 : index
    %c0_33 = arith.constant 0 : index
    %c40 = arith.constant 40 : index
    %101 = vector.load %arg3[%c0_32, %c0_33, %c40] : memref<1x16x48xbf16, #tpu.memory_space<vmem>>, vector<1x16x8xbf16>
    %102 = vector.shape_cast %101 : vector<1x16x8xbf16> to vector<16x8xbf16>
    %c0_34 = arith.constant 0 : index
    %c8_35 = arith.constant 8 : index
    %103 = vector.load %arg4[%c0_34, %c8_35] : memref<16x16xbf16, #tpu.memory_space<vmem>>, vector<16x8xbf16>
    %104 = vector.extract_strided_slice %9 {offsets = [0, 8], sizes = [1, 8], strides = [1, 1]} : vector<1x16xf32> to vector<1x8xf32>
    %105 = vector.broadcast %104 : vector<1x8xf32> to vector<16x8xf32>
    %106 = arith.addf %98, %105 : vector<16x8xf32>
    %107 = arith.truncf %106 : vector<16x8xf32> to vector<16x8xbf16>
    %108 = vector.extract_strided_slice %10 {offsets = [0, 8], sizes = [1, 8], strides = [1, 1]} : vector<1x16xf32> to vector<1x8xf32>
    %109 = vector.broadcast %108 : vector<1x8xf32> to vector<16x8xf32>
    %110 = arith.addf %98, %109 : vector<16x8xf32>
    %111 = arith.truncf %110 : vector<16x8xf32> to vector<16x8xbf16>
    %cst_36 = arith.constant dense<0.000000e+00> : vector<16x16xf32>
    %112 = tpu.matmul %107, %100, %cst_36 {dimension_numbers = #tpu.dot_dimension_numbers<[1], [1], [0], [0], [0, 0, 1, 0], [], []>} : vector<16x8xbf16>, vector<16x8xbf16>, vector<16x16xf32> -> vector<16x16xf32>
    %cst_37 = arith.constant dense<0.000000e+00> : vector<16x16xf32>
    %113 = tpu.matmul %111, %103, %cst_37 {dimension_numbers = #tpu.dot_dimension_numbers<[1], [1], [0], [0], [0, 0, 1, 0], [], []>} : vector<16x8xbf16>, vector<16x8xbf16>, vector<16x16xf32> -> vector<16x16xf32>
    %114 = vector.extract_strided_slice %113 {offsets = [0, 1], sizes = [16, 15], strides = [1, 1]} : vector<16x16xf32> to vector<16x15xf32>
    %115 = vector.extract_strided_slice %113 {offsets = [0, 0], sizes = [16, 1], strides = [1, 1]} : vector<16x16xf32> to vector<16x1xf32>
    %116 = tpu.concatenate %114, %115 in 1 : vector<16x15xf32>, vector<16x1xf32> -> vector<16x16xf32>
    %c0_i32_38 = arith.constant 0 : i32
    %117 = vector.broadcast %c0_i32_38 : i32 to vector<16x1xi32>
    %118 = arith.shrsi %8, %117 : vector<16x1xi32>
    %c1_i32_39 = arith.constant 1 : i32
    %119 = vector.broadcast %c1_i32_39 : i32 to vector<16x1xi32>
    %120 = arith.andi %118, %119 : vector<16x1xi32>
    %c1_i32_40 = arith.constant 1 : i32
    %121 = vector.broadcast %c1_i32_40 : i32 to vector<16x1xi32>
    %122 = arith.cmpi eq, %120, %121 : vector<16x1xi32>
    %123 = vector.shape_cast %122 : vector<16x1xi1> to vector<16x1xi1>
    %124 = vector.broadcast %123 : vector<16x1xi1> to vector<16x16xi1>
    %125 = arith.select %124, %116, %113 : vector<16x16xi1>, vector<16x16xf32>
    %126 = vector.extract_strided_slice %125 {offsets = [0, 2], sizes = [16, 14], strides = [1, 1]} : vector<16x16xf32> to vector<16x14xf32>
    %127 = vector.extract_strided_slice %125 {offsets = [0, 0], sizes = [16, 2], strides = [1, 1]} : vector<16x16xf32> to vector<16x2xf32>
    %128 = tpu.concatenate %126, %127 in 1 : vector<16x14xf32>, vector<16x2xf32> -> vector<16x16xf32>
    %c1_i32_41 = arith.constant 1 : i32
    %129 = vector.broadcast %c1_i32_41 : i32 to vector<16x1xi32>
    %130 = arith.shrsi %8, %129 : vector<16x1xi32>
    %c1_i32_42 = arith.constant 1 : i32
    %131 = vector.broadcast %c1_i32_42 : i32 to vector<16x1xi32>
    %132 = arith.andi %130, %131 : vector<16x1xi32>
    %c1_i32_43 = arith.constant 1 : i32
    %133 = vector.broadcast %c1_i32_43 : i32 to vector<16x1xi32>
    %134 = arith.cmpi eq, %132, %133 : vector<16x1xi32>
    %135 = vector.shape_cast %134 : vector<16x1xi1> to vector<16x1xi1>
    %136 = vector.broadcast %135 : vector<16x1xi1> to vector<16x16xi1>
    %137 = arith.select %136, %128, %125 : vector<16x16xi1>, vector<16x16xf32>
    %138 = vector.extract_strided_slice %137 {offsets = [0, 4], sizes = [16, 12], strides = [1, 1]} : vector<16x16xf32> to vector<16x12xf32>
    %139 = vector.extract_strided_slice %137 {offsets = [0, 0], sizes = [16, 4], strides = [1, 1]} : vector<16x16xf32> to vector<16x4xf32>
    %140 = tpu.concatenate %138, %139 in 1 : vector<16x12xf32>, vector<16x4xf32> -> vector<16x16xf32>
    %c2_i32_44 = arith.constant 2 : i32
    %141 = vector.broadcast %c2_i32_44 : i32 to vector<16x1xi32>
    %142 = arith.shrsi %8, %141 : vector<16x1xi32>
    %c1_i32_45 = arith.constant 1 : i32
    %143 = vector.broadcast %c1_i32_45 : i32 to vector<16x1xi32>
    %144 = arith.andi %142, %143 : vector<16x1xi32>
    %c1_i32_46 = arith.constant 1 : i32
    %145 = vector.broadcast %c1_i32_46 : i32 to vector<16x1xi32>
    %146 = arith.cmpi eq, %144, %145 : vector<16x1xi32>
    %147 = vector.shape_cast %146 : vector<16x1xi1> to vector<16x1xi1>
    %148 = vector.broadcast %147 : vector<16x1xi1> to vector<16x16xi1>
    %149 = arith.select %148, %140, %137 : vector<16x16xi1>, vector<16x16xf32>
    %150 = vector.extract_strided_slice %149 {offsets = [0, 8], sizes = [16, 8], strides = [1, 1]} : vector<16x16xf32> to vector<16x8xf32>
    %151 = vector.extract_strided_slice %149 {offsets = [0, 0], sizes = [16, 8], strides = [1, 1]} : vector<16x16xf32> to vector<16x8xf32>
    %152 = tpu.concatenate %150, %151 in 1 : vector<16x8xf32>, vector<16x8xf32> -> vector<16x16xf32>
    %c3_i32_47 = arith.constant 3 : i32
    %153 = vector.broadcast %c3_i32_47 : i32 to vector<16x1xi32>
    %154 = arith.shrsi %8, %153 : vector<16x1xi32>
    %c1_i32_48 = arith.constant 1 : i32
    %155 = vector.broadcast %c1_i32_48 : i32 to vector<16x1xi32>
    %156 = arith.andi %154, %155 : vector<16x1xi32>
    %c1_i32_49 = arith.constant 1 : i32
    %157 = vector.broadcast %c1_i32_49 : i32 to vector<16x1xi32>
    %158 = arith.cmpi eq, %156, %157 : vector<16x1xi32>
    %159 = vector.shape_cast %158 : vector<16x1xi1> to vector<16x1xi1>
    %160 = vector.broadcast %159 : vector<16x1xi1> to vector<16x16xi1>
    %161 = arith.select %160, %152, %149 : vector<16x16xi1>, vector<16x16xf32>
    %162 = arith.addf %112, %161 : vector<16x16xf32>
    %cst_50 = arith.constant -1.000000e+30 : f32
    %163 = vector.broadcast %cst_50 : f32 to vector<16x16xf32>
    %164 = arith.select %6, %163, %162 : vector<16x16xi1>, vector<16x16xf32>
    %cst_51 = arith.constant dense<0xFF800000> : vector<16xf32>
    %165 = vector.multi_reduction <maximumf>, %164, %cst_51 [1] : vector<16x16xf32> to vector<16xf32>
    %166 = vector.shape_cast %165 : vector<16xf32> to vector<16x1xf32>
    %167 = vector.broadcast %166 : vector<16x1xf32> to vector<16x16xf32>
    %168 = arith.subf %164, %167 : vector<16x16xf32>
    %169 = math.exp %168 : vector<16x16xf32>
    %cst_52 = arith.constant dense<0.000000e+00> : vector<16xf32>
    %170 = vector.multi_reduction <add>, %169, %cst_52 [1] : vector<16x16xf32> to vector<16xf32>
    %171 = vector.shape_cast %170 : vector<16xf32> to vector<16x1xf32>
    %172 = tpu.reciprocal %171 {approx = true} : vector<16x1xf32> -> vector<16x1xf32>
    %173 = vector.broadcast %172 : vector<16x1xf32> to vector<16x16xf32>
    %174 = arith.mulf %169, %173 : vector<16x16xf32>
    %175 = arith.truncf %174 : vector<16x16xf32> to vector<16x16xbf16>
    %cst_53 = arith.constant dense<0.000000e+00> : vector<16x8xf32>
    %176 = tpu.matmul %175, %102, %cst_53 {dimension_numbers = #tpu.dot_dimension_numbers<[1], [0], [0], [1], [0, 0, 1, 1], [], []>} : vector<16x16xbf16>, vector<16x8xbf16>, vector<16x8xf32> -> vector<16x8xf32>
    %177 = arith.truncf %176 : vector<16x8xf32> to vector<16x8xbf16>
    %c0_54 = arith.constant 0 : index
    %c0_55 = arith.constant 0 : index
    %c8_56 = arith.constant 8 : index
    %178 = vector.load %arg7[%c0_54, %c0_55, %c8_56] : memref<1x16x16xbf16, #tpu.memory_space<vmem>>, vector<1x16x8xbf16>
    %179 = vector.shape_cast %178 : vector<1x16x8xbf16> to vector<16x8xbf16>
    %180 = vector.shape_cast %177 : vector<16x8xbf16> to vector<1x16x8xbf16>
    tpu.vector_store %arg7[%c0_54, %c0_55, %c8_56], %180 {strides = array<i32>} : memref<1x16x16xbf16, #tpu.memory_space<vmem>>, vector<1x16x8xbf16>,
    return
  }
  func.func @transform_0(%arg0: i32, %arg1: i32) -> (i32, i32, i32) {
    %c0_i32 = arith.constant 0 : i32
    %c0_i32_0 = arith.constant 0 : i32
    return %arg0, %arg1, %c0_i32 : i32, i32, i32
  }
  func.func @transform_1(%arg0: i32, %arg1: i32) -> (i32, i32, i32) {
    %c0_i32 = arith.constant 0 : i32
    %c0_i32_0 = arith.constant 0 : i32
    %c0_i32_1 = arith.constant 0 : i32
    return %arg0, %c0_i32, %c0_i32_0 : i32, i32, i32
  }
  func.func @transform_2(%arg0: i32, %arg1: i32) -> (i32, i32) {
    %c0_i32 = arith.constant 0 : i32
    %c0_i32_0 = arith.constant 0 : i32
    %c0_i32_1 = arith.constant 0 : i32
    return %c0_i32, %c0_i32_0 : i32, i32
  }
  func.func @transform_3(%arg0: i32, %arg1: i32) -> (i32, i32) {
    %c0_i32 = arith.constant 0 : i32
    %c0_i32_0 = arith.constant 0 : i32
    %c0_i32_1 = arith.constant 0 : i32
    return %c0_i32, %c0_i32_0 : i32, i32
  }
  func.func @transform_4(%arg0: i32, %arg1: i32) -> (i32, i32) {
    %c0_i32 = arith.constant 0 : i32
    %c0_i32_0 = arith.constant 0 : i32
    %c0_i32_1 = arith.constant 0 : i32
    return %c0_i32, %c0_i32_0 : i32, i32
  }
  func.func @transform_5(%arg0: i32, %arg1: i32) -> (i32, i32, i32) {
    %c0_i32 = arith.constant 0 : i32
    %c0_i32_0 = arith.constant 0 : i32
    return %arg0, %arg1, %c0_i32 : i32, i32, i32
  }
}

module attributes {stable_mosaic.version = 11 : i64} {
  func.func @_post_kernel(%arg0: i32, %arg1: memref<32x16xbf16, #tpu.memory_space<vmem>>, %arg2: memref<32x32xf32, #tpu.memory_space<vmem>>, %arg3: memref<16x32xbf16, #tpu.memory_space<vmem>>, %arg4: memref<1x32xf32, #tpu.memory_space<vmem>>, %arg5: memref<1x32xf32, #tpu.memory_space<vmem>>, %arg6: memref<32x64xbf16, #tpu.memory_space<vmem>>, %arg7: memref<1x64xf32, #tpu.memory_space<vmem>>, %arg8: memref<64x32xbf16, #tpu.memory_space<vmem>>, %arg9: memref<1x32xf32, #tpu.memory_space<vmem>>, %arg10: memref<1x32xf32, #tpu.memory_space<vmem>>, %arg11: memref<1x32xf32, #tpu.memory_space<vmem>>, %arg12: memref<32x32xf32, #tpu.memory_space<vmem>>) attributes {dimension_semantics = [#tpu.dimension_semantics<parallel>], iteration_bounds = array<i64: 1>, scalar_prefetch = 0 : i64, scratch_operands = 0 : i64, tpu.core_type = #tpu.core_type<tc>, window_params = [{transform_indices = @transform_0, window_bounds = array<i64: 32, 16>}, {transform_indices = @transform_1, window_bounds = array<i64: 32, 32>}, {pipeline_mode = #tpu.pipeline_mode<synchronous>, transform_indices = @transform_2, window_bounds = array<i64: 16, 32>}, {pipeline_mode = #tpu.pipeline_mode<synchronous>, transform_indices = @transform_3, window_bounds = array<i64: 1, 32>}, {pipeline_mode = #tpu.pipeline_mode<synchronous>, transform_indices = @transform_4, window_bounds = array<i64: 1, 32>}, {pipeline_mode = #tpu.pipeline_mode<synchronous>, transform_indices = @transform_5, window_bounds = array<i64: 32, 64>}, {pipeline_mode = #tpu.pipeline_mode<synchronous>, transform_indices = @transform_6, window_bounds = array<i64: 1, 64>}, {pipeline_mode = #tpu.pipeline_mode<synchronous>, transform_indices = @transform_7, window_bounds = array<i64: 64, 32>}, {pipeline_mode = #tpu.pipeline_mode<synchronous>, transform_indices = @transform_8, window_bounds = array<i64: 1, 32>}, {pipeline_mode = #tpu.pipeline_mode<synchronous>, transform_indices = @transform_9, window_bounds = array<i64: 1, 32>}, {pipeline_mode = #tpu.pipeline_mode<synchronous>, transform_indices = @transform_10, window_bounds = array<i64: 1, 32>}, {transform_indices = @transform_11, window_bounds = array<i64: 32, 32>}]} {
    %c0 = arith.constant 0 : index
    %c0_0 = arith.constant 0 : index
    %0 = vector.load %arg1[%c0, %c0_0] : memref<32x16xbf16, #tpu.memory_space<vmem>>, vector<32x16xbf16>
    %c0_1 = arith.constant 0 : index
    %c0_2 = arith.constant 0 : index
    %1 = vector.load %arg3[%c0_1, %c0_2] : memref<16x32xbf16, #tpu.memory_space<vmem>>, vector<16x32xbf16>
    %cst = arith.constant dense<0.000000e+00> : vector<32x32xf32>
    %2 = tpu.matmul %0, %1, %cst {dimension_numbers = #tpu.dot_dimension_numbers<[1], [0], [0], [1], [0, 0, 1, 1], [], []>} : vector<32x16xbf16>, vector<16x32xbf16>, vector<32x32xf32> -> vector<32x32xf32>
    %c0_3 = arith.constant 0 : index
    %c0_4 = arith.constant 0 : index
    %3 = vector.load %arg2[%c0_3, %c0_4] : memref<32x32xf32, #tpu.memory_space<vmem>>, vector<32x32xf32>
    %4 = arith.addf %3, %2 : vector<32x32xf32>
    %cst_5 = arith.constant dense<0.000000e+00> : vector<32xf32>
    %5 = vector.multi_reduction <add>, %4, %cst_5 [1] : vector<32x32xf32> to vector<32xf32>
    %6 = vector.shape_cast %5 : vector<32xf32> to vector<32x1xf32>
    %cst_6 = arith.constant 3.200000e+01 : f32
    %7 = vector.broadcast %cst_6 : f32 to vector<32x1xf32>
    %8 = arith.divf %6, %7 : vector<32x1xf32>
    %9 = vector.broadcast %8 : vector<32x1xf32> to vector<32x32xf32>
    %10 = arith.subf %4, %9 : vector<32x32xf32>
    %11 = arith.mulf %10, %10 : vector<32x32xf32>
    %cst_7 = arith.constant dense<0.000000e+00> : vector<32xf32>
    %12 = vector.multi_reduction <add>, %11, %cst_7 [1] : vector<32x32xf32> to vector<32xf32>
    %13 = vector.shape_cast %12 : vector<32xf32> to vector<32x1xf32>
    %cst_8 = arith.constant 3.200000e+01 : f32
    %14 = vector.broadcast %cst_8 : f32 to vector<32x1xf32>
    %15 = arith.divf %13, %14 : vector<32x1xf32>
    %16 = vector.broadcast %8 : vector<32x1xf32> to vector<32x32xf32>
    %17 = arith.subf %4, %16 : vector<32x32xf32>
    %cst_9 = arith.constant 9.99999974E-6 : f32
    %18 = vector.broadcast %cst_9 : f32 to vector<32x1xf32>
    %19 = arith.addf %15, %18 : vector<32x1xf32>
    %20 = math.rsqrt %19 : vector<32x1xf32>
    %21 = vector.broadcast %20 : vector<32x1xf32> to vector<32x32xf32>
    %22 = arith.mulf %17, %21 : vector<32x32xf32>
    %c0_10 = arith.constant 0 : index
    %c0_11 = arith.constant 0 : index
    %23 = vector.load %arg4[%c0_10, %c0_11] : memref<1x32xf32, #tpu.memory_space<vmem>>, vector<1x32xf32>
    %24 = vector.broadcast %23 : vector<1x32xf32> to vector<32x32xf32>
    %25 = arith.mulf %22, %24 : vector<32x32xf32>
    %c0_12 = arith.constant 0 : index
    %c0_13 = arith.constant 0 : index
    %26 = vector.load %arg5[%c0_12, %c0_13] : memref<1x32xf32, #tpu.memory_space<vmem>>, vector<1x32xf32>
    %27 = vector.broadcast %26 : vector<1x32xf32> to vector<32x32xf32>
    %28 = arith.addf %25, %27 : vector<32x32xf32>
    %29 = arith.truncf %28 : vector<32x32xf32> to vector<32x32xbf16>
    %c0_14 = arith.constant 0 : index
    %c0_15 = arith.constant 0 : index
    %30 = vector.load %arg6[%c0_14, %c0_15] : memref<32x64xbf16, #tpu.memory_space<vmem>>, vector<32x64xbf16>
    %cst_16 = arith.constant dense<0.000000e+00> : vector<32x64xf32>
    %31 = tpu.matmul %29, %30, %cst_16 {dimension_numbers = #tpu.dot_dimension_numbers<[1], [0], [0], [1], [0, 0, 1, 1], [], []>} : vector<32x32xbf16>, vector<32x64xbf16>, vector<32x64xf32> -> vector<32x64xf32>
    %c0_17 = arith.constant 0 : index
    %c0_18 = arith.constant 0 : index
    %32 = vector.load %arg7[%c0_17, %c0_18] : memref<1x64xf32, #tpu.memory_space<vmem>>, vector<1x64xf32>
    %33 = vector.broadcast %32 : vector<1x64xf32> to vector<32x64xf32>
    %34 = arith.addf %31, %33 : vector<32x64xf32>
    %cst_19 = arith.constant 0.000000e+00 : f32
    %35 = vector.broadcast %cst_19 : f32 to vector<32x64xf32>
    %36 = arith.maximumf %34, %35 : vector<32x64xf32>
    %37 = arith.truncf %36 : vector<32x64xf32> to vector<32x64xbf16>
    %c0_20 = arith.constant 0 : index
    %c0_21 = arith.constant 0 : index
    %38 = vector.load %arg8[%c0_20, %c0_21] : memref<64x32xbf16, #tpu.memory_space<vmem>>, vector<64x32xbf16>
    %cst_22 = arith.constant dense<0.000000e+00> : vector<32x32xf32>
    %39 = tpu.matmul %37, %38, %cst_22 {dimension_numbers = #tpu.dot_dimension_numbers<[1], [0], [0], [1], [0, 0, 1, 1], [], []>} : vector<32x64xbf16>, vector<64x32xbf16>, vector<32x32xf32> -> vector<32x32xf32>
    %c0_23 = arith.constant 0 : index
    %c0_24 = arith.constant 0 : index
    %40 = vector.load %arg9[%c0_23, %c0_24] : memref<1x32xf32, #tpu.memory_space<vmem>>, vector<1x32xf32>
    %41 = vector.broadcast %40 : vector<1x32xf32> to vector<32x32xf32>
    %42 = arith.addf %39, %41 : vector<32x32xf32>
    %43 = arith.addf %28, %42 : vector<32x32xf32>
    %cst_25 = arith.constant dense<0.000000e+00> : vector<32xf32>
    %44 = vector.multi_reduction <add>, %43, %cst_25 [1] : vector<32x32xf32> to vector<32xf32>
    %45 = vector.shape_cast %44 : vector<32xf32> to vector<32x1xf32>
    %cst_26 = arith.constant 3.200000e+01 : f32
    %46 = vector.broadcast %cst_26 : f32 to vector<32x1xf32>
    %47 = arith.divf %45, %46 : vector<32x1xf32>
    %48 = vector.broadcast %47 : vector<32x1xf32> to vector<32x32xf32>
    %49 = arith.subf %43, %48 : vector<32x32xf32>
    %50 = arith.mulf %49, %49 : vector<32x32xf32>
    %cst_27 = arith.constant dense<0.000000e+00> : vector<32xf32>
    %51 = vector.multi_reduction <add>, %50, %cst_27 [1] : vector<32x32xf32> to vector<32xf32>
    %52 = vector.shape_cast %51 : vector<32xf32> to vector<32x1xf32>
    %cst_28 = arith.constant 3.200000e+01 : f32
    %53 = vector.broadcast %cst_28 : f32 to vector<32x1xf32>
    %54 = arith.divf %52, %53 : vector<32x1xf32>
    %55 = vector.broadcast %47 : vector<32x1xf32> to vector<32x32xf32>
    %56 = arith.subf %43, %55 : vector<32x32xf32>
    %cst_29 = arith.constant 9.99999974E-6 : f32
    %57 = vector.broadcast %cst_29 : f32 to vector<32x1xf32>
    %58 = arith.addf %54, %57 : vector<32x1xf32>
    %59 = math.rsqrt %58 : vector<32x1xf32>
    %60 = vector.broadcast %59 : vector<32x1xf32> to vector<32x32xf32>
    %61 = arith.mulf %56, %60 : vector<32x32xf32>
    %c0_30 = arith.constant 0 : index
    %c0_31 = arith.constant 0 : index
    %62 = vector.load %arg10[%c0_30, %c0_31] : memref<1x32xf32, #tpu.memory_space<vmem>>, vector<1x32xf32>
    %63 = vector.broadcast %62 : vector<1x32xf32> to vector<32x32xf32>
    %64 = arith.mulf %61, %63 : vector<32x32xf32>
    %c0_32 = arith.constant 0 : index
    %c0_33 = arith.constant 0 : index
    %65 = vector.load %arg11[%c0_32, %c0_33] : memref<1x32xf32, #tpu.memory_space<vmem>>, vector<1x32xf32>
    %66 = vector.broadcast %65 : vector<1x32xf32> to vector<32x32xf32>
    %67 = arith.addf %64, %66 : vector<32x32xf32>
    %c0_34 = arith.constant 0 : index
    %c0_35 = arith.constant 0 : index
    %68 = vector.load %arg12[%c0_34, %c0_35] : memref<32x32xf32, #tpu.memory_space<vmem>>, vector<32x32xf32>
    tpu.vector_store %arg12[%c0_34, %c0_35], %67 {strides = array<i32>} : memref<32x32xf32, #tpu.memory_space<vmem>>, vector<32x32xf32>,
    return
  }
  func.func @transform_0(%arg0: i32) -> (i32, i32) {
    %c0_i32 = arith.constant 0 : i32
    %c0_i32_0 = arith.constant 0 : i32
    return %arg0, %c0_i32 : i32, i32
  }
  func.func @transform_1(%arg0: i32) -> (i32, i32) {
    %c0_i32 = arith.constant 0 : i32
    %c0_i32_0 = arith.constant 0 : i32
    return %arg0, %c0_i32 : i32, i32
  }
  func.func @transform_2(%arg0: i32) -> (i32, i32) {
    %c0_i32 = arith.constant 0 : i32
    %c0_i32_0 = arith.constant 0 : i32
    %c0_i32_1 = arith.constant 0 : i32
    return %c0_i32, %c0_i32_0 : i32, i32
  }
  func.func @transform_3(%arg0: i32) -> (i32, i32) {
    %c0_i32 = arith.constant 0 : i32
    %c0_i32_0 = arith.constant 0 : i32
    %c0_i32_1 = arith.constant 0 : i32
    return %c0_i32, %c0_i32_0 : i32, i32
  }
  func.func @transform_4(%arg0: i32) -> (i32, i32) {
    %c0_i32 = arith.constant 0 : i32
    %c0_i32_0 = arith.constant 0 : i32
    %c0_i32_1 = arith.constant 0 : i32
    return %c0_i32, %c0_i32_0 : i32, i32
  }
  func.func @transform_5(%arg0: i32) -> (i32, i32) {
    %c0_i32 = arith.constant 0 : i32
    %c0_i32_0 = arith.constant 0 : i32
    %c0_i32_1 = arith.constant 0 : i32
    return %c0_i32, %c0_i32_0 : i32, i32
  }
  func.func @transform_6(%arg0: i32) -> (i32, i32) {
    %c0_i32 = arith.constant 0 : i32
    %c0_i32_0 = arith.constant 0 : i32
    %c0_i32_1 = arith.constant 0 : i32
    return %c0_i32, %c0_i32_0 : i32, i32
  }
  func.func @transform_7(%arg0: i32) -> (i32, i32) {
    %c0_i32 = arith.constant 0 : i32
    %c0_i32_0 = arith.constant 0 : i32
    %c0_i32_1 = arith.constant 0 : i32
    return %c0_i32, %c0_i32_0 : i32, i32
  }
  func.func @transform_8(%arg0: i32) -> (i32, i32) {
    %c0_i32 = arith.constant 0 : i32
    %c0_i32_0 = arith.constant 0 : i32
    %c0_i32_1 = arith.constant 0 : i32
    return %c0_i32, %c0_i32_0 : i32, i32
  }
  func.func @transform_9(%arg0: i32) -> (i32, i32) {
    %c0_i32 = arith.constant 0 : i32
    %c0_i32_0 = arith.constant 0 : i32
    %c0_i32_1 = arith.constant 0 : i32
    return %c0_i32, %c0_i32_0 : i32, i32
  }
  func.func @transform_10(%arg0: i32) -> (i32, i32) {
    %c0_i32 = arith.constant 0 : i32
    %c0_i32_0 = arith.constant 0 : i32
    %c0_i32_1 = arith.constant 0 : i32
    return %c0_i32, %c0_i32_0 : i32, i32
  }
  func.func @transform_11(%arg0: i32) -> (i32, i32) {
    %c0_i32 = arith.constant 0 : i32
    %c0_i32_0 = arith.constant 0 : i32
    return %arg0, %c0_i32 : i32, i32
  }
}

</mosaic_0001>

<bundles_post_ra>
// kernel: decoder_layer_forward.4
= control target key start
LH: loop header
LB: loop body
LE: loop exit
PB: predicated region body
PF: predicated region fallthrough
CT: control target
= control target key end

     0   :  { %vm34_vm0 = vcmask 261120   ;;  %vm64_vm1 = vcmask 388096   ;;  %s132_s1 = inlined_call_operand.vmem [shape: bf16[32,48], index: 1, kind: input, shape index: {}]   ;;  %s133_s0 = inlined_call_operand.vmem [shape: f32[32,32], index: 0, kind: input, shape index: {}]   ;;  %s134_s2 = inlined_call_operand.vmem [shape: bf16[32,48], index: 2, kind: output, shape index: {}]  }
   0x1   :  { %v84_v0 = vld [vmem:[%s132_s1 + $0x8] sm:$0xff]  ;;  %v83_v1 = vld [vmem:[%s132_s1] sm:$0xff]  ;;  %v14_v4 = vld [vmem:[%s133_s0 + $0x10] sm:$0xff] }
   0x2   :  { %v12_v2 = vld [vmem:[%s133_s0] sm:$0xff]  ;;  %47 = vmatpush.bf16.msra.mxu0 %v84_v0  ;;  %85 = vmatpush.bf16.msra.mxu1 %v84_v0  ;;  %v13_v3 = vld [vmem:[%s133_s0 + $0x8] sm:$0xff]  ;;  %v15_v5 = vld [vmem:[%s133_s0 + $0x18] sm:$0xff] }
   0x3   :  { %v16_v6 = vpack.c.bf16 %v13_v3, %v12_v2  ;;  %v17_v7 = vpack.c.bf16 %v15_v5, %v14_v4 }
   0x6   :  { %48 = vmatpush.bf16.msra.mxu0 %v83_v1  ;;  %86 = vmatpush.bf16.msra.mxu1 %v83_v1 }
   0x9   :  { %81 = vmatmul.msk.bf16.vlgmr.msra.gmra.mxu0 %vm34_vm0, %v16_v6  ;;  %82 = vmatmul.msk.bf16.vlgmr.msra.gmra.mxu1 %vm34_vm0, %v17_v7 }
  0x86   :  { %v50_v8 = vpop.f32.mrf.mxu0  ;;  %v55_v9 = vpop.f32.mrf.mxu1 }
  0x87   :  { %v60_v10 = vpack.c.bf16 %v50_v8, %v50_v8  ;;  %v62_v11 = vpack.c.bf16 %v55_v9, %v55_v9 }
  0x89   :  { %65 = vst.msk [vmem:[%s134_s2] sm:$0xf] %vm64_vm1, %v60_v10 }
  0x8a   :  { %67 = vst.msk [vmem:[%s134_s2 + $0x8] sm:$0xf] %vm64_vm1, %v62_v11 }
  0x8e   :  { %v52_v12 = vpop.f32.mrf.mxu0  ;;  %v57_v13 = vpop.f32.mrf.mxu1 }
  0x8f   :  { %v61_v14 = vpack.c.bf16 %v52_v12, %v52_v12  ;;  %v63_v15 = vpack.c.bf16 %v57_v13, %v57_v13 }
  0x91   :  { %66 = vst.msk [vmem:[%s134_s2 + $0x4] sm:$0xf] %vm64_vm1, %v61_v14 }
  0x92   :  { %68 = vst.msk [vmem:[%s134_s2 + $0xc] sm:$0xf] %vm64_vm1, %v63_v15 }

// kernel: decoder_layer_forward.5
= control target key start
LH: loop header
LB: loop body
LE: loop exit
PB: predicated region body
PF: predicated region fallthrough
CT: control target
= control target key end

     0   :  { %7 = vsyncpa [#allocation3], 0  ;;  %s115_s12 = smov [#allocation2]   ;;  %s116_s14 = smov 128   ;;  %s148_s0 = inlined_call_operand.hbm [shape: f32[16,32], index: 0, kind: input, shape index: {}]   ;;  %s149_s1 = inlined_call_operand.vmem [shape: bf16[32,16], index: 1, kind: input, shape index: {}]   ;;  %s150_s2 = inlined_call_operand.vmem [shape: bf16[16,16], index: 2, kind: output, shape index: {}]  }
   0x1   :  { %s12_s11 = sshll.u32 %s148_s0, 4  ;;  %s14_s13 = sshll.u32 %s115_s12, 4  ;;  %s13_s11 = int_to_ptr.hbm [resolvable:$true] %s12_s11  ;;  %s15_s13 = int_to_ptr.vmem [resolvable:$true] %s14_s13 }
   0x2   :  { %s117_s15 = smov 8  }
   0x3   :  { %20 = dma.hbm_to_vmem [thread:$0]  %s13_s11, 256, %s15_s13, [#allocation3], %s116_s14, %s116_s14, %s117_s15  }
   0x4   :  { %113 = dma.done.wait [#allocation3], 256  }
   0x5   :  { %114 = vsyncadd [#allocation3], 4294967040  ;;  %v85_v0 = vld [vmem:[%s149_s1 + $0x8] sm:$0xff]  ;;  %v84_v1 = vld [vmem:[%s149_s1] sm:$0xff]  ;;  %vm47_vm0 = vcmask 261120   ;;  %vm67_vm1 = vcmask 125952  }
   0x6   :  { %57 = vmatpush.bf16.msra.mxu0 %v85_v0  ;;  %v28_v2 = vld [vmem:[#allocation2] sm:$0xff]  ;;  %v29_v3 = vld [vmem:[#allocation2 + $0x8] sm:$0xff] }
   0x7   :  { %v30_v4 = vpack.c.bf16 %v29_v3, %v28_v2 }
   0xa   :  { %58 = vmatpush.bf16.msra.mxu0 %v84_v1 }
   0xd   :  { %83 = vmatmul.msk.bf16.vlgmr.msra.gmra.mxu0 %vm47_vm0, %v30_v4 }
  0x8a   :  { %v60_v5 = vpop.f32.mrf.mxu0 }
  0x8b   :  { %v65_v6 = vpack.c.bf16 %v60_v5, %v60_v5 }
  0x8d   :  { %68 = vst.msk [vmem:[%s150_s2] sm:$0xf] %vm67_vm1, %v65_v6 }
  0x92   :  { %v62_v7 = vpop.f32.mrf.mxu0 }
  0x93   :  { %v66_v8 = vpack.c.bf16 %v62_v7, %v62_v7 }
  0x95   :  { %69 = vst.msk [vmem:[%s150_s2 + $0x4] sm:$0xf] %vm67_vm1, %v66_v8 }
  0x96   :  { %74 = vsyncpa [#allocation3], 1 }

// kernel: decoder_layer_forward.7
= control target key start
LH: loop header
LB: loop body
LE: loop exit
PB: predicated region body
PF: predicated region fallthrough
CT: control target
= control target key end

     0   :  { %vm61_vm0 = vcmask 130048   ;;  %vm95_vm1 = vcmask 261120   ;;  %v518_v19 = vmov 32.0   ;;  %vm296_vm15 = vcmask 523264   ;;  %s717_s2 = inlined_call_operand.vmem [shape: bf16[16,32], index: 2, kind: input, shape index: {}]   ;;  %s718_s0 = inlined_call_operand.vmem [shape: bf16[32,16], index: 0, kind: input, shape index: {}]   ;;  %s719_s1 = inlined_call_operand.vmem [shape: f32[32,32], index: 1, kind: input, shape index: {}]   ;;  %s720_s3 = inlined_call_operand.vmem [shape: f32[1,32], index: 3, kind: input, shape index: {}]   ;;  %s721_s4 = inlined_call_operand.vmem [shape: f32[1,32], index: 4, kind: input, shape index: {}]   ;;  %s722_s6 = inlined_call_operand.vmem [shape: f32[1,64], index: 6, kind: input, shape index: {}]   ;;  %s723_s5 = inlined_call_operand.vmem [shape: bf16[32,64], index: 5, kind: input, shape index: {}]   ;;  %s724_s8 = inlined_call_operand.vmem [shape: f32[1,32], index: 8, kind: input, shape index: {}]   ;;  %s725_s7 = inlined_call_operand.vmem [shape: bf16[64,32], index: 7, kind: input, shape index: {}]   ;;  %s726_s9 = inlined_call_operand.vmem [shape: f32[1,32], index: 9, kind: input, shape index: {}]   ;;  %s727_s10 = inlined_call_operand.vmem [shape: f32[1,32], index: 10, kind: input, shape index: {}]   ;;  %s728_s11 = inlined_call_operand.vmem [shape: f32[32,32], index: 11, kind: output, shape index: {}]  }
   0x1   :  { %v482_v0 = vld [vmem:[%s717_s2] sm:$0xff]  ;;  %v481_v2 = vld [vmem:[%s718_s0 + $0x8] sm:$0xff]  ;;  %v89_v11 = vld [vmem:[%s719_s1 + $0x10] sm:$0xff]  ;;  %500 = vrcp.f32 %v518_v19 }
   0x2   :  { %v480_v1 = vld [vmem:[%s718_s0] sm:$0xff]  ;;  %75 = vmatpush.bf16.msra.mxu0 %v482_v0  ;;  %v88_v7 = vld [vmem:[%s719_s1 + $0x8] sm:$0xff]  ;;  %v90_v15 = vld [vmem:[%s719_s1 + $0x18] sm:$0xff] }
   0x3   :  { %v87_v3 = vld [vmem:[%s719_s1] sm:$0xff]  ;;  %v484_v46 = vld [vmem:[%s723_s5 + $0x8] sm:$0xff] }
   0x4   :  { %241 = vmatpush.bf16.msra.mxu1 %v484_v46  ;;  %v483_v49 = vld [vmem:[%s723_s5] sm:$0xff] }
   0x5   :  { %450 = vmatmul.msk.bf16.vlgmr.msra.gmra.mxu0 %vm61_vm0, %v480_v1  ;;  %v496_v46 = vld [vmem:[%s722_s6] ss:$0 sm:$0xff] }
   0x7   :  { %v501_v20 = vpop.eup %500 }
   0x8   :  { %v109_v21 = vmul.f32 32.0, %v501_v20  ;;  %vm113_vm2 = vweird.f32 %v501_v20  ;;  %242 = vmatpush.bf16.msra.mxu1 %v483_v49 }
   0xa   :  { %v110_v22 = vsub.f32 1.0, %v109_v21 }
   0xc   :  { %v111_v23 = vmul.f32 %v501_v20, %v110_v22 }
   0xe   :  { %v112_v24 = vadd.f32 %v501_v20, %v111_v23 }
  0x10   :  { %v604_v25 = vsel %vm113_vm2, %v501_v20, %v112_v24 }
  0x15   :  { %451 = vmatmul.msk.bf16.gmra.mxu0 %vm61_vm0, %v481_v2 }
  0x82   :  { %v77_v4 = vpop.f32.mrf.mxu0 }
  0x83   :  { %v91_v5 = vadd.f32 %v87_v3, %v77_v4 }
  0x85   :  { %v96_v6 = vsel %vm95_vm1, %v91_v5, 0.0 }
  0x86   :  { %97 = vadd.xlane.f32.xlu0 %v96_v6 }
  0x8a   :  { %v79_v8 = vpop.f32.mrf.mxu0 }
  0x8b   :  { %v92_v9 = vadd.f32 %v88_v7, %v79_v8 }
  0x8d   :  { %v99_v10 = vsel %vm95_vm1, %v92_v9, 0.0 }
  0x8e   :  { %100 = vadd.xlane.f32.xlu0 %v99_v10  ;;  %v494_v10 = vld [vmem:[%s720_s3] ss:$0 sm:$0xff] }
  0x92   :  { %v82_v12 = vpop.f32.mrf.mxu0 }
  0x93   :  { %v93_v13 = vadd.f32 %v89_v11, %v82_v12 }
  0x95   :  { %v102_v14 = vsel %vm95_vm1, %v93_v13, 0.0 }
  0x96   :  { %103 = vadd.xlane.f32.xlu1 %v102_v14 }
  0x9a   :  { %v84_v16 = vpop.f32.mrf.mxu0 }
  0x9b   :  { %v94_v17 = vadd.f32 %v90_v15, %v84_v16 }
  0x9d   :  { %v105_v18 = vsel %vm95_vm1, %v94_v17, 0.0 }
  0x9e   :  { %106 = vadd.xlane.f32.xlu1 %v105_v18 }
  0xf9   :  { %v98_v26 = vpop.xlane.xlu0 %97 }
  0xfa   :  { %v115_v27 = vmul.f32 %v604_v25, %v98_v26 }
  0xfc   :  { %v119_v28 = vsub.f32 %v91_v5, %v115_v27 }
  0xfe   :  { %v123_v29 = vmul.f32 %v119_v28, %v119_v28 }
 0x100   :  { %v127_v30 = vsel %vm95_vm1, %v123_v29, 0.0 }
 0x101   :  { %128 = vadd.xlane.f32.xlu2 %v127_v30  ;;  %v101_v31 = vpop.xlane.xlu0 %100 }
 0x102   :  { %v116_v32 = vmul.f32 %v604_v25, %v101_v31 }
 0x104   :  { %v609_v33 = vsub.f32 %v92_v9, %v116_v32 }
 0x106   :  { %v124_v34 = vmul.f32 %v609_v33, %v609_v33 }
 0x108   :  { %v130_v35 = vsel %vm95_vm1, %v124_v34, 0.0 }
 0x109   :  { %131 = vadd.xlane.f32.xlu2 %v130_v35  ;;  %v104_v36 = vpop.xlane.xlu1 %103 }
 0x10a   :  { %v117_v37 = vmul.f32 %v604_v25, %v104_v36 }
 0x10c   :  { %v615_v38 = vsub.f32 %v93_v13, %v117_v37 }
 0x10e   :  { %v125_v39 = vmul.f32 %v615_v38, %v615_v38 }
 0x110   :  { %v133_v40 = vsel %vm95_vm1, %v125_v39, 0.0 }
 0x111   :  { %134 = vadd.xlane.f32.xlu0 %v133_v40  ;;  %v107_v41 = vpop.xlane.xlu1 %106 }
 0x112   :  { %v118_v42 = vmul.f32 %v604_v25, %v107_v41 }
 0x114   :  { %v621_v43 = vsub.f32 %v94_v17, %v118_v42  ;;  %v495_v17 = vld [vmem:[%s721_s4] ss:$0 sm:$0xff]  ;;  %v488_v42 = vld [vmem:[%s725_s7 + $0x18] sm:$0xff] }
 0x115   :  { %307 = vmatpush.bf16.msra.mxu2 %v488_v42  ;;  %489 = vmatpush.bf16.msra.mxu3 %v488_v42 }
 0x116   :  { %v126_v44 = vmul.f32 %v621_v43, %v621_v43 }
 0x118   :  { %v136_v45 = vsel %vm95_vm1, %v126_v44, 0.0  ;;  %v485_v44 = vld [vmem:[%s725_s7] sm:$0xff] }
 0x119   :  { %137 = vadd.xlane.f32.xlu1 %v136_v45 }
 0x174   :  { %v129_v47 = vpop.xlane.xlu2 %128 }
 0x175   :  { %v139_v48 = vmul.f32 %v129_v47, %v604_v25 }
 0x177   :  { %v143_v50 = vadd.f32 1e-05, %v139_v48 }
 0x179   :  { %502 = vrsqrt.f32 %v143_v50  ;;  %vm153_vm4 = vweird.f32 %v143_v50 }
 0x17c   :  { %v132_v51 = vpop.xlane.xlu2 %131 }
 0x17d   :  { %v140_v52 = vmul.f32 %v132_v51, %v604_v25 }
 0x17f   :  { %v503_v53 = vpop.eup %502  ;;  %v144_v54 = vadd.f32 1e-05, %v140_v52 }
 0x180   :  { %v148_v55 = vmul.f32 %v503_v53, %v143_v50  ;;  %vm154_vm3 = vweird.f32 %v503_v53 }
 0x181   :  { %504 = vrsqrt.f32 %v144_v54  ;;  %vm155_vm5 = vmor %vm153_vm4, %vm154_vm3  ;;  %vm163_vm7 = vweird.f32 %v144_v54 }
 0x182   :  { %v149_v56 = vmul.f32 %v503_v53, %v148_v55 }
 0x184   :  { %v150_v57 = vmul.f32 0.5, %v149_v56  ;;  %v135_v58 = vpop.xlane.xlu0 %134 }
 0x185   :  { %v141_v59 = vmul.f32 %v135_v58, %v604_v25 }
 0x186   :  { %v151_v60 = vsub.f32 1.5, %v150_v57 }
 0x187   :  { %v505_v61 = vpop.eup %504  ;;  %v145_v62 = vadd.f32 1e-05, %v141_v59 }
 0x188   :  { %v152_v63 = vmul.f32 %v503_v53, %v151_v60  ;;  %v158_v0 = vmul.f32 %v505_v61, %v144_v54  ;;  %vm164_vm6 = vweird.f32 %v505_v61  ;;  %v497_v60 = vld [vmem:[%s724_s8] ss:$0 sm:$0xff] }
 0x189   :  { %506 = vrsqrt.f32 %v145_v62  ;;  %vm165_vm8 = vmor %vm163_vm7, %vm164_vm6  ;;  %vm173_vm10 = vweird.f32 %v145_v62 }
 0x18a   :  { %v159_v1 = vmul.f32 %v505_v61, %v158_v0  ;;  %v156_v2 = vsel %vm155_vm5, %v503_v53, %v152_v63 }
 0x18b   :  { %v187_v8 = vmul.f32 %v156_v2, %v119_v28 }
 0x18c   :  { %v160_v3 = vmul.f32 0.5, %v159_v1  ;;  %v138_v4 = vpop.xlane.xlu1 %137 }
 0x18d   :  { %v142_v5 = vmul.f32 %v138_v4, %v604_v25  ;;  %v195_v16 = vmul.f32 %v494_v10, %v187_v8 }
 0x18e   :  { %v161_v6 = vsub.f32 1.5, %v160_v3 }
 0x18f   :  { %v507_v7 = vpop.eup %506  ;;  %v146_v9 = vadd.f32 1e-05, %v142_v5  ;;  %v203_v22 = vadd.f32 %v495_v17, %v195_v16 }
 0x190   :  { %v162_v11 = vmul.f32 %v505_v61, %v161_v6  ;;  %v168_v12 = vmul.f32 %v507_v7, %v145_v62  ;;  %vm174_vm9 = vweird.f32 %v507_v7 }
 0x191   :  { %508 = vrsqrt.f32 %v146_v9  ;;  %vm175_vm11 = vmor %vm173_vm10, %vm174_vm9  ;;  %vm183_vm13 = vweird.f32 %v146_v9 }
 0x192   :  { %v166_v13 = vsel %vm165_vm8, %v505_v61, %v162_v11  ;;  %v169_v14 = vmul.f32 %v507_v7, %v168_v12 }
 0x193   :  { %v188_v15 = vmul.f32 %v166_v13, %v609_v33 }
 0x194   :  { %v170_v18 = vmul.f32 0.5, %v169_v14 }
 0x195   :  { %v196_v19 = vmul.f32 %v494_v10, %v188_v15 }
 0x196   :  { %v171_v20 = vsub.f32 1.5, %v170_v18 }
 0x197   :  { %v509_v21 = vpop.eup %508  ;;  %v643_v23 = vadd.f32 %v495_v17, %v196_v19 }
 0x198   :  { %v172_v24 = vmul.f32 %v507_v7, %v171_v20  ;;  %v178_v26 = vmul.f32 %v509_v21, %v146_v9  ;;  %vm184_vm12 = vweird.f32 %v509_v21 }
 0x199   :  { %v207_v27 = vpack.c.bf16 %v643_v23, %v203_v22  ;;  %vm185_vm14 = vmor %vm183_vm13, %vm184_vm12 }
 0x19a   :  { %v179_v28 = vmul.f32 %v509_v21, %v178_v26  ;;  %v176_v29 = vsel %vm175_vm11, %v507_v7, %v172_v24 }
 0x19b   :  { %460 = vmatmul.msk.bf16.vlgmr.msra.gmra.mxu1 %vm95_vm1, %v207_v27  ;;  %v189_v32 = vmul.f32 %v176_v29, %v615_v38  ;;  %v487_v38 = vld [vmem:[%s725_s7 + $0x10] sm:$0xff] }
 0x19c   :  { %v180_v30 = vmul.f32 0.5, %v179_v28  ;;  %308 = vmatpush.bf16.msra.mxu2 %v487_v38  ;;  %490 = vmatpush.bf16.msra.mxu3 %v487_v38 }
 0x19d   :  { %v197_v36 = vmul.f32 %v494_v10, %v189_v32 }
 0x19e   :  { %v181_v31 = vsub.f32 1.5, %v180_v30 }
 0x19f   :  { %v205_v39 = vadd.f32 %v495_v17, %v197_v36 }
 0x1a0   :  { %v182_v33 = vmul.f32 %v509_v21, %v181_v31 }
 0x1a2   :  { %v186_v34 = vsel %vm185_vm14, %v509_v21, %v182_v33 }
 0x1a3   :  { %v190_v35 = vmul.f32 %v186_v34, %v621_v43  ;;  %v486_v43 = vld [vmem:[%s725_s7 + $0x8] sm:$0xff] }
 0x1a4   :  { %309 = vmatpush.bf16.msra.mxu2 %v486_v43  ;;  %491 = vmatpush.bf16.msra.mxu3 %v486_v43 }
 0x1a5   :  { %v198_v37 = vmul.f32 %v494_v10, %v190_v35 }
 0x1a7   :  { %v206_v40 = vadd.f32 %v495_v17, %v198_v37 }
 0x1a8   :  { %310 = vmatpush.bf16.msra.mxu2 %v485_v44  ;;  %492 = vmatpush.bf16.msra.mxu3 %v485_v44 }
 0x1a9   :  { %v208_v41 = vpack.c.bf16 %v206_v40, %v205_v39 }
 0x1ab   :  { %461 = vmatmul.msk.bf16.gmra.mxu1 %vm95_vm1, %v208_v41 }
 0x218   :  { %v244_v45 = vpop.f32.mrf.mxu1 }
 0x219   :  { %v245_v47 = vadd.f32 %v496_v46, %v244_v45 }
 0x21b   :  { %v254_v50 = vmax.f32 %v245_v47, 0.0 }
 0x220   :  { %v246_v48 = vpop.f32.mrf.mxu1 }
 0x221   :  { %v247_v49 = vadd.f32 %v496_v46, %v246_v48 }
 0x223   :  { %v255_v51 = vmax.f32 %v247_v49, 0.0 }
 0x225   :  { %v258_v52 = vpack.c.bf16 %v255_v51, %v254_v50  ;;  %v498_v51 = vld [vmem:[%s726_s9] ss:$0 sm:$0xff] }
 0x227   :  { %478 = vmatmul.msk.bf16.vlgmr.msra.gmra.mxu2 %vm296_vm15, %v258_v52 }
 0x228   :  { %v249_v53 = vpop.f32.mrf.mxu1 }
 0x229   :  { %v250_v54 = vadd.f32 %v496_v46, %v249_v53 }
 0x22b   :  { %v256_v57 = vmax.f32 %v250_v54, 0.0  ;;  %v499_v54 = vld [vmem:[%s727_s10] ss:$0 sm:$0xff] }
 0x230   :  { %v251_v55 = vpop.f32.mrf.mxu1 }
 0x231   :  { %v252_v56 = vadd.f32 %v496_v46, %v251_v55 }
 0x233   :  { %v257_v58 = vmax.f32 %v252_v56, 0.0 }
 0x235   :  { %v259_v59 = vpack.c.bf16 %v257_v58, %v256_v57 }
 0x237   :  { %479 = vmatmul.msk.bf16.vlgmr.msra.gmra.mxu3 %vm296_vm15, %v259_v59 }
 0x2aa   :  { %v312_v61 = vpop.f32.mrf.mxu2 }
 0x2ab   :  { %v313_v62 = vadd.f32 %v497_v60, %v312_v61 }
 0x2ad   :  { %v322_v63 = vadd.f32 %v313_v62, %v203_v22 }
 0x2af   :  { %v326_v0 = vsel %vm95_vm1, %v322_v63, 0.0 }
 0x2b0   :  { %327 = vadd.xlane.f32.xlu2 %v326_v0 }
 0x2b2   :  { %v314_v1 = vpop.f32.mrf.mxu2 }
 0x2b3   :  { %v315_v2 = vadd.f32 %v497_v60, %v314_v1 }
 0x2b5   :  { %v323_v3 = vadd.f32 %v315_v2, %v643_v23 }
 0x2b7   :  { %v329_v4 = vsel %vm95_vm1, %v323_v3, 0.0 }
 0x2b8   :  { %330 = vadd.xlane.f32.xlu0 %v329_v4 }
 0x2ba   :  { %v317_v5 = vpop.f32.mrf.mxu3 }
 0x2bb   :  { %v318_v6 = vadd.f32 %v497_v60, %v317_v5 }
 0x2bd   :  { %v324_v7 = vadd.f32 %v318_v6, %v205_v39 }
 0x2bf   :  { %v332_v8 = vsel %vm95_vm1, %v324_v7, 0.0 }
 0x2c0   :  { %333 = vadd.xlane.f32.xlu1 %v332_v8 }
 0x2c2   :  { %v319_v9 = vpop.f32.mrf.mxu3 }
 0x2c3   :  { %v320_v10 = vadd.f32 %v497_v60, %v319_v9 }
 0x2c5   :  { %v325_v11 = vadd.f32 %v320_v10, %v206_v40 }
 0x2c7   :  { %v335_v12 = vsel %vm95_vm1, %v325_v11, 0.0 }
 0x2c8   :  { %336 = vadd.xlane.f32.xlu2 %v335_v12 }
 0x323   :  { %v328_v13 = vpop.xlane.xlu2 %327 }
 0x324   :  { %v338_v14 = vmul.f32 %v328_v13, %v604_v25 }
 0x326   :  { %v342_v15 = vsub.f32 %v322_v63, %v338_v14 }
 0x328   :  { %v346_v16 = vmul.f32 %v342_v15, %v342_v15 }
 0x32a   :  { %v350_v17 = vsel %vm95_vm1, %v346_v16, 0.0 }
 0x32b   :  { %351 = vadd.xlane.f32.xlu0 %v350_v17  ;;  %v331_v18 = vpop.xlane.xlu0 %330 }
 0x32c   :  { %v339_v19 = vmul.f32 %v331_v18, %v604_v25 }
 0x32e   :  { %v343_v20 = vsub.f32 %v323_v3, %v339_v19 }
 0x330   :  { %v347_v21 = vmul.f32 %v343_v20, %v343_v20 }
 0x332   :  { %v353_v22 = vsel %vm95_vm1, %v347_v21, 0.0 }
 0x333   :  { %354 = vadd.xlane.f32.xlu1 %v353_v22  ;;  %v334_v23 = vpop.xlane.xlu1 %333 }
 0x334   :  { %v340_v24 = vmul.f32 %v334_v23, %v604_v25 }
 0x336   :  { %v678_v26 = vsub.f32 %v324_v7, %v340_v24 }
 0x338   :  { %v348_v27 = vmul.f32 %v678_v26, %v678_v26 }
 0x33a   :  { %v356_v28 = vsel %vm95_vm1, %v348_v27, 0.0 }
 0x33b   :  { %v337_v29 = vpop.xlane.xlu2 %336  ;;  %357 = vadd.xlane.f32.xlu2 %v356_v28 }
 0x33c   :  { %v341_v30 = vmul.f32 %v337_v29, %v604_v25 }
 0x33e   :  { %v684_v31 = vsub.f32 %v325_v11, %v341_v30 }
 0x340   :  { %v349_v32 = vmul.f32 %v684_v31, %v684_v31 }
 0x342   :  { %v359_v33 = vsel %vm95_vm1, %v349_v32, 0.0 }
 0x343   :  { %360 = vadd.xlane.f32.xlu0 %v359_v33 }
 0x39e   :  { %v352_v34 = vpop.xlane.xlu0 %351 }
 0x39f   :  { %v362_v35 = vmul.f32 %v352_v34, %v604_v25 }
 0x3a1   :  { %v366_v36 = vadd.f32 1e-05, %v362_v35 }
 0x3a3   :  { %510 = vrsqrt.f32 %v366_v36  ;;  %vm376_vm2 = vweird.f32 %v366_v36 }
 0x3a6   :  { %v355_v37 = vpop.xlane.xlu1 %354 }
 0x3a7   :  { %v363_v39 = vmul.f32 %v355_v37, %v604_v25 }
 0x3a9   :  { %v511_v40 = vpop.eup %510  ;;  %v367_v41 = vadd.f32 1e-05, %v363_v39 }
 0x3aa   :  { %v371_v42 = vmul.f32 %v511_v40, %v366_v36  ;;  %vm377_vm0 = vweird.f32 %v511_v40 }
 0x3ab   :  { %512 = vrsqrt.f32 %v367_v41  ;;  %vm378_vm3 = vmor %vm376_vm2, %vm377_vm0  ;;  %vm386_vm5 = vweird.f32 %v367_v41 }
 0x3ac   :  { %v372_v38 = vmul.f32 %v511_v40, %v371_v42 }
 0x3ae   :  { %v373_v43 = vmul.f32 0.5, %v372_v38  ;;  %v358_v44 = vpop.xlane.xlu2 %357 }
 0x3af   :  { %v364_v45 = vmul.f32 %v358_v44, %v604_v25 }
 0x3b0   :  { %v374_v46 = vsub.f32 1.5, %v373_v43 }
 0x3b1   :  { %v513_v47 = vpop.eup %512  ;;  %v368_v48 = vadd.f32 1e-05, %v364_v45 }
 0x3b2   :  { %v375_v49 = vmul.f32 %v511_v40, %v374_v46  ;;  %v381_v50 = vmul.f32 %v513_v47, %v367_v41  ;;  %vm387_vm4 = vweird.f32 %v513_v47 }
 0x3b3   :  { %514 = vrsqrt.f32 %v368_v48  ;;  %vm388_vm6 = vmor %vm386_vm5, %vm387_vm4  ;;  %vm396_vm8 = vweird.f32 %v368_v48 }
 0x3b4   :  { %v379_v52 = vsel %vm378_vm3, %v511_v40, %v375_v49  ;;  %v382_v53 = vmul.f32 %v513_v47, %v381_v50 }
 0x3b5   :  { %v410_v55 = vmul.f32 %v379_v52, %v342_v15 }
 0x3b6   :  { %v383_v56 = vmul.f32 0.5, %v382_v53  ;;  %v361_v57 = vpop.xlane.xlu0 %360 }
 0x3b7   :  { %v418_v58 = vmul.f32 %v498_v51, %v410_v55  ;;  %v365_v59 = vmul.f32 %v361_v57, %v604_v25 }
 0x3b8   :  { %v384_v60 = vsub.f32 1.5, %v383_v56 }
 0x3b9   :  { %v515_v61 = vpop.eup %514  ;;  %v426_v62 = vadd.f32 %v499_v54, %v418_v58  ;;  %v369_v63 = vadd.f32 1e-05, %v365_v59 }
 0x3ba   :  { %v385_v0 = vmul.f32 %v513_v47, %v384_v60  ;;  %v391_v1 = vmul.f32 %v515_v61, %v368_v48  ;;  %vm397_vm7 = vweird.f32 %v515_v61 }
 0x3bb   :  { %430 = vst.msk [vmem:[%s728_s11] sm:$0xff] %vm95_vm1, %v426_v62  ;;  %516 = vrsqrt.f32 %v369_v63  ;;  %vm398_vm9 = vmor %vm396_vm8, %vm397_vm7  ;;  %vm406_vm11 = vweird.f32 %v369_v63 }
 0x3bc   :  { %v389_v2 = vsel %vm388_vm6, %v513_v47, %v385_v0  ;;  %v392_v3 = vmul.f32 %v515_v61, %v391_v1 }
 0x3bd   :  { %v411_v4 = vmul.f32 %v389_v2, %v343_v20 }
 0x3be   :  { %v393_v5 = vmul.f32 0.5, %v392_v3 }
 0x3bf   :  { %v419_v25 = vmul.f32 %v498_v51, %v411_v4 }
 0x3c0   :  { %v394_v6 = vsub.f32 1.5, %v393_v5 }
 0x3c1   :  { %v517_v7 = vpop.eup %516  ;;  %v427_v8 = vadd.f32 %v499_v54, %v419_v25 }
 0x3c2   :  { %v395_v9 = vmul.f32 %v515_v61, %v394_v6  ;;  %v401_v10 = vmul.f32 %v517_v7, %v369_v63  ;;  %vm407_vm10 = vweird.f32 %v517_v7 }
 0x3c3   :  { %431 = vst.msk [vmem:[%s728_s11 + $0x8] sm:$0xff] %vm95_vm1, %v427_v8  ;;  %vm408_vm12 = vmor %vm406_vm11, %vm407_vm10 }
 0x3c4   :  { %v399_v11 = vsel %vm398_vm9, %v515_v61, %v395_v9  ;;  %v402_v12 = vmul.f32 %v517_v7, %v401_v10 }
 0x3c5   :  { %v412_v13 = vmul.f32 %v399_v11, %v678_v26 }
 0x3c6   :  { %v403_v14 = vmul.f32 0.5, %v402_v12 }
 0x3c7   :  { %v420_v15 = vmul.f32 %v498_v51, %v412_v13 }
 0x3c8   :  { %v404_v16 = vsub.f32 1.5, %v403_v14 }
 0x3c9   :  { %v428_v17 = vadd.f32 %v499_v54, %v420_v15 }
 0x3ca   :  { %v405_v18 = vmul.f32 %v517_v7, %v404_v16 }
 0x3cb   :  { %432 = vst.msk [vmem:[%s728_s11 + $0x10] sm:$0xff] %vm95_vm1, %v428_v17 }
 0x3cc   :  { %v409_v19 = vsel %vm408_vm12, %v517_v7, %v405_v18 }
 0x3cd   :  { %v413_v20 = vmul.f32 %v409_v19, %v684_v31 }
 0x3cf   :  { %v421_v21 = vmul.f32 %v498_v51, %v413_v20 }
 0x3d1   :  { %v429_v22 = vadd.f32 %v499_v54, %v421_v21 }
 0x3d3   :  { %433 = vst.msk [vmem:[%s728_s11 + $0x18] sm:$0xff] %vm95_vm1, %v429_v22 }

// kernel: decoder_layer_forward.6
= control target key start
LH: loop header
LB: loop body
LE: loop exit
PB: predicated region body
PF: predicated region fallthrough
CT: control target
= control target key end

     0   :  { %s1010_s18 = smov 0   ;;  %s1012_s19 = smov 0   ;;  %s1265_s0 = inlined_call_operand.vmem [shape: bf16[2,16,48], index: 0, kind: input, shape index: {}, may-alias: {0,1}]   ;;  %s1266_s1 = inlined_call_operand.vmem [shape: bf16[2,16,48], index: 1, kind: input, shape index: {}, may-alias: {0,1}]   ;;  %s1267_s2 = inlined_call_operand.vmem [shape: bf16[16,16], index: 2, kind: input, shape index: {}]   ;;  %s1268_s3 = inlined_call_operand.vmem [shape: f32[1,16], index: 3, kind: input, shape index: {}]   ;;  %s1269_s4 = inlined_call_operand.vmem [shape: f32[1,16], index: 4, kind: input, shape index: {}]   ;;  %s1270_s5 = inlined_call_operand.vmem [shape: bf16[2,16,16], index: 5, kind: output, shape index: {}]  }
   0x1   :  { %s1014_s20 = smov 0  }
   0x2 LB: > { %s27_s21 = sadd.s32 1, %s962_s19  ;;  %p844_p0 = scmp.ge.s32.totalorder %s966_s20, 1  ;;  %s966_s20 = sphi %s1014_s20, %s15_s20   ;;  %s962_s19 = sphi %s1012_s19, %s1276_s19   ;;  %s958_s18 = sphi %s1010_s18, %s1275_s18  }
   0x3   : > { %p29_p1 = scmp.ge.s32.totalorder %s27_s21, 2  ;;  %p218_p2 = scmp.lt.s32.totalorder %s966_s20, 3 }
   0x5   : > { %s1278_s21 = smov (%p29_p1, %s27_s21), 0  ;;  %p219_p3 = pnand %p844_p0, %p218_p2 }
   0x6   : > { %p260_p4 = scmp.lt.s32.totalorder (!%p219_p3), %s958_s18, 1  ;;  %s968_s8 = smov (!%p219_p3), 112  }
   0x7   : > { %222 = sbr.rel (%p219_p3) target bundleno = 1776 (0x6f0), region = 40  ;;  %s969_s9 = smov (!%p219_p3), 127  }
   0x8   : > { %s970_s10 = smov (!%p219_p3), 15   ;;  %s971_s11 = smov (!%p219_p3), 126  }
   0x9   : > { %s972_s12 = smov (!%p219_p3), 14   ;;  %s973_s15 = smov (!%p219_p3), 120  }
   0xa   : > { %s974_s16 = smov (!%p219_p3), 124   ;;  %s975_s17 = smov (!%p219_p3), 12  }
   0xb   : > { %s976_s23 = smov (!%p219_p3), 8   ;;  %s977_s25 = smov (!%p219_p3), 96  }
   0xc   : > { %v879_v0 = vld [vmem:[%s1267_s2] sm:$0xff]  ;;  %vm325_vm0 = vcmask 64512   ;;  %s1280_s18 = smov (!%p260_p4, %s958_s18), 1  ;;  %v286_v14 = vlaneseq  ;;  %vm360_vm1 = vcmask 121856   ;;  %vm387_vm4 = vcmask 113664   ;;  %s978_s26 = smov 104  }
   0xd   : > { %v330_v1 = vsel %vm325_vm0, %v879_v0, 0  ;;  %s1032_s24 = sshll.u32 %s1280_s18, 3  ;;  %v926_v2 = vld [vmem:[%s1269_s4] ss:$0 sm:$0xff]  ;;  %vm416_vm7 = vcmask 97280   ;;  %vm488_vm12 = vcmask 130048  }
   0xe   : > { %339 = vmatpush.bf16.xpose.msra.mxu0 %v330_v1  ;;  %s267_s27 = scalar_lea.vmem %s1265_s0, %s1032_s24  ;;  %s1045_s7 = scalar_lea.vmem %s1266_s1, %s1032_s24  ;;  %v1066_v15 = vshrl.u32 %v286_v14, 7  ;;  %v881_v31 = vld [vmem:[%s1267_s2] sm:$0xff]  ;;  %v1155_v1 = vand.u32 127, %v286_v14  ;;  %vm534_vm15 = vcmask 60416  }
   0xf   : > { %v1047_v3 = vld [vmem:[%s267_s27] sm:$0xff]   ;;  %s1216_s29 = scalar_lea.vmem %s1270_s5, %s1032_s24  ;;  %s979_s24 = smov 88  }
  0x10   : > { %v1050_v4 = vld [vmem:[%s1045_s7] sm:$0xff]  ;;  %v884_v5 = vunpack.c.l.bf16 %v1047_v3  ;;  %v885_v6 = vunpack.c.h.bf16 %v1047_v3  ;;  %v1069_v16 = vadd.s32 8, %v1066_v15  ;;  %v1080_v20 = vsub.s32 15, %v1066_v15 }
  0x11   : > { %464 = vrot.lane.b32.xlu0 %v1050_v4, %s968_s8  ;;  %v927_v44 = vld [vmem:[%s1268_s3] ss:$0 sm:$0xff]  ;;  %vm294_vm11 = vcmp.gt.s32.totalorder %v1155_v1, %v1066_v15 }
  0x12   : > { %v317_v7 = vadd.f32 %v926_v2, %v884_v5  ;;  %v318_v8 = vadd.f32 %v926_v2, %v885_v6  ;;  %v1072_v17 = vsub.s32 15, %v1069_v16  ;;  %v363_v25 = vand.u32 1, %v1080_v20 }
  0x13   : > { %v390_v35 = vshra.s32 %v1080_v20, 1  ;;  %v311_v45 = vadd.f32 %v927_v44, %v884_v5  ;;  %v312_v46 = vadd.f32 %v927_v44, %v885_v6  ;;  %v419_v52 = vshra.s32 %v1080_v20, 2 }
  0x14   : > { %v319_v9 = vpack.c.bf16 %v318_v8, %v317_v7  ;;  %v364_v18 = vand.u32 1, %v1072_v17  ;;  %vm1087_vm3 = vcmp.eq.s32.totalorder %v363_v25, 1  ;;  %v391_v33 = vshra.s32 %v1072_v17, 1 }
  0x15   : > { %v1110_v40 = vand.u32 1, %v390_v35  ;;  %v1127_v47 = vpack.c.bf16 %v312_v46, %v311_v45  ;;  %v1134_v53 = vand.u32 1, %v419_v52  ;;  %v420_v54 = vshra.s32 %v1072_v17, 2 }
  0x16   : > { %855 = vmatmul.msk.bf16.vlgmr.msra.gmra.mxu0 %vm325_vm0, %v319_v9  ;;  %vm1075_vm2 = vcmp.eq.s32.totalorder %v364_v18, 1  ;;  %v1102_v34 = vand.u32 1, %v391_v33  ;;  %v447_v63 = vshra.s32 %v1080_v20, 3  ;;  %v448_v3 = vshra.s32 %v1072_v17, 3 }
  0x17   : > { %vm394_vm6 = vcmp.eq.s32.totalorder %v1110_v40, 1  ;;  %vm423_vm8 = vcmp.eq.s32.totalorder %v1134_v53, 1  ;;  %v1143_v59 = vand.u32 1, %v420_v54  ;;  %vm295_vm14 = vcmp.gt.s32.totalorder %v1155_v1, %v1069_v16 }
  0x18   : > { %vm395_vm5 = vcmp.eq.s32.totalorder %v1102_v34, 1  ;;  %v1152_v0 = vand.u32 1, %v447_v63 }
  0x19   : > { %vm424_vm9 = vcmp.eq.s32.totalorder %v1143_v59, 1 }
  0x1a   : > { %vm451_vm10 = vcmp.eq.s32.totalorder %v1152_v0, 1 }
  0x83   : > { %v465_v12 = vpop.permute.xlu0 %464 }
  0x84   : > { %v470_v13 = vsel %vm325_vm0, %v465_v12, 0 }
  0x85   : > { %479 = vmatpush.bf16.xpose.msra.mxu1 %v470_v13 }
  0x8c   : > { %860 = vmatmul.msk.bf16.vlgmr.msra.gmra.mxu1 %vm325_vm0, %v1127_v47 }
  0x93   : > { %v341_v10 = vpop.f32.mrf.mxu0 }
  0x94   : > { %348 = vrot.lane.b32.xlu0 %v341_v10, %s969_s9 }
  0x9b   : > { %v343_v11 = vpop.f32.mrf.mxu0 }
  0x9c   : > { %356 = vrot.lane.b32.xlu2 %v343_v11, %s970_s10  ;;  %350 = vrot.lane.b32.xlu1 %v343_v11, %s969_s9 }
  0xa4   : > { %354 = vrot.lane.b32.xlu1 %v341_v10, %s970_s10 }
  0xf6   : > { %v357_v21 = vpop.permute.xlu2 %356 }
 0x106   : > { %v349_v27 = vpop.permute.xlu0 %348 }
 0x109   : > { %v481_v2 = vpop.f32.mrf.mxu1 }
 0x10e   : > { %v351_v22 = vpop.permute.xlu1 %350 }
 0x10f   : > { %v362_v23 = vsel %vm360_vm1, %v351_v22, %v357_v21 }
 0x110   : > { %v372_v24 = vsel %vm1075_vm2, %v362_v23, %v343_v11 }
 0x111   : > { %377 = vrot.lane.b32.xlu0 %v372_v24, %s971_s11  ;;  %v483_v18 = vpop.f32.mrf.mxu1 }
 0x116   : > { %v355_v28 = vpop.permute.xlu1 %354 }
 0x117   : > { %v361_v29 = vsel %vm360_vm1, %v349_v27, %v355_v28 }
 0x118   : > { %v371_v30 = vsel %vm1087_vm3, %v361_v29, %v341_v10  ;;  %v1164_v10 = vand.u32 1, %v448_v3 }
 0x119   : > { %381 = vrot.lane.b32.xlu1 %v371_v30, %s972_s12  ;;  %375 = vrot.lane.b32.xlu2 %v371_v30, %s971_s11 }
 0x11a   : > { %559 = vrot.lane.b32.xlu0 %v881_v31, %s973_s15  ;;  %vm452_vm13 = vcmp.eq.s32.totalorder %v1164_v10, 1 }
 0x121   : > { %383 = vrot.lane.b32.xlu2 %v372_v24, %s972_s12 }
 0x173   : > { %v376_v32 = vpop.permute.xlu2 %375 }
 0x17b   : > { %v384_v36 = vpop.permute.xlu2 %383 }
 0x183   : > { %v378_v37 = vpop.permute.xlu0 %377 }
 0x184   : > { %v389_v38 = vsel %vm387_vm4, %v378_v37, %v384_v36 }
 0x185   : > { %v401_v39 = vsel %vm395_vm5, %v389_v38, %v372_v24  ;;  %v1189_v38 = vld [vmem:[%s1045_s7] sm:$0xff] }
 0x186   : > { %406 = vrot.lane.b32.xlu2 %v401_v39, %s974_s16 }
 0x18b   : > { %v382_v41 = vpop.permute.xlu1 %381 }
 0x18c   : > { %v388_v42 = vsel %vm387_vm4, %v376_v32, %v382_v41  ;;  %v560_v48 = vpop.permute.xlu0 %559 }
 0x18d   : > { %v400_v43 = vsel %vm394_vm6, %v388_v42, %v371_v30  ;;  %v565_v49 = vsel %vm325_vm0, %v560_v48, 0 }
 0x18e   : > { %410 = vrot.lane.b32.xlu0 %v400_v43, %s975_s17  ;;  %404 = vrot.lane.b32.xlu1 %v400_v43, %s974_s16 }
 0x18f   : > { %552 = vrot.lane.b32.xlu2 %v319_v9, %s973_s15  ;;  %574 = vmatpush.bf16.xpose.msra.mxu3 %v565_v49 }
 0x196   : > { %412 = vrot.lane.b32.xlu1 %v401_v39, %s975_s17 }
 0x1e0   : > { %v407_v50 = vpop.permute.xlu2 %406 }
 0x1e9   : > { %v553_v51 = vpop.permute.xlu2 %552 }
 0x1ea   : > { %866 = vmatmul.msk.bf16.vlgmr.msra.gmra.mxu3 %vm325_vm0, %v553_v51 }
 0x200   : > { %v411_v55 = vpop.permute.xlu0 %410  ;;  %v405_v56 = vpop.permute.xlu1 %404 }
 0x201   : > { %v417_v57 = vsel %vm416_vm7, %v405_v56, %v411_v55 }
 0x202   : > { %v429_v58 = vsel %vm423_vm8, %v417_v57, %v400_v43 }
 0x203   : > { %433 = vrot.lane.b32.xlu0 %v429_v58, %s973_s15  ;;  %439 = vrot.lane.b32.xlu2 %v429_v58, %s976_s23 }
 0x208   : > { %v413_v60 = vpop.permute.xlu1 %412 }
 0x209   : > { %v418_v61 = vsel %vm416_vm7, %v407_v50, %v413_v60 }
 0x20a   : > { %v430_v62 = vsel %vm424_vm9, %v418_v61, %v401_v39 }
 0x20b   : > { %441 = vrot.lane.b32.xlu0 %v430_v62, %s976_s23  ;;  %435 = vrot.lane.b32.xlu1 %v430_v62, %s973_s15 }
 0x25d   : > { %v440_v5 = vpop.permute.xlu2 %439 }
 0x26d   : > { %v576_v24 = vpop.f32.mrf.mxu3 }
 0x275   : > { %v434_v6 = vpop.permute.xlu0 %433  ;;  %v578_v25 = vpop.f32.mrf.mxu3 }
 0x276   : > { %v445_v7 = vsel %vm325_vm0, %v434_v6, %v440_v5 }
 0x277   : > { %v457_v8 = vsel %vm451_vm10, %v445_v7, %v429_v58 }
 0x278   : > { %v482_v9 = vadd.f32 %v481_v2, %v457_v8 }
 0x27a   : > { %v486_v11 = vsel %vm294_vm11, -1e+30, %v482_v9 }
 0x27b   : > { %v489_v12 = vsel %vm488_vm12, %v486_v11, -inf }
 0x27c   : > { %490 = vmax.xlane.f32.xlu1 %v489_v12 }
 0x27d   : > { %v442_v13 = vpop.permute.xlu0 %441  ;;  %v436_v14 = vpop.permute.xlu1 %435 }
 0x27e   : > { %v446_v17 = vsel %vm325_vm0, %v436_v14, %v442_v13 }
 0x27f   : > { %v458_v20 = vsel %vm452_vm13, %v446_v17, %v430_v62 }
 0x280   : > { %v484_v21 = vadd.f32 %v483_v18, %v458_v20 }
 0x282   : > { %v487_v22 = vsel %vm295_vm14, -1e+30, %v484_v21 }
 0x283   : > { %v492_v23 = vsel %vm488_vm12, %v487_v22, -inf }
 0x284   : > { %493 = vmax.xlane.f32.xlu2 %v492_v23 }
 0x295   : > { %512 = vrot.lane.b32.xlu1 %v1050_v4, %s977_s25 }
 0x29d   : > { %583 = vrot.lane.b32.xlu1 %v576_v24, %s969_s9 }
 0x2a5   : > { %591 = vrot.lane.b32.xlu1 %v578_v25, %s970_s10 }
 0x2ef   : > { %v491_v27 = vpop.xlane.xlu1 %490 }
 0x2f0   : > { %v495_v28 = vsub.f32 %v486_v11, %v491_v27 }
 0x2f2   : > { %v497_v29 = vmul.f32 1.442695, %v495_v28 }
 0x2f4   : > { %928 = vpow2.f32 %v497_v29 }
 0x2f7   : > { %v494_v30 = vpop.xlane.xlu2 %493 }
 0x2f8   : > { %v496_v31 = vsub.f32 %v487_v22, %v494_v30 }
 0x2fa   : > { %v929_v32 = vpop.eup %928  ;;  %v499_v33 = vmul.f32 1.442695, %v496_v31 }
 0x2fb   : > { %v501_v35 = vsel %vm488_vm12, %v929_v32, 0.0 }
 0x2fc   : > { %930 = vpow2.f32 %v499_v33  ;;  %502 = vadd.xlane.f32.xlu0 %v501_v35 }
 0x302   : > { %v931_v4 = vpop.eup %930 }
 0x303   : > { %v504_v36 = vsel %vm488_vm12, %v931_v4, 0.0 }
 0x304   : > { %505 = vadd.xlane.f32.xlu2 %v504_v36 }
 0x307   : > { %v513_v37 = vpop.permute.xlu1 %512 }
 0x308   : > { %525 = vmatpush.bf16.msra.mxu2 %v513_v37 }
 0x30f   : > { %v584_v48 = vpop.permute.xlu1 %583 }
 0x310   : > { %654 = vrot.lane.b32.xlu0 %v1127_v47, %s973_s15 }
 0x317   : > { %v592_v55 = vpop.permute.xlu1 %591 }
 0x318   : > { %585 = vrot.lane.b32.xlu0 %v578_v25, %s969_s9 }
 0x31c   : > { %661 = vrot.lane.b32.xlu2 %v1189_v38, %s978_s26 }
 0x324   : > { %589 = vrot.lane.b32.xlu2 %v576_v24, %s970_s10 }
 0x36f   : > { %v503_v39 = vpop.xlane.xlu0 %502 }
 0x370   : > { %932 = vrcp.f32 %v503_v39 }
 0x376   : > { %v933_v42 = vpop.eup %932 }
 0x377   : > { %v506_v41 = vpop.xlane.xlu2 %505  ;;  %v509_v45 = vmul.f32 %v933_v42, %v929_v32 }
 0x378   : > { %934 = vrcp.f32 %v506_v41 }
 0x37e   : > { %v935_v43 = vpop.eup %934 }
 0x37f   : > { %v662_v44 = vpop.permute.xlu2 %661  ;;  %v510_v46 = vmul.f32 %v935_v43, %v931_v4 }
 0x380   : > { %v667_v47 = vsel %vm325_vm0, %v662_v44, 0 }
 0x381   : > { %676 = vmatpush.bf16.xpose.msrb.mxu2 %v667_v47  ;;  %v511_v49 = vpack.c.bf16 %v510_v46, %v509_v45 }
 0x382   : > { %v655_v50 = vpop.permute.xlu0 %654 }
 0x383   : > { %861 = vmatmul.msk.bf16.vlgmr.msra.gmra.mxu2 %vm488_vm12, %v511_v49 }
 0x387   : > { %v590_v51 = vpop.permute.xlu2 %589 }
 0x388   : > { %v595_v52 = vsel %vm360_vm1, %v584_v48, %v590_v51 }
 0x389   : > { %v597_v54 = vsel %vm1087_vm3, %v595_v52, %v576_v24 }
 0x38a   : > { %v586_v56 = vpop.permute.xlu0 %585  ;;  %607 = vrot.lane.b32.xlu1 %v597_v54, %s972_s12  ;;  %601 = vrot.lane.b32.xlu0 %v597_v54, %s971_s11 }
 0x38b   : > { %v596_v57 = vsel %vm360_vm1, %v586_v56, %v592_v55 }
 0x38c   : > { %v598_v58 = vsel %vm1075_vm2, %v596_v57, %v578_v25 }
 0x38d   : > { %603 = vrot.lane.b32.xlu2 %v598_v58, %s971_s11 }
 0x392   : > { %609 = vrot.lane.b32.xlu0 %v598_v58, %s972_s12 }
 0x393   : > { %871 = vmatmul.msk.bf16.vlgmr.msrb.gmra.mxu2 %vm325_vm0, %v655_v50 }
 0x3e7   : > { %v604_v63 = vpop.permute.xlu2 %603 }
 0x3fc   : > { %v602_v26 = vpop.permute.xlu0 %601  ;;  %v608_v60 = vpop.permute.xlu1 %607 }
 0x3fd   : > { %v613_v61 = vsel %vm387_vm4, %v602_v26, %v608_v60 }
 0x3fe   : > { %v615_v62 = vsel %vm394_vm6, %v613_v61, %v597_v54 }
 0x3ff   : > { %625 = vrot.lane.b32.xlu0 %v615_v62, %s975_s17  ;;  %619 = vrot.lane.b32.xlu2 %v615_v62, %s974_s16 }
 0x404   : > { %v610_v19 = vpop.permute.xlu0 %609 }
 0x405   : > { %v614_v2 = vsel %vm387_vm4, %v604_v63, %v610_v19 }
 0x406   : > { %v527_v3 = vpop.f32.mrf.mxu2  ;;  %v616_v40 = vsel %vm395_vm5, %v614_v2, %v598_v58 }
 0x407   : > { %v532_v5 = vpack.c.bf16 %v527_v3, %v527_v3  ;;  %621 = vrot.lane.b32.xlu1 %v616_v40, %s974_s16  ;;  %627 = vrot.lane.b32.xlu2 %v616_v40, %s975_s17 }
 0x409   : > { %535 = vst.msk [vmem:[%s1216_s29] sm:$0xf] %vm534_vm15, %v532_v5 }
 0x40e   : > { %v529_v6 = vpop.f32.mrf.mxu2 }
 0x40f   : > { %v533_v7 = vpack.c.bf16 %v529_v6, %v529_v6 }
 0x411   : > { %536 = vst.msk [vmem:[%s1216_s29 + $0x4] sm:$0xf] %vm534_vm15, %v533_v7 }
 0x416   : > { %v678_v18 = vpop.f32.mrf.mxu2 }
 0x41e   : > { %v680_v29 = vpop.f32.mrf.mxu2 }
 0x459   : > { %v620_v8 = vpop.permute.xlu2 %619 }
 0x461   : > { %v628_v34 = vpop.permute.xlu2 %627 }
 0x471   : > { %v626_v9 = vpop.permute.xlu0 %625 }
 0x472   : > { %v631_v11 = vsel %vm416_vm7, %v620_v8, %v626_v9 }
 0x473   : > { %v633_v12 = vsel %vm423_vm8, %v631_v11, %v615_v62 }
 0x474   : > { %643 = vrot.lane.b32.xlu2 %v633_v12, %s976_s23  ;;  %637 = vrot.lane.b32.xlu1 %v633_v12, %s973_s15 }
 0x479   : > { %v622_v13 = vpop.permute.xlu1 %621 }
 0x47a   : > { %v632_v14 = vsel %vm416_vm7, %v622_v13, %v628_v34 }
 0x47b   : > { %v634_v17 = vsel %vm424_vm9, %v632_v14, %v616_v40 }
 0x47c   : > { %645 = vrot.lane.b32.xlu1 %v634_v17, %s976_s23  ;;  %639 = vrot.lane.b32.xlu0 %v634_v17, %s973_s15 }
 0x4ce   : > { %v644_v20 = vpop.permute.xlu2 %643 }
 0x4e6   : > { %v638_v21 = vpop.permute.xlu1 %637 }
 0x4e7   : > { %v649_v53 = vsel %vm325_vm0, %v638_v21, %v644_v20 }
 0x4e8   : > { %v651_v22 = vsel %vm451_vm10, %v649_v53, %v633_v12 }
 0x4e9   : > { %v679_v23 = vadd.f32 %v678_v18, %v651_v22 }
 0x4eb   : > { %v683_v24 = vsel %vm294_vm11, -1e+30, %v679_v23 }
 0x4ec   : > { %v685_v59 = vsel %vm488_vm12, %v683_v24, -inf }
 0x4ed   : > { %686 = vmax.xlane.f32.xlu0 %v685_v59 }
 0x4ee   : > { %v640_v25 = vpop.permute.xlu0 %639  ;;  %v646_v27 = vpop.permute.xlu1 %645 }
 0x4ef   : > { %v650_v28 = vsel %vm325_vm0, %v640_v25, %v646_v27  ;;  %vm738_vm0 = vcmask 126016  }
 0x4f0   : > { %v652_v30 = vsel %vm452_vm13, %v650_v28, %v634_v17 }
 0x4f1   : > { %v681_v31 = vadd.f32 %v680_v29, %v652_v30 }
 0x4f3   : > { %v684_v0 = vsel %vm295_vm14, -1e+30, %v681_v31 }
 0x4f4   : > { %v688_v32 = vsel %vm488_vm12, %v684_v0, -inf }
 0x4f5   : > { %689 = vmax.xlane.f32.xlu2 %v688_v32 }
 0x50d   : > { %708 = vrot.lane.b32.xlu2 %v1189_v38, %s979_s24 }
 0x560   : > { %v687_v15 = vpop.xlane.xlu0 %686 }
 0x561   : > { %v691_v33 = vsub.f32 %v683_v24, %v687_v15 }
 0x563   : > { %v693_v35 = vmul.f32 1.442695, %v691_v33 }
 0x565   : > { %936 = vpow2.f32 %v693_v35 }
 0x568   : > { %v690_v4 = vpop.xlane.xlu2 %689 }
 0x569   : > { %v692_v36 = vsub.f32 %v684_v0, %v690_v4 }
 0x56b   : > { %v937_v37 = vpop.eup %936  ;;  %v695_v10 = vmul.f32 1.442695, %v692_v36 }
 0x56c   : > { %v697_v39 = vsel %vm488_vm12, %v937_v37, 0.0 }
 0x56d   : > { %938 = vpow2.f32 %v695_v10  ;;  %698 = vadd.xlane.f32.xlu1 %v697_v39 }
 0x570   : > { %v709_v41 = vpop.permute.xlu2 %708 }
 0x571   : > { %721 = vmatpush.bf16.msrb.mxu0 %v709_v41 }
 0x573   : > { %v939_v16 = vpop.eup %938 }
 0x574   : > { %v700_v1 = vsel %vm488_vm12, %v939_v16, 0.0 }
 0x575   : > { %701 = vadd.xlane.f32.xlu0 %v700_v1 }
 0x5e0   : > { %v699_v42 = vpop.xlane.xlu1 %698 }
 0x5e1   : > { %940 = vrcp.f32 %v699_v42 }
 0x5e7   : > { %v941_v43 = vpop.eup %940 }
 0x5e8   : > { %v702_v38 = vpop.xlane.xlu0 %701  ;;  %v705_v45 = vmul.f32 %v941_v43, %v937_v37 }
 0x5e9   : > { %942 = vrcp.f32 %v702_v38 }
 0x5ef   : > { %v943_v44 = vpop.eup %942 }
 0x5f0   : > { %v706_v46 = vmul.f32 %v943_v44, %v939_v16 }
 0x5f2   : > { %v707_v48 = vpack.c.bf16 %v706_v46, %v705_v45 }
 0x5f4   : > { %872 = vmatmul.msk.bf16.vlgmr.msrb.gmra.mxu0 %vm488_vm12, %v707_v48 }
 0x671   : > { %v723_v47 = vpop.f32.mrf.mxu0 }
 0x672   : > { %v728_v49 = vpack.c.bf16 %v723_v47, %v723_v47 }
 0x674   : > { %732 = vrot.lane.b32.xlu1 %v728_v49, %s976_s23 }
 0x679   : > { %v725_v50 = vpop.f32.mrf.mxu0 }
 0x67a   : > { %v729_v51 = vpack.c.bf16 %v725_v50, %v725_v50 }
 0x67c   : > { %734 = vrot.lane.b32.xlu0 %v729_v51, %s976_s23 }
 0x6e6   : > { %v733_v52 = vpop.permute.xlu1 %732 }
 0x6e7   : > { %739 = vst.msk [vmem:[%s1216_s29] sm:$0xf] %vm738_vm0, %v733_v52 }
 0x6ee   : > { %v735_v54 = vpop.permute.xlu0 %734 }
 0x6ef   : > { %740 = vst.msk [vmem:[%s1216_s29 + $0x4] sm:$0xf] %vm738_vm0, %v735_v54 }
 0x6f0 PF: > { %s15_s20 = sadd.s32 1, %s966_s20   ;;  %s1275_s18 = smov %s962_s19 }
 0x6f1   : > { %p12_p5 = scmp.ge.s32.totalorder %s15_s20, 4   ;;  %s1276_s19 = smov %s1278_s21 }
 0x6f3   :  { %14 = sbr.rel (!%p12_p5) target bundleno = 2 (0x2), region = 73 }

// kernel: decoder_layer_forward.5
= control target key start
LH: loop header
LB: loop body
LE: loop exit
PB: predicated region body
PF: predicated region fallthrough
CT: control target
= control target key end

     0   :  { %7 = vsyncpa [#allocation3], 0  ;;  %s115_s12 = smov [#allocation2]   ;;  %s116_s14 = smov 128   ;;  %s148_s0 = inlined_call_operand.hbm [shape: f32[16,32], index: 0, kind: input, shape index: {}]   ;;  %s149_s1 = inlined_call_operand.vmem [shape: bf16[32,16], index: 1, kind: input, shape index: {}]   ;;  %s150_s2 = inlined_call_operand.vmem [shape: bf16[16,16], index: 2, kind: output, shape index: {}]  }
   0x1   :  { %s12_s11 = sshll.u32 %s148_s0, 4  ;;  %s14_s13 = sshll.u32 %s115_s12, 4  ;;  %s13_s11 = int_to_ptr.hbm [resolvable:$true] %s12_s11  ;;  %s15_s13 = int_to_ptr.vmem [resolvable:$true] %s14_s13 }
   0x2   :  { %s117_s15 = smov 8  }
   0x3   :  { %20 = dma.hbm_to_vmem [thread:$0]  %s13_s11, 256, %s15_s13, [#allocation3], %s116_s14, %s116_s14, %s117_s15  }
   0x4   :  { %113 = dma.done.wait [#allocation3], 256  }
   0x5   :  { %114 = vsyncadd [#allocation3], 4294967040  ;;  %v85_v0 = vld [vmem:[%s149_s1 + $0x8] sm:$0xff]  ;;  %v84_v1 = vld [vmem:[%s149_s1] sm:$0xff]  ;;  %vm47_vm0 = vcmask 261120   ;;  %vm67_vm1 = vcmask 125952  }
   0x6   :  { %57 = vmatpush.bf16.msra.mxu0 %v85_v0  ;;  %v28_v2 = vld [vmem:[#allocation2] sm:$0xff]  ;;  %v29_v3 = vld [vmem:[#allocation2 + $0x8] sm:$0xff] }
   0x7   :  { %v30_v4 = vpack.c.bf16 %v29_v3, %v28_v2 }
   0xa   :  { %58 = vmatpush.bf16.msra.mxu0 %v84_v1 }
   0xd   :  { %83 = vmatmul.msk.bf16.vlgmr.msra.gmra.mxu0 %vm47_vm0, %v30_v4 }
  0x8a   :  { %v60_v5 = vpop.f32.mrf.mxu0 }
  0x8b   :  { %v65_v6 = vpack.c.bf16 %v60_v5, %v60_v5 }
  0x8d   :  { %68 = vst.msk [vmem:[%s150_s2] sm:$0xf] %vm67_vm1, %v65_v6 }
  0x92   :  { %v62_v7 = vpop.f32.mrf.mxu0 }
  0x93   :  { %v66_v8 = vpack.c.bf16 %v62_v7, %v62_v7 }
  0x95   :  { %69 = vst.msk [vmem:[%s150_s2 + $0x4] sm:$0xf] %vm67_vm1, %v66_v8 }
  0x96   :  { %74 = vsyncpa [#allocation3], 1 }

// kernel: decoder_layer_forward.4
= control target key start
LH: loop header
LB: loop body
LE: loop exit
PB: predicated region body
PF: predicated region fallthrough
CT: control target
= control target key end

     0   :  { %vm34_vm0 = vcmask 261120   ;;  %vm64_vm1 = vcmask 388096   ;;  %s132_s1 = inlined_call_operand.vmem [shape: bf16[32,48], index: 1, kind: input, shape index: {}]   ;;  %s133_s0 = inlined_call_operand.vmem [shape: f32[32,32], index: 0, kind: input, shape index: {}]   ;;  %s134_s2 = inlined_call_operand.vmem [shape: bf16[32,48], index: 2, kind: output, shape index: {}]  }
   0x1   :  { %v84_v0 = vld [vmem:[%s132_s1 + $0x8] sm:$0xff]  ;;  %v83_v1 = vld [vmem:[%s132_s1] sm:$0xff]  ;;  %v14_v4 = vld [vmem:[%s133_s0 + $0x10] sm:$0xff] }
   0x2   :  { %v12_v2 = vld [vmem:[%s133_s0] sm:$0xff]  ;;  %47 = vmatpush.bf16.msra.mxu0 %v84_v0  ;;  %85 = vmatpush.bf16.msra.mxu1 %v84_v0  ;;  %v13_v3 = vld [vmem:[%s133_s0 + $0x8] sm:$0xff]  ;;  %v15_v5 = vld [vmem:[%s133_s0 + $0x18] sm:$0xff] }
   0x3   :  { %v16_v6 = vpack.c.bf16 %v13_v3, %v12_v2  ;;  %v17_v7 = vpack.c.bf16 %v15_v5, %v14_v4 }
   0x6   :  { %48 = vmatpush.bf16.msra.mxu0 %v83_v1  ;;  %86 = vmatpush.bf16.msra.mxu1 %v83_v1 }
   0x9   :  { %81 = vmatmul.msk.bf16.vlgmr.msra.gmra.mxu0 %vm34_vm0, %v16_v6  ;;  %82 = vmatmul.msk.bf16.vlgmr.msra.gmra.mxu1 %vm34_vm0, %v17_v7 }
  0x86   :  { %v50_v8 = vpop.f32.mrf.mxu0  ;;  %v55_v9 = vpop.f32.mrf.mxu1 }
  0x87   :  { %v60_v10 = vpack.c.bf16 %v50_v8, %v50_v8  ;;  %v62_v11 = vpack.c.bf16 %v55_v9, %v55_v9 }
  0x89   :  { %65 = vst.msk [vmem:[%s134_s2] sm:$0xf] %vm64_vm1, %v60_v10 }
  0x8a   :  { %67 = vst.msk [vmem:[%s134_s2 + $0x8] sm:$0xf] %vm64_vm1, %v62_v11 }
  0x8e   :  { %v52_v12 = vpop.f32.mrf.mxu0  ;;  %v57_v13 = vpop.f32.mrf.mxu1 }
  0x8f   :  { %v61_v14 = vpack.c.bf16 %v52_v12, %v52_v12  ;;  %v63_v15 = vpack.c.bf16 %v57_v13, %v57_v13 }
  0x91   :  { %66 = vst.msk [vmem:[%s134_s2 + $0x4] sm:$0xf] %vm64_vm1, %v61_v14 }
  0x92   :  { %68 = vst.msk [vmem:[%s134_s2 + $0xc] sm:$0xf] %vm64_vm1, %v63_v15 }

// kernel: decoder_layer_forward.6
= control target key start
LH: loop header
LB: loop body
LE: loop exit
PB: predicated region body
PF: predicated region fallthrough
CT: control target
= control target key end

     0   :  { %s1010_s18 = smov 0   ;;  %s1012_s19 = smov 0   ;;  %s1265_s0 = inlined_call_operand.vmem [shape: bf16[2,16,48], index: 0, kind: input, shape index: {}, may-alias: {0,1}]   ;;  %s1266_s1 = inlined_call_operand.vmem [shape: bf16[2,16,48], index: 1, kind: input, shape index: {}, may-alias: {0,1}]   ;;  %s1267_s2 = inlined_call_operand.vmem [shape: bf16[16,16], index: 2, kind: input, shape index: {}]   ;;  %s1268_s3 = inlined_call_operand.vmem [shape: f32[1,16], index: 3, kind: input, shape index: {}]   ;;  %s1269_s4 = inlined_call_operand.vmem [shape: f32[1,16], index: 4, kind: input, shape index: {}]   ;;  %s1270_s5 = inlined_call_operand.vmem [shape: bf16[2,16,16], index: 5, kind: output, shape index: {}]  }
   0x1   :  { %s1014_s20 = smov 0  }
   0x2 LB: > { %s27_s21 = sadd.s32 1, %s962_s19  ;;  %p844_p0 = scmp.ge.s32.totalorder %s966_s20, 1  ;;  %s966_s20 = sphi %s1014_s20, %s15_s20   ;;  %s962_s19 = sphi %s1012_s19, %s1276_s19   ;;  %s958_s18 = sphi %s1010_s18, %s1275_s18  }
   0x3   : > { %p29_p1 = scmp.ge.s32.totalorder %s27_s21, 2  ;;  %p218_p2 = scmp.lt.s32.totalorder %s966_s20, 3 }
   0x5   : > { %s1278_s21 = smov (%p29_p1, %s27_s21), 0  ;;  %p219_p3 = pnand %p844_p0, %p218_p2 }
   0x6   : > { %p260_p4 = scmp.lt.s32.totalorder (!%p219_p3), %s958_s18, 1  ;;  %s968_s8 = smov (!%p219_p3), 112  }
   0x7   : > { %222 = sbr.rel (%p219_p3) target bundleno = 1776 (0x6f0), region = 40  ;;  %s969_s9 = smov (!%p219_p3), 127  }
   0x8   : > { %s970_s10 = smov (!%p219_p3), 15   ;;  %s971_s11 = smov (!%p219_p3), 126  }
   0x9   : > { %s972_s12 = smov (!%p219_p3), 14   ;;  %s973_s15 = smov (!%p219_p3), 120  }
   0xa   : > { %s974_s16 = smov (!%p219_p3), 124   ;;  %s975_s17 = smov (!%p219_p3), 12  }
   0xb   : > { %s976_s23 = smov (!%p219_p3), 8   ;;  %s977_s25 = smov (!%p219_p3), 96  }
   0xc   : > { %v879_v0 = vld [vmem:[%s1267_s2] sm:$0xff]  ;;  %vm325_vm0 = vcmask 64512   ;;  %s1280_s18 = smov (!%p260_p4, %s958_s18), 1  ;;  %v286_v14 = vlaneseq  ;;  %vm360_vm1 = vcmask 121856   ;;  %vm387_vm4 = vcmask 113664   ;;  %s978_s26 = smov 104  }
   0xd   : > { %v330_v1 = vsel %vm325_vm0, %v879_v0, 0  ;;  %s1032_s24 = sshll.u32 %s1280_s18, 3  ;;  %v926_v2 = vld [vmem:[%s1269_s4] ss:$0 sm:$0xff]  ;;  %vm416_vm7 = vcmask 97280   ;;  %vm488_vm12 = vcmask 130048  }
   0xe   : > { %339 = vmatpush.bf16.xpose.msra.mxu0 %v330_v1  ;;  %s267_s27 = scalar_lea.vmem %s1265_s0, %s1032_s24  ;;  %s1045_s7 = scalar_lea.vmem %s1266_s1, %s1032_s24  ;;  %v1066_v15 = vshrl.u32 %v286_v14, 7  ;;  %v881_v31 = vld [vmem:[%s1267_s2] sm:$0xff]  ;;  %v1155_v1 = vand.u32 127, %v286_v14  ;;  %vm534_vm15 = vcmask 60416  }
   0xf   : > { %v1047_v3 = vld [vmem:[%s267_s27] sm:$0xff]   ;;  %s1216_s29 = scalar_lea.vmem %s1270_s5, %s1032_s24  ;;  %s979_s24 = smov 88  }
  0x10   : > { %v1050_v4 = vld [vmem:[%s1045_s7] sm:$0xff]  ;;  %v884_v5 = vunpack.c.l.bf16 %v1047_v3  ;;  %v885_v6 = vunpack.c.h.bf16 %v1047_v3  ;;  %v1069_v16 = vadd.s32 8, %v1066_v15  ;;  %v1080_v20 = vsub.s32 15, %v1066_v15 }
  0x11   : > { %464 = vrot.lane.b32.xlu0 %v1050_v4, %s968_s8  ;;  %v927_v44 = vld [vmem:[%s1268_s3] ss:$0 sm:$0xff]  ;;  %vm294_vm11 = vcmp.gt.s32.totalorder %v1155_v1, %v1066_v15 }
  0x12   : > { %v317_v7 = vadd.f32 %v926_v2, %v884_v5  ;;  %v318_v8 = vadd.f32 %v926_v2, %v885_v6  ;;  %v1072_v17 = vsub.s32 15, %v1069_v16  ;;  %v363_v25 = vand.u32 1, %v1080_v20 }
  0x13   : > { %v390_v35 = vshra.s32 %v1080_v20, 1  ;;  %v311_v45 = vadd.f32 %v927_v44, %v884_v5  ;;  %v312_v46 = vadd.f32 %v927_v44, %v885_v6  ;;  %v419_v52 = vshra.s32 %v1080_v20, 2 }
  0x14   : > { %v319_v9 = vpack.c.bf16 %v318_v8, %v317_v7  ;;  %v364_v18 = vand.u32 1, %v1072_v17  ;;  %vm1087_vm3 = vcmp.eq.s32.totalorder %v363_v25, 1  ;;  %v391_v33 = vshra.s32 %v1072_v17, 1 }
  0x15   : > { %v1110_v40 = vand.u32 1, %v390_v35  ;;  %v1127_v47 = vpack.c.bf16 %v312_v46, %v311_v45  ;;  %v1134_v53 = vand.u32 1, %v419_v52  ;;  %v420_v54 = vshra.s32 %v1072_v17, 2 }
  0x16   : > { %855 = vmatmul.msk.bf16.vlgmr.msra.gmra.mxu0 %vm325_vm0, %v319_v9  ;;  %vm1075_vm2 = vcmp.eq.s32.totalorder %v364_v18, 1  ;;  %v1102_v34 = vand.u32 1, %v391_v33  ;;  %v447_v63 = vshra.s32 %v1080_v20, 3  ;;  %v448_v3 = vshra.s32 %v1072_v17, 3 }
  0x17   : > { %vm394_vm6 = vcmp.eq.s32.totalorder %v1110_v40, 1  ;;  %vm423_vm8 = vcmp.eq.s32.totalorder %v1134_v53, 1  ;;  %v1143_v59 = vand.u32 1, %v420_v54  ;;  %vm295_vm14 = vcmp.gt.s32.totalorder %v1155_v1, %v1069_v16 }
  0x18   : > { %vm395_vm5 = vcmp.eq.s32.totalorder %v1102_v34, 1  ;;  %v1152_v0 = vand.u32 1, %v447_v63 }
  0x19   : > { %vm424_vm9 = vcmp.eq.s32.totalorder %v1143_v59, 1 }
  0x1a   : > { %vm451_vm10 = vcmp.eq.s32.totalorder %v1152_v0, 1 }
  0x83   : > { %v465_v12 = vpop.permute.xlu0 %464 }
  0x84   : > { %v470_v13 = vsel %vm325_vm0, %v465_v12, 0 }
  0x85   : > { %479 = vmatpush.bf16.xpose.msra.mxu1 %v470_v13 }
  0x8c   : > { %860 = vmatmul.msk.bf16.vlgmr.msra.gmra.mxu1 %vm325_vm0, %v1127_v47 }
  0x93   : > { %v341_v10 = vpop.f32.mrf.mxu0 }
  0x94   : > { %348 = vrot.lane.b32.xlu0 %v341_v10, %s969_s9 }
  0x9b   : > { %v343_v11 = vpop.f32.mrf.mxu0 }
  0x9c   : > { %356 = vrot.lane.b32.xlu2 %v343_v11, %s970_s10  ;;  %350 = vrot.lane.b32.xlu1 %v343_v11, %s969_s9 }
  0xa4   : > { %354 = vrot.lane.b32.xlu1 %v341_v10, %s970_s10 }
  0xf6   : > { %v357_v21 = vpop.permute.xlu2 %356 }
 0x106   : > { %v349_v27 = vpop.permute.xlu0 %348 }
 0x109   : > { %v481_v2 = vpop.f32.mrf.mxu1 }
 0x10e   : > { %v351_v22 = vpop.permute.xlu1 %350 }
 0x10f   : > { %v362_v23 = vsel %vm360_vm1, %v351_v22, %v357_v21 }
 0x110   : > { %v372_v24 = vsel %vm1075_vm2, %v362_v23, %v343_v11 }
 0x111   : > { %377 = vrot.lane.b32.xlu0 %v372_v24, %s971_s11  ;;  %v483_v18 = vpop.f32.mrf.mxu1 }
 0x116   : > { %v355_v28 = vpop.permute.xlu1 %354 }
 0x117   : > { %v361_v29 = vsel %vm360_vm1, %v349_v27, %v355_v28 }
 0x118   : > { %v371_v30 = vsel %vm1087_vm3, %v361_v29, %v341_v10  ;;  %v1164_v10 = vand.u32 1, %v448_v3 }
 0x119   : > { %381 = vrot.lane.b32.xlu1 %v371_v30, %s972_s12  ;;  %375 = vrot.lane.b32.xlu2 %v371_v30, %s971_s11 }
 0x11a   : > { %559 = vrot.lane.b32.xlu0 %v881_v31, %s973_s15  ;;  %vm452_vm13 = vcmp.eq.s32.totalorder %v1164_v10, 1 }
 0x121   : > { %383 = vrot.lane.b32.xlu2 %v372_v24, %s972_s12 }
 0x173   : > { %v376_v32 = vpop.permute.xlu2 %375 }
 0x17b   : > { %v384_v36 = vpop.permute.xlu2 %383 }
 0x183   : > { %v378_v37 = vpop.permute.xlu0 %377 }
 0x184   : > { %v389_v38 = vsel %vm387_vm4, %v378_v37, %v384_v36 }
 0x185   : > { %v401_v39 = vsel %vm395_vm5, %v389_v38, %v372_v24  ;;  %v1189_v38 = vld [vmem:[%s1045_s7] sm:$0xff] }
 0x186   : > { %406 = vrot.lane.b32.xlu2 %v401_v39, %s974_s16 }
 0x18b   : > { %v382_v41 = vpop.permute.xlu1 %381 }
 0x18c   : > { %v388_v42 = vsel %vm387_vm4, %v376_v32, %v382_v41  ;;  %v560_v48 = vpop.permute.xlu0 %559 }
 0x18d   : > { %v400_v43 = vsel %vm394_vm6, %v388_v42, %v371_v30  ;;  %v565_v49 = vsel %vm325_vm0, %v560_v48, 0 }
 0x18e   : > { %410 = vrot.lane.b32.xlu0 %v400_v43, %s975_s17  ;;  %404 = vrot.lane.b32.xlu1 %v400_v43, %s974_s16 }
 0x18f   : > { %552 = vrot.lane.b32.xlu2 %v319_v9, %s973_s15  ;;  %574 = vmatpush.bf16.xpose.msra.mxu3 %v565_v49 }
 0x196   : > { %412 = vrot.lane.b32.xlu1 %v401_v39, %s975_s17 }
 0x1e0   : > { %v407_v50 = vpop.permute.xlu2 %406 }
 0x1e9   : > { %v553_v51 = vpop.permute.xlu2 %552 }
 0x1ea   : > { %866 = vmatmul.msk.bf16.vlgmr.msra.gmra.mxu3 %vm325_vm0, %v553_v51 }
 0x200   : > { %v411_v55 = vpop.permute.xlu0 %410  ;;  %v405_v56 = vpop.permute.xlu1 %404 }
 0x201   : > { %v417_v57 = vsel %vm416_vm7, %v405_v56, %v411_v55 }
 0x202   : > { %v429_v58 = vsel %vm423_vm8, %v417_v57, %v400_v43 }
 0x203   : > { %433 = vrot.lane.b32.xlu0 %v429_v58, %s973_s15  ;;  %439 = vrot.lane.b32.xlu2 %v429_v58, %s976_s23 }
 0x208   : > { %v413_v60 = vpop.permute.xlu1 %412 }
 0x209   : > { %v418_v61 = vsel %vm416_vm7, %v407_v50, %v413_v60 }
 0x20a   : > { %v430_v62 = vsel %vm424_vm9, %v418_v61, %v401_v39 }
 0x20b   : > { %441 = vrot.lane.b32.xlu0 %v430_v62, %s976_s23  ;;  %435 = vrot.lane.b32.xlu1 %v430_v62, %s973_s15 }
 0x25d   : > { %v440_v5 = vpop.permute.xlu2 %439 }
 0x26d   : > { %v576_v24 = vpop.f32.mrf.mxu3 }
 0x275   : > { %v434_v6 = vpop.permute.xlu0 %433  ;;  %v578_v25 = vpop.f32.mrf.mxu3 }
 0x276   : > { %v445_v7 = vsel %vm325_vm0, %v434_v6, %v440_v5 }
 0x277   : > { %v457_v8 = vsel %vm451_vm10, %v445_v7, %v429_v58 }
 0x278   : > { %v482_v9 = vadd.f32 %v481_v2, %v457_v8 }
 0x27a   : > { %v486_v11 = vsel %vm294_vm11, -1e+30, %v482_v9 }
 0x27b   : > { %v489_v12 = vsel %vm488_vm12, %v486_v11, -inf }
 0x27c   : > { %490 = vmax.xlane.f32.xlu1 %v489_v12 }
 0x27d   : > { %v442_v13 = vpop.permute.xlu0 %441  ;;  %v436_v14 = vpop.permute.xlu1 %435 }
 0x27e   : > { %v446_v17 = vsel %vm325_vm0, %v436_v14, %v442_v13 }
 0x27f   : > { %v458_v20 = vsel %vm452_vm13, %v446_v17, %v430_v62 }
 0x280   : > { %v484_v21 = vadd.f32 %v483_v18, %v458_v20 }
 0x282   : > { %v487_v22 = vsel %vm295_vm14, -1e+30, %v484_v21 }
 0x283   : > { %v492_v23 = vsel %vm488_vm12, %v487_v22, -inf }
 0x284   : > { %493 = vmax.xlane.f32.xlu2 %v492_v23 }
 0x295   : > { %512 = vrot.lane.b32.xlu1 %v1050_v4, %s977_s25 }
 0x29d   : > { %583 = vrot.lane.b32.xlu1 %v576_v24, %s969_s9 }
 0x2a5   : > { %591 = vrot.lane.b32.xlu1 %v578_v25, %s970_s10 }
 0x2ef   : > { %v491_v27 = vpop.xlane.xlu1 %490 }
 0x2f0   : > { %v495_v28 = vsub.f32 %v486_v11, %v491_v27 }
 0x2f2   : > { %v497_v29 = vmul.f32 1.442695, %v495_v28 }
 0x2f4   : > { %928 = vpow2.f32 %v497_v29 }
 0x2f7   : > { %v494_v30 = vpop.xlane.xlu2 %493 }
 0x2f8   : > { %v496_v31 = vsub.f32 %v487_v22, %v494_v30 }
 0x2fa   : > { %v929_v32 = vpop.eup %928  ;;  %v499_v33 = vmul.f32 1.442695, %v496_v31 }
 0x2fb   : > { %v501_v35 = vsel %vm488_vm12, %v929_v32, 0.0 }
 0x2fc   : > { %930 = vpow2.f32 %v499_v33  ;;  %502 = vadd.xlane.f32.xlu0 %v501_v35 }
 0x302   : > { %v931_v4 = vpop.eup %930 }
 0x303   : > { %v504_v36 = vsel %vm488_vm12, %v931_v4, 0.0 }
 0x304   : > { %505 = vadd.xlane.f32.xlu2 %v504_v36 }
 0x307   : > { %v513_v37 = vpop.permute.xlu1 %512 }
 0x308   : > { %525 = vmatpush.bf16.msra.mxu2 %v513_v37 }
 0x30f   : > { %v584_v48 = vpop.permute.xlu1 %583 }
 0x310   : > { %654 = vrot.lane.b32.xlu0 %v1127_v47, %s973_s15 }
 0x317   : > { %v592_v55 = vpop.permute.xlu1 %591 }
 0x318   : > { %585 = vrot.lane.b32.xlu0 %v578_v25, %s969_s9 }
 0x31c   : > { %661 = vrot.lane.b32.xlu2 %v1189_v38, %s978_s26 }
 0x324   : > { %589 = vrot.lane.b32.xlu2 %v576_v24, %s970_s10 }
 0x36f   : > { %v503_v39 = vpop.xlane.xlu0 %502 }
 0x370   : > { %932 = vrcp.f32 %v503_v39 }
 0x376   : > { %v933_v42 = vpop.eup %932 }
 0x377   : > { %v506_v41 = vpop.xlane.xlu2 %505  ;;  %v509_v45 = vmul.f32 %v933_v42, %v929_v32 }
 0x378   : > { %934 = vrcp.f32 %v506_v41 }
 0x37e   : > { %v935_v43 = vpop.eup %934 }
 0x37f   : > { %v662_v44 = vpop.permute.xlu2 %661  ;;  %v510_v46 = vmul.f32 %v935_v43, %v931_v4 }
 0x380   : > { %v667_v47 = vsel %vm325_vm0, %v662_v44, 0 }
 0x381   : > { %676 = vmatpush.bf16.xpose.msrb.mxu2 %v667_v47  ;;  %v511_v49 = vpack.c.bf16 %v510_v46, %v509_v45 }
 0x382   : > { %v655_v50 = vpop.permute.xlu0 %654 }
 0x383   : > { %861 = vmatmul.msk.bf16.vlgmr.msra.gmra.mxu2 %vm488_vm12, %v511_v49 }
 0x387   : > { %v590_v51 = vpop.permute.xlu2 %589 }
 0x388   : > { %v595_v52 = vsel %vm360_vm1, %v584_v48, %v590_v51 }
 0x389   : > { %v597_v54 = vsel %vm1087_vm3, %v595_v52, %v576_v24 }
 0x38a   : > { %v586_v56 = vpop.permute.xlu0 %585  ;;  %607 = vrot.lane.b32.xlu1 %v597_v54, %s972_s12  ;;  %601 = vrot.lane.b32.xlu0 %v597_v54, %s971_s11 }
 0x38b   : > { %v596_v57 = vsel %vm360_vm1, %v586_v56, %v592_v55 }
 0x38c   : > { %v598_v58 = vsel %vm1075_vm2, %v596_v57, %v578_v25 }
 0x38d   : > { %603 = vrot.lane.b32.xlu2 %v598_v58, %s971_s11 }
 0x392   : > { %609 = vrot.lane.b32.xlu0 %v598_v58, %s972_s12 }
 0x393   : > { %871 = vmatmul.msk.bf16.vlgmr.msrb.gmra.mxu2 %vm325_vm0, %v655_v50 }
 0x3e7   : > { %v604_v63 = vpop.permute.xlu2 %603 }
 0x3fc   : > { %v602_v26 = vpop.permute.xlu0 %601  ;;  %v608_v60 = vpop.permute.xlu1 %607 }
 0x3fd   : > { %v613_v61 = vsel %vm387_vm4, %v602_v26, %v608_v60 }
 0x3fe   : > { %v615_v62 = vsel %vm394_vm6, %v613_v61, %v597_v54 }
 0x3ff   : > { %625 = vrot.lane.b32.xlu0 %v615_v62, %s975_s17  ;;  %619 = vrot.lane.b32.xlu2 %v615_v62, %s974_s16 }
 0x404   : > { %v610_v19 = vpop.permute.xlu0 %609 }
 0x405   : > { %v614_v2 = vsel %vm387_vm4, %v604_v63, %v610_v19 }
 0x406   : > { %v527_v3 = vpop.f32.mrf.mxu2  ;;  %v616_v40 = vsel %vm395_vm5, %v614_v2, %v598_v58 }
 0x407   : > { %v532_v5 = vpack.c.bf16 %v527_v3, %v527_v3  ;;  %621 = vrot.lane.b32.xlu1 %v616_v40, %s974_s16  ;;  %627 = vrot.lane.b32.xlu2 %v616_v40, %s975_s17 }
 0x409   : > { %535 = vst.msk [vmem:[%s1216_s29] sm:$0xf] %vm534_vm15, %v532_v5 }
 0x40e   : > { %v529_v6 = vpop.f32.mrf.mxu2 }
 0x40f   : > { %v533_v7 = vpack.c.bf16 %v529_v6, %v529_v6 }
 0x411   : > { %536 = vst.msk [vmem:[%s1216_s29 + $0x4] sm:$0xf] %vm534_vm15, %v533_v7 }
 0x416   : > { %v678_v18 = vpop.f32.mrf.mxu2 }
 0x41e   : > { %v680_v29 = vpop.f32.mrf.mxu2 }
 0x459   : > { %v620_v8 = vpop.permute.xlu2 %619 }
 0x461   : > { %v628_v34 = vpop.permute.xlu2 %627 }
 0x471   : > { %v626_v9 = vpop.permute.xlu0 %625 }
 0x472   : > { %v631_v11 = vsel %vm416_vm7, %v620_v8, %v626_v9 }
 0x473   : > { %v633_v12 = vsel %vm423_vm8, %v631_v11, %v615_v62 }
 0x474   : > { %643 = vrot.lane.b32.xlu2 %v633_v12, %s976_s23  ;;  %637 = vrot.lane.b32.xlu1 %v633_v12, %s973_s15 }
 0x479   : > { %v622_v13 = vpop.permute.xlu1 %621 }
 0x47a   : > { %v632_v14 = vsel %vm416_vm7, %v622_v13, %v628_v34 }
 0x47b   : > { %v634_v17 = vsel %vm424_vm9, %v632_v14, %v616_v40 }
 0x47c   : > { %645 = vrot.lane.b32.xlu1 %v634_v17, %s976_s23  ;;  %639 = vrot.lane.b32.xlu0 %v634_v17, %s973_s15 }
 0x4ce   : > { %v644_v20 = vpop.permute.xlu2 %643 }
 0x4e6   : > { %v638_v21 = vpop.permute.xlu1 %637 }
 0x4e7   : > { %v649_v53 = vsel %vm325_vm0, %v638_v21, %v644_v20 }
 0x4e8   : > { %v651_v22 = vsel %vm451_vm10, %v649_v53, %v633_v12 }
 0x4e9   : > { %v679_v23 = vadd.f32 %v678_v18, %v651_v22 }
 0x4eb   : > { %v683_v24 = vsel %vm294_vm11, -1e+30, %v679_v23 }
 0x4ec   : > { %v685_v59 = vsel %vm488_vm12, %v683_v24, -inf }
 0x4ed   : > { %686 = vmax.xlane.f32.xlu0 %v685_v59 }
 0x4ee   : > { %v640_v25 = vpop.permute.xlu0 %639  ;;  %v646_v27 = vpop.permute.xlu1 %645 }
 0x4ef   : > { %v650_v28 = vsel %vm325_vm0, %v640_v25, %v646_v27  ;;  %vm738_vm0 = vcmask 126016  }
 0x4f0   : > { %v652_v30 = vsel %vm452_vm13, %v650_v28, %v634_v17 }
 0x4f1   : > { %v681_v31 = vadd.f32 %v680_v29, %v652_v30 }
 0x4f3   : > { %v684_v0 = vsel %vm295_vm14, -1e+30, %v681_v31 }
 0x4f4   : > { %v688_v32 = vsel %vm488_vm12, %v684_v0, -inf }
 0x4f5   : > { %689 = vmax.xlane.f32.xlu2 %v688_v32 }
 0x50d   : > { %708 = vrot.lane.b32.xlu2 %v1189_v38, %s979_s24 }
 0x560   : > { %v687_v15 = vpop.xlane.xlu0 %686 }
 0x561   : > { %v691_v33 = vsub.f32 %v683_v24, %v687_v15 }
 0x563   : > { %v693_v35 = vmul.f32 1.442695, %v691_v33 }
 0x565   : > { %936 = vpow2.f32 %v693_v35 }
 0x568   : > { %v690_v4 = vpop.xlane.xlu2 %689 }
 0x569   : > { %v692_v36 = vsub.f32 %v684_v0, %v690_v4 }
 0x56b   : > { %v937_v37 = vpop.eup %936  ;;  %v695_v10 = vmul.f32 1.442695, %v692_v36 }
 0x56c   : > { %v697_v39 = vsel %vm488_vm12, %v937_v37, 0.0 }
 0x56d   : > { %938 = vpow2.f32 %v695_v10  ;;  %698 = vadd.xlane.f32.xlu1 %v697_v39 }
 0x570   : > { %v709_v41 = vpop.permute.xlu2 %708 }
 0x571   : > { %721 = vmatpush.bf16.msrb.mxu0 %v709_v41 }
 0x573   : > { %v939_v16 = vpop.eup %938 }
 0x574   : > { %v700_v1 = vsel %vm488_vm12, %v939_v16, 0.0 }
 0x575   : > { %701 = vadd.xlane.f32.xlu0 %v700_v1 }
 0x5e0   : > { %v699_v42 = vpop.xlane.xlu1 %698 }
 0x5e1   : > { %940 = vrcp.f32 %v699_v42 }
 0x5e7   : > { %v941_v43 = vpop.eup %940 }
 0x5e8   : > { %v702_v38 = vpop.xlane.xlu0 %701  ;;  %v705_v45 = vmul.f32 %v941_v43, %v937_v37 }
 0x5e9   : > { %942 = vrcp.f32 %v702_v38 }
 0x5ef   : > { %v943_v44 = vpop.eup %942 }
 0x5f0   : > { %v706_v46 = vmul.f32 %v943_v44, %v939_v16 }
 0x5f2   : > { %v707_v48 = vpack.c.bf16 %v706_v46, %v705_v45 }
 0x5f4   : > { %872 = vmatmul.msk.bf16.vlgmr.msrb.gmra.mxu0 %vm488_vm12, %v707_v48 }
 0x671   : > { %v723_v47 = vpop.f32.mrf.mxu0 }
 0x672   : > { %v728_v49 = vpack.c.bf16 %v723_v47, %v723_v47 }
 0x674   : > { %732 = vrot.lane.b32.xlu1 %v728_v49, %s976_s23 }
 0x679   : > { %v725_v50 = vpop.f32.mrf.mxu0 }
 0x67a   : > { %v729_v51 = vpack.c.bf16 %v725_v50, %v725_v50 }
 0x67c   : > { %734 = vrot.lane.b32.xlu0 %v729_v51, %s976_s23 }
 0x6e6   : > { %v733_v52 = vpop.permute.xlu1 %732 }
 0x6e7   : > { %739 = vst.msk [vmem:[%s1216_s29] sm:$0xf] %vm738_vm0, %v733_v52 }
 0x6ee   : > { %v735_v54 = vpop.permute.xlu0 %734 }
 0x6ef   : > { %740 = vst.msk [vmem:[%s1216_s29 + $0x4] sm:$0xf] %vm738_vm0, %v735_v54 }
 0x6f0 PF: > { %s15_s20 = sadd.s32 1, %s966_s20   ;;  %s1275_s18 = smov %s962_s19 }
 0x6f1   : > { %p12_p5 = scmp.ge.s32.totalorder %s15_s20, 4   ;;  %s1276_s19 = smov %s1278_s21 }
 0x6f3   :  { %14 = sbr.rel (!%p12_p5) target bundleno = 2 (0x2), region = 73 }

// kernel: decoder_layer_forward.7
= control target key start
LH: loop header
LB: loop body
LE: loop exit
PB: predicated region body
PF: predicated region fallthrough
CT: control target
= control target key end

     0   :  { %vm61_vm0 = vcmask 130048   ;;  %vm95_vm1 = vcmask 261120   ;;  %v518_v19 = vmov 32.0   ;;  %vm296_vm15 = vcmask 523264   ;;  %s717_s2 = inlined_call_operand.vmem [shape: bf16[16,32], index: 2, kind: input, shape index: {}]   ;;  %s718_s0 = inlined_call_operand.vmem [shape: bf16[32,16], index: 0, kind: input, shape index: {}]   ;;  %s719_s1 = inlined_call_operand.vmem [shape: f32[32,32], index: 1, kind: input, shape index: {}]   ;;  %s720_s3 = inlined_call_operand.vmem [shape: f32[1,32], index: 3, kind: input, shape index: {}]   ;;  %s721_s4 = inlined_call_operand.vmem [shape: f32[1,32], index: 4, kind: input, shape index: {}]   ;;  %s722_s6 = inlined_call_operand.vmem [shape: f32[1,64], index: 6, kind: input, shape index: {}]   ;;  %s723_s5 = inlined_call_operand.vmem [shape: bf16[32,64], index: 5, kind: input, shape index: {}]   ;;  %s724_s8 = inlined_call_operand.vmem [shape: f32[1,32], index: 8, kind: input, shape index: {}]   ;;  %s725_s7 = inlined_call_operand.vmem [shape: bf16[64,32], index: 7, kind: input, shape index: {}]   ;;  %s726_s9 = inlined_call_operand.vmem [shape: f32[1,32], index: 9, kind: input, shape index: {}]   ;;  %s727_s10 = inlined_call_operand.vmem [shape: f32[1,32], index: 10, kind: input, shape index: {}]   ;;  %s728_s11 = inlined_call_operand.vmem [shape: f32[32,32], index: 11, kind: output, shape index: {}]  }
   0x1   :  { %v482_v0 = vld [vmem:[%s717_s2] sm:$0xff]  ;;  %v481_v2 = vld [vmem:[%s718_s0 + $0x8] sm:$0xff]  ;;  %v89_v11 = vld [vmem:[%s719_s1 + $0x10] sm:$0xff]  ;;  %500 = vrcp.f32 %v518_v19 }
   0x2   :  { %v480_v1 = vld [vmem:[%s718_s0] sm:$0xff]  ;;  %75 = vmatpush.bf16.msra.mxu0 %v482_v0  ;;  %v88_v7 = vld [vmem:[%s719_s1 + $0x8] sm:$0xff]  ;;  %v90_v15 = vld [vmem:[%s719_s1 + $0x18] sm:$0xff] }
   0x3   :  { %v87_v3 = vld [vmem:[%s719_s1] sm:$0xff]  ;;  %v484_v46 = vld [vmem:[%s723_s5 + $0x8] sm:$0xff] }
   0x4   :  { %241 = vmatpush.bf16.msra.mxu1 %v484_v46  ;;  %v483_v49 = vld [vmem:[%s723_s5] sm:$0xff] }
   0x5   :  { %450 = vmatmul.msk.bf16.vlgmr.msra.gmra.mxu0 %vm61_vm0, %v480_v1  ;;  %v496_v46 = vld [vmem:[%s722_s6] ss:$0 sm:$0xff] }
   0x7   :  { %v501_v20 = vpop.eup %500 }
   0x8   :  { %v109_v21 = vmul.f32 32.0, %v501_v20  ;;  %vm113_vm2 = vweird.f32 %v501_v20  ;;  %242 = vmatpush.bf16.msra.mxu1 %v483_v49 }
   0xa   :  { %v110_v22 = vsub.f32 1.0, %v109_v21 }
   0xc   :  { %v111_v23 = vmul.f32 %v501_v20, %v110_v22 }
   0xe   :  { %v112_v24 = vadd.f32 %v501_v20, %v111_v23 }
  0x10   :  { %v604_v25 = vsel %vm113_vm2, %v501_v20, %v112_v24 }
  0x15   :  { %451 = vmatmul.msk.bf16.gmra.mxu0 %vm61_vm0, %v481_v2 }
  0x82   :  { %v77_v4 = vpop.f32.mrf.mxu0 }
  0x83   :  { %v91_v5 = vadd.f32 %v87_v3, %v77_v4 }
  0x85   :  { %v96_v6 = vsel %vm95_vm1, %v91_v5, 0.0 }
  0x86   :  { %97 = vadd.xlane.f32.xlu0 %v96_v6 }
  0x8a   :  { %v79_v8 = vpop.f32.mrf.mxu0 }
  0x8b   :  { %v92_v9 = vadd.f32 %v88_v7, %v79_v8 }
  0x8d   :  { %v99_v10 = vsel %vm95_vm1, %v92_v9, 0.0 }
  0x8e   :  { %100 = vadd.xlane.f32.xlu0 %v99_v10  ;;  %v494_v10 = vld [vmem:[%s720_s3] ss:$0 sm:$0xff] }
  0x92   :  { %v82_v12 = vpop.f32.mrf.mxu0 }
  0x93   :  { %v93_v13 = vadd.f32 %v89_v11, %v82_v12 }
  0x95   :  { %v102_v14 = vsel %vm95_vm1, %v93_v13, 0.0 }
  0x96   :  { %103 = vadd.xlane.f32.xlu1 %v102_v14 }
  0x9a   :  { %v84_v16 = vpop.f32.mrf.mxu0 }
  0x9b   :  { %v94_v17 = vadd.f32 %v90_v15, %v84_v16 }
  0x9d   :  { %v105_v18 = vsel %vm95_vm1, %v94_v17, 0.0 }
  0x9e   :  { %106 = vadd.xlane.f32.xlu1 %v105_v18 }
  0xf9   :  { %v98_v26 = vpop.xlane.xlu0 %97 }
  0xfa   :  { %v115_v27 = vmul.f32 %v604_v25, %v98_v26 }
  0xfc   :  { %v119_v28 = vsub.f32 %v91_v5, %v115_v27 }
  0xfe   :  { %v123_v29 = vmul.f32 %v119_v28, %v119_v28 }
 0x100   :  { %v127_v30 = vsel %vm95_vm1, %v123_v29, 0.0 }
 0x101   :  { %128 = vadd.xlane.f32.xlu2 %v127_v30  ;;  %v101_v31 = vpop.xlane.xlu0 %100 }
 0x102   :  { %v116_v32 = vmul.f32 %v604_v25, %v101_v31 }
 0x104   :  { %v609_v33 = vsub.f32 %v92_v9, %v116_v32 }
 0x106   :  { %v124_v34 = vmul.f32 %v609_v33, %v609_v33 }
 0x108   :  { %v130_v35 = vsel %vm95_vm1, %v124_v34, 0.0 }
 0x109   :  { %131 = vadd.xlane.f32.xlu2 %v130_v35  ;;  %v104_v36 = vpop.xlane.xlu1 %103 }
 0x10a   :  { %v117_v37 = vmul.f32 %v604_v25, %v104_v36 }
 0x10c   :  { %v615_v38 = vsub.f32 %v93_v13, %v117_v37 }
 0x10e   :  { %v125_v39 = vmul.f32 %v615_v38, %v615_v38 }
 0x110   :  { %v133_v40 = vsel %vm95_vm1, %v125_v39, 0.0 }
 0x111   :  { %134 = vadd.xlane.f32.xlu0 %v133_v40  ;;  %v107_v41 = vpop.xlane.xlu1 %106 }
 0x112   :  { %v118_v42 = vmul.f32 %v604_v25, %v107_v41 }
 0x114   :  { %v621_v43 = vsub.f32 %v94_v17, %v118_v42  ;;  %v495_v17 = vld [vmem:[%s721_s4] ss:$0 sm:$0xff]  ;;  %v488_v42 = vld [vmem:[%s725_s7 + $0x18] sm:$0xff] }
 0x115   :  { %307 = vmatpush.bf16.msra.mxu2 %v488_v42  ;;  %489 = vmatpush.bf16.msra.mxu3 %v488_v42 }
 0x116   :  { %v126_v44 = vmul.f32 %v621_v43, %v621_v43 }
 0x118   :  { %v136_v45 = vsel %vm95_vm1, %v126_v44, 0.0  ;;  %v485_v44 = vld [vmem:[%s725_s7] sm:$0xff] }
 0x119   :  { %137 = vadd.xlane.f32.xlu1 %v136_v45 }
 0x174   :  { %v129_v47 = vpop.xlane.xlu2 %128 }
 0x175   :  { %v139_v48 = vmul.f32 %v129_v47, %v604_v25 }
 0x177   :  { %v143_v50 = vadd.f32 1e-05, %v139_v48 }
 0x179   :  { %502 = vrsqrt.f32 %v143_v50  ;;  %vm153_vm4 = vweird.f32 %v143_v50 }
 0x17c   :  { %v132_v51 = vpop.xlane.xlu2 %131 }
 0x17d   :  { %v140_v52 = vmul.f32 %v132_v51, %v604_v25 }
 0x17f   :  { %v503_v53 = vpop.eup %502  ;;  %v144_v54 = vadd.f32 1e-05, %v140_v52 }
 0x180   :  { %v148_v55 = vmul.f32 %v503_v53, %v143_v50  ;;  %vm154_vm3 = vweird.f32 %v503_v53 }
 0x181   :  { %504 = vrsqrt.f32 %v144_v54  ;;  %vm155_vm5 = vmor %vm153_vm4, %vm154_vm3  ;;  %vm163_vm7 = vweird.f32 %v144_v54 }
 0x182   :  { %v149_v56 = vmul.f32 %v503_v53, %v148_v55 }
 0x184   :  { %v150_v57 = vmul.f32 0.5, %v149_v56  ;;  %v135_v58 = vpop.xlane.xlu0 %134 }
 0x185   :  { %v141_v59 = vmul.f32 %v135_v58, %v604_v25 }
 0x186   :  { %v151_v60 = vsub.f32 1.5, %v150_v57 }
 0x187   :  { %v505_v61 = vpop.eup %504  ;;  %v145_v62 = vadd.f32 1e-05, %v141_v59 }
 0x188   :  { %v152_v63 = vmul.f32 %v503_v53, %v151_v60  ;;  %v158_v0 = vmul.f32 %v505_v61, %v144_v54  ;;  %vm164_vm6 = vweird.f32 %v505_v61  ;;  %v497_v60 = vld [vmem:[%s724_s8] ss:$0 sm:$0xff] }
 0x189   :  { %506 = vrsqrt.f32 %v145_v62  ;;  %vm165_vm8 = vmor %vm163_vm7, %vm164_vm6  ;;  %vm173_vm10 = vweird.f32 %v145_v62 }
 0x18a   :  { %v159_v1 = vmul.f32 %v505_v61, %v158_v0  ;;  %v156_v2 = vsel %vm155_vm5, %v503_v53, %v152_v63 }
 0x18b   :  { %v187_v8 = vmul.f32 %v156_v2, %v119_v28 }
 0x18c   :  { %v160_v3 = vmul.f32 0.5, %v159_v1  ;;  %v138_v4 = vpop.xlane.xlu1 %137 }
 0x18d   :  { %v142_v5 = vmul.f32 %v138_v4, %v604_v25  ;;  %v195_v16 = vmul.f32 %v494_v10, %v187_v8 }
 0x18e   :  { %v161_v6 = vsub.f32 1.5, %v160_v3 }
 0x18f   :  { %v507_v7 = vpop.eup %506  ;;  %v146_v9 = vadd.f32 1e-05, %v142_v5  ;;  %v203_v22 = vadd.f32 %v495_v17, %v195_v16 }
 0x190   :  { %v162_v11 = vmul.f32 %v505_v61, %v161_v6  ;;  %v168_v12 = vmul.f32 %v507_v7, %v145_v62  ;;  %vm174_vm9 = vweird.f32 %v507_v7 }
 0x191   :  { %508 = vrsqrt.f32 %v146_v9  ;;  %vm175_vm11 = vmor %vm173_vm10, %vm174_vm9  ;;  %vm183_vm13 = vweird.f32 %v146_v9 }
 0x192   :  { %v166_v13 = vsel %vm165_vm8, %v505_v61, %v162_v11  ;;  %v169_v14 = vmul.f32 %v507_v7, %v168_v12 }
 0x193   :  { %v188_v15 = vmul.f32 %v166_v13, %v609_v33 }
 0x194   :  { %v170_v18 = vmul.f32 0.5, %v169_v14 }
 0x195   :  { %v196_v19 = vmul.f32 %v494_v10, %v188_v15 }
 0x196   :  { %v171_v20 = vsub.f32 1.5, %v170_v18 }
 0x197   :  { %v509_v21 = vpop.eup %508  ;;  %v643_v23 = vadd.f32 %v495_v17, %v196_v19 }
 0x198   :  { %v172_v24 = vmul.f32 %v507_v7, %v171_v20  ;;  %v178_v26 = vmul.f32 %v509_v21, %v146_v9  ;;  %vm184_vm12 = vweird.f32 %v509_v21 }
 0x199   :  { %v207_v27 = vpack.c.bf16 %v643_v23, %v203_v22  ;;  %vm185_vm14 = vmor %vm183_vm13, %vm184_vm12 }
 0x19a   :  { %v179_v28 = vmul.f32 %v509_v21, %v178_v26  ;;  %v176_v29 = vsel %vm175_vm11, %v507_v7, %v172_v24 }
 0x19b   :  { %460 = vmatmul.msk.bf16.vlgmr.msra.gmra.mxu1 %vm95_vm1, %v207_v27  ;;  %v189_v32 = vmul.f32 %v176_v29, %v615_v38  ;;  %v487_v38 = vld [vmem:[%s725_s7 + $0x10] sm:$0xff] }
 0x19c   :  { %v180_v30 = vmul.f32 0.5, %v179_v28  ;;  %308 = vmatpush.bf16.msra.mxu2 %v487_v38  ;;  %490 = vmatpush.bf16.msra.mxu3 %v487_v38 }
 0x19d   :  { %v197_v36 = vmul.f32 %v494_v10, %v189_v32 }
 0x19e   :  { %v181_v31 = vsub.f32 1.5, %v180_v30 }
 0x19f   :  { %v205_v39 = vadd.f32 %v495_v17, %v197_v36 }
 0x1a0   :  { %v182_v33 = vmul.f32 %v509_v21, %v181_v31 }
 0x1a2   :  { %v186_v34 = vsel %vm185_vm14, %v509_v21, %v182_v33 }
 0x1a3   :  { %v190_v35 = vmul.f32 %v186_v34, %v621_v43  ;;  %v486_v43 = vld [vmem:[%s725_s7 + $0x8] sm:$0xff] }
 0x1a4   :  { %309 = vmatpush.bf16.msra.mxu2 %v486_v43  ;;  %491 = vmatpush.bf16.msra.mxu3 %v486_v43 }
 0x1a5   :  { %v198_v37 = vmul.f32 %v494_v10, %v190_v35 }
 0x1a7   :  { %v206_v40 = vadd.f32 %v495_v17, %v198_v37 }
 0x1a8   :  { %310 = vmatpush.bf16.msra.mxu2 %v485_v44  ;;  %492 = vmatpush.bf16.msra.mxu3 %v485_v44 }
 0x1a9   :  { %v208_v41 = vpack.c.bf16 %v206_v40, %v205_v39 }
 0x1ab   :  { %461 = vmatmul.msk.bf16.gmra.mxu1 %vm95_vm1, %v208_v41 }
 0x218   :  { %v244_v45 = vpop.f32.mrf.mxu1 }
 0x219   :  { %v245_v47 = vadd.f32 %v496_v46, %v244_v45 }
 0x21b   :  { %v254_v50 = vmax.f32 %v245_v47, 0.0 }
 0x220   :  { %v246_v48 = vpop.f32.mrf.mxu1 }
 0x221   :  { %v247_v49 = vadd.f32 %v496_v46, %v246_v48 }
 0x223   :  { %v255_v51 = vmax.f32 %v247_v49, 0.0 }
 0x225   :  { %v258_v52 = vpack.c.bf16 %v255_v51, %v254_v50  ;;  %v498_v51 = vld [vmem:[%s726_s9] ss:$0 sm:$0xff] }
 0x227   :  { %478 = vmatmul.msk.bf16.vlgmr.msra.gmra.mxu2 %vm296_vm15, %v258_v52 }
 0x228   :  { %v249_v53 = vpop.f32.mrf.mxu1 }
 0x229   :  { %v250_v54 = vadd.f32 %v496_v46, %v249_v53 }
 0x22b   :  { %v256_v57 = vmax.f32 %v250_v54, 0.0  ;;  %v499_v54 = vld [vmem:[%s727_s10] ss:$0 sm:$0xff] }
 0x230   :  { %v251_v55 = vpop.f32.mrf.mxu1 }
 0x231   :  { %v252_v56 = vadd.f32 %v496_v46, %v251_v55 }
 0x233   :  { %v257_v58 = vmax.f32 %v252_v56, 0.0 }
 0x235   :  { %v259_v59 = vpack.c.bf16 %v257_v58, %v256_v57 }
 0x237   :  { %479 = vmatmul.msk.bf16.vlgmr.msra.gmra.mxu3 %vm296_vm15, %v259_v59 }
 0x2aa   :  { %v312_v61 = vpop.f32.mrf.mxu2 }
 0x2ab   :  { %v313_v62 = vadd.f32 %v497_v60, %v312_v61 }
 0x2ad   :  { %v322_v63 = vadd.f32 %v313_v62, %v203_v22 }
 0x2af   :  { %v326_v0 = vsel %vm95_vm1, %v322_v63, 0.0 }
 0x2b0   :  { %327 = vadd.xlane.f32.xlu2 %v326_v0 }
 0x2b2   :  { %v314_v1 = vpop.f32.mrf.mxu2 }
 0x2b3   :  { %v315_v2 = vadd.f32 %v497_v60, %v314_v1 }
 0x2b5   :  { %v323_v3 = vadd.f32 %v315_v2, %v643_v23 }
 0x2b7   :  { %v329_v4 = vsel %vm95_vm1, %v323_v3, 0.0 }
 0x2b8   :  { %330 = vadd.xlane.f32.xlu0 %v329_v4 }
 0x2ba   :  { %v317_v5 = vpop.f32.mrf.mxu3 }
 0x2bb   :  { %v318_v6 = vadd.f32 %v497_v60, %v317_v5 }
 0x2bd   :  { %v324_v7 = vadd.f32 %v318_v6, %v205_v39 }
 0x2bf   :  { %v332_v8 = vsel %vm95_vm1, %v324_v7, 0.0 }
 0x2c0   :  { %333 = vadd.xlane.f32.xlu1 %v332_v8 }
 0x2c2   :  { %v319_v9 = vpop.f32.mrf.mxu3 }
 0x2c3   :  { %v320_v10 = vadd.f32 %v497_v60, %v319_v9 }
 0x2c5   :  { %v325_v11 = vadd.f32 %v320_v10, %v206_v40 }
 0x2c7   :  { %v335_v12 = vsel %vm95_vm1, %v325_v11, 0.0 }
 0x2c8   :  { %336 = vadd.xlane.f32.xlu2 %v335_v12 }
 0x323   :  { %v328_v13 = vpop.xlane.xlu2 %327 }
 0x324   :  { %v338_v14 = vmul.f32 %v328_v13, %v604_v25 }
 0x326   :  { %v342_v15 = vsub.f32 %v322_v63, %v338_v14 }
 0x328   :  { %v346_v16 = vmul.f32 %v342_v15, %v342_v15 }
 0x32a   :  { %v350_v17 = vsel %vm95_vm1, %v346_v16, 0.0 }
 0x32b   :  { %351 = vadd.xlane.f32.xlu0 %v350_v17  ;;  %v331_v18 = vpop.xlane.xlu0 %330 }
 0x32c   :  { %v339_v19 = vmul.f32 %v331_v18, %v604_v25 }
 0x32e   :  { %v343_v20 = vsub.f32 %v323_v3, %v339_v19 }
 0x330   :  { %v347_v21 = vmul.f32 %v343_v20, %v343_v20 }
 0x332   :  { %v353_v22 = vsel %vm95_vm1, %v347_v21, 0.0 }
 0x333   :  { %354 = vadd.xlane.f32.xlu1 %v353_v22  ;;  %v334_v23 = vpop.xlane.xlu1 %333 }
 0x334   :  { %v340_v24 = vmul.f32 %v334_v23, %v604_v25 }
 0x336   :  { %v678_v26 = vsub.f32 %v324_v7, %v340_v24 }
 0x338   :  { %v348_v27 = vmul.f32 %v678_v26, %v678_v26 }
 0x33a   :  { %v356_v28 = vsel %vm95_vm1, %v348_v27, 0.0 }
 0x33b   :  { %v337_v29 = vpop.xlane.xlu2 %336  ;;  %357 = vadd.xlane.f32.xlu2 %v356_v28 }
 0x33c   :  { %v341_v30 = vmul.f32 %v337_v29, %v604_v25 }
 0x33e   :  { %v684_v31 = vsub.f32 %v325_v11, %v341_v30 }
 0x340   :  { %v349_v32 = vmul.f32 %v684_v31, %v684_v31 }
 0x342   :  { %v359_v33 = vsel %vm95_vm1, %v349_v32, 0.0 }
 0x343   :  { %360 = vadd.xlane.f32.xlu0 %v359_v33 }
 0x39e   :  { %v352_v34 = vpop.xlane.xlu0 %351 }
 0x39f   :  { %v362_v35 = vmul.f32 %v352_v34, %v604_v25 }
 0x3a1   :  { %v366_v36 = vadd.f32 1e-05, %v362_v35 }
 0x3a3   :  { %510 = vrsqrt.f32 %v366_v36  ;;  %vm376_vm2 = vweird.f32 %v366_v36 }
 0x3a6   :  { %v355_v37 = vpop.xlane.xlu1 %354 }
 0x3a7   :  { %v363_v39 = vmul.f32 %v355_v37, %v604_v25 }
 0x3a9   :  { %v511_v40 = vpop.eup %510  ;;  %v367_v41 = vadd.f32 1e-05, %v363_v39 }
 0x3aa   :  { %v371_v42 = vmul.f32 %v511_v40, %v366_v36  ;;  %vm377_vm0 = vweird.f32 %v511_v40 }
 0x3ab   :  { %512 = vrsqrt.f32 %v367_v41  ;;  %vm378_vm3 = vmor %vm376_vm2, %vm377_vm0  ;;  %vm386_vm5 = vweird.f32 %v367_v41 }
 0x3ac   :  { %v372_v38 = vmul.f32 %v511_v40, %v371_v42 }
 0x3ae   :  { %v373_v43 = vmul.f32 0.5, %v372_v38  ;;  %v358_v44 = vpop.xlane.xlu2 %357 }
 0x3af   :  { %v364_v45 = vmul.f32 %v358_v44, %v604_v25 }
 0x3b0   :  { %v374_v46 = vsub.f32 1.5, %v373_v43 }
 0x3b1   :  { %v513_v47 = vpop.eup %512  ;;  %v368_v48 = vadd.f32 1e-05, %v364_v45 }
 0x3b2   :  { %v375_v49 = vmul.f32 %v511_v40, %v374_v46  ;;  %v381_v50 = vmul.f32 %v513_v47, %v367_v41  ;;  %vm387_vm4 = vweird.f32 %v513_v47 }
 0x3b3   :  { %514 = vrsqrt.f32 %v368_v48  ;;  %vm388_vm6 = vmor %vm386_vm5, %vm387_vm4  ;;  %vm396_vm8 = vweird.f32 %v368_v48 }
 0x3b4   :  { %v379_v52 = vsel %vm378_vm3, %v511_v40, %v375_v49  ;;  %v382_v53 = vmul.f32 %v513_v47, %v381_v50 }
 0x3b5   :  { %v410_v55 = vmul.f32 %v379_v52, %v342_v15 }
 0x3b6   :  { %v383_v56 = vmul.f32 0.5, %v382_v53  ;;  %v361_v57 = vpop.xlane.xlu0 %360 }
 0x3b7   :  { %v418_v58 = vmul.f32 %v498_v51, %v410_v55  ;;  %v365_v59 = vmul.f32 %v361_v57, %v604_v25 }
 0x3b8   :  { %v384_v60 = vsub.f32 1.5, %v383_v56 }
 0x3b9   :  { %v515_v61 = vpop.eup %514  ;;  %v426_v62 = vadd.f32 %v499_v54, %v418_v58  ;;  %v369_v63 = vadd.f32 1e-05, %v365_v59 }
 0x3ba   :  { %v385_v0 = vmul.f32 %v513_v47, %v384_v60  ;;  %v391_v1 = vmul.f32 %v515_v61, %v368_v48  ;;  %vm397_vm7 = vweird.f32 %v515_v61 }
 0x3bb   :  { %430 = vst.msk [vmem:[%s728_s11] sm:$0xff] %vm95_vm1, %v426_v62  ;;  %516 = vrsqrt.f32 %v369_v63  ;;  %vm398_vm9 = vmor %vm396_vm8, %vm397_vm7  ;;  %vm406_vm11 = vweird.f32 %v369_v63 }
 0x3bc   :  { %v389_v2 = vsel %vm388_vm6, %v513_v47, %v385_v0  ;;  %v392_v3 = vmul.f32 %v515_v61, %v391_v1 }
 0x3bd   :  { %v411_v4 = vmul.f32 %v389_v2, %v343_v20 }
 0x3be   :  { %v393_v5 = vmul.f32 0.5, %v392_v3 }
 0x3bf   :  { %v419_v25 = vmul.f32 %v498_v51, %v411_v4 }
 0x3c0   :  { %v394_v6 = vsub.f32 1.5, %v393_v5 }
 0x3c1   :  { %v517_v7 = vpop.eup %516  ;;  %v427_v8 = vadd.f32 %v499_v54, %v419_v25 }
 0x3c2   :  { %v395_v9 = vmul.f32 %v515_v61, %v394_v6  ;;  %v401_v10 = vmul.f32 %v517_v7, %v369_v63  ;;  %vm407_vm10 = vweird.f32 %v517_v7 }
 0x3c3   :  { %431 = vst.msk [vmem:[%s728_s11 + $0x8] sm:$0xff] %vm95_vm1, %v427_v8  ;;  %vm408_vm12 = vmor %vm406_vm11, %vm407_vm10 }
 0x3c4   :  { %v399_v11 = vsel %vm398_vm9, %v515_v61, %v395_v9  ;;  %v402_v12 = vmul.f32 %v517_v7, %v401_v10 }
 0x3c5   :  { %v412_v13 = vmul.f32 %v399_v11, %v678_v26 }
 0x3c6   :  { %v403_v14 = vmul.f32 0.5, %v402_v12 }
 0x3c7   :  { %v420_v15 = vmul.f32 %v498_v51, %v412_v13 }
 0x3c8   :  { %v404_v16 = vsub.f32 1.5, %v403_v14 }
 0x3c9   :  { %v428_v17 = vadd.f32 %v499_v54, %v420_v15 }
 0x3ca   :  { %v405_v18 = vmul.f32 %v517_v7, %v404_v16 }
 0x3cb   :  { %432 = vst.msk [vmem:[%s728_s11 + $0x10] sm:$0xff] %vm95_vm1, %v428_v17 }
 0x3cc   :  { %v409_v19 = vsel %vm408_vm12, %v517_v7, %v405_v18 }
 0x3cd   :  { %v413_v20 = vmul.f32 %v409_v19, %v684_v31 }
 0x3cf   :  { %v421_v21 = vmul.f32 %v498_v51, %v413_v20 }
 0x3d1   :  { %v429_v22 = vadd.f32 %v499_v54, %v421_v21 }
 0x3d3   :  { %433 = vst.msk [vmem:[%s728_s11 + $0x18] sm:$0xff] %vm95_vm1, %v429_v22 }

// kernel: decoder_layer_forward.4
= control target key start
LH: loop header
LB: loop body
LE: loop exit
PB: predicated region body
PF: predicated region fallthrough
CT: control target
= control target key end

     0   :  { %vm34_vm0 = vcmask 261120   ;;  %vm64_vm1 = vcmask 388096   ;;  %s132_s1 = inlined_call_operand.vmem [shape: bf16[32,48], index: 1, kind: input, shape index: {}]   ;;  %s133_s0 = inlined_call_operand.vmem [shape: f32[32,32], index: 0, kind: input, shape index: {}]   ;;  %s134_s2 = inlined_call_operand.vmem [shape: bf16[32,48], index: 2, kind: output, shape index: {}]  }
   0x1   :  { %v84_v0 = vld [vmem:[%s132_s1 + $0x8] sm:$0xff]  ;;  %v83_v1 = vld [vmem:[%s132_s1] sm:$0xff]  ;;  %v14_v4 = vld [vmem:[%s133_s0 + $0x10] sm:$0xff] }
   0x2   :  { %v12_v2 = vld [vmem:[%s133_s0] sm:$0xff]  ;;  %47 = vmatpush.bf16.msra.mxu0 %v84_v0  ;;  %85 = vmatpush.bf16.msra.mxu1 %v84_v0  ;;  %v13_v3 = vld [vmem:[%s133_s0 + $0x8] sm:$0xff]  ;;  %v15_v5 = vld [vmem:[%s133_s0 + $0x18] sm:$0xff] }
   0x3   :  { %v16_v6 = vpack.c.bf16 %v13_v3, %v12_v2  ;;  %v17_v7 = vpack.c.bf16 %v15_v5, %v14_v4 }
   0x6   :  { %48 = vmatpush.bf16.msra.mxu0 %v83_v1  ;;  %86 = vmatpush.bf16.msra.mxu1 %v83_v1 }
   0x9   :  { %81 = vmatmul.msk.bf16.vlgmr.msra.gmra.mxu0 %vm34_vm0, %v16_v6  ;;  %82 = vmatmul.msk.bf16.vlgmr.msra.gmra.mxu1 %vm34_vm0, %v17_v7 }
  0x86   :  { %v50_v8 = vpop.f32.mrf.mxu0  ;;  %v55_v9 = vpop.f32.mrf.mxu1 }
  0x87   :  { %v60_v10 = vpack.c.bf16 %v50_v8, %v50_v8  ;;  %v62_v11 = vpack.c.bf16 %v55_v9, %v55_v9 }
  0x89   :  { %65 = vst.msk [vmem:[%s134_s2] sm:$0xf] %vm64_vm1, %v60_v10 }
  0x8a   :  { %67 = vst.msk [vmem:[%s134_s2 + $0x8] sm:$0xf] %vm64_vm1, %v62_v11 }
  0x8e   :  { %v52_v12 = vpop.f32.mrf.mxu0  ;;  %v57_v13 = vpop.f32.mrf.mxu1 }
  0x8f   :  { %v61_v14 = vpack.c.bf16 %v52_v12, %v52_v12  ;;  %v63_v15 = vpack.c.bf16 %v57_v13, %v57_v13 }
  0x91   :  { %66 = vst.msk [vmem:[%s134_s2 + $0x4] sm:$0xf] %vm64_vm1, %v61_v14 }
  0x92   :  { %68 = vst.msk [vmem:[%s134_s2 + $0xc] sm:$0xf] %vm64_vm1, %v63_v15 }

// kernel: decoder_layer_forward.5
= control target key start
LH: loop header
LB: loop body
LE: loop exit
PB: predicated region body
PF: predicated region fallthrough
CT: control target
= control target key end

     0   :  { %7 = vsyncpa [#allocation3], 0  ;;  %s115_s12 = smov [#allocation2]   ;;  %s116_s14 = smov 128   ;;  %s148_s0 = inlined_call_operand.hbm [shape: f32[16,32], index: 0, kind: input, shape index: {}]   ;;  %s149_s1 = inlined_call_operand.vmem [shape: bf16[32,16], index: 1, kind: input, shape index: {}]   ;;  %s150_s2 = inlined_call_operand.vmem [shape: bf16[16,16], index: 2, kind: output, shape index: {}]  }
   0x1   :  { %s12_s11 = sshll.u32 %s148_s0, 4  ;;  %s14_s13 = sshll.u32 %s115_s12, 4  ;;  %s13_s11 = int_to_ptr.hbm [resolvable:$true] %s12_s11  ;;  %s15_s13 = int_to_ptr.vmem [resolvable:$true] %s14_s13 }
   0x2   :  { %s117_s15 = smov 8  }
   0x3   :  { %20 = dma.hbm_to_vmem [thread:$0]  %s13_s11, 256, %s15_s13, [#allocation3], %s116_s14, %s116_s14, %s117_s15  }
   0x4   :  { %113 = dma.done.wait [#allocation3], 256  }
   0x5   :  { %114 = vsyncadd [#allocation3], 4294967040  ;;  %v85_v0 = vld [vmem:[%s149_s1 + $0x8] sm:$0xff]  ;;  %v84_v1 = vld [vmem:[%s149_s1] sm:$0xff]  ;;  %vm47_vm0 = vcmask 261120   ;;  %vm67_vm1 = vcmask 125952  }
   0x6   :  { %57 = vmatpush.bf16.msra.mxu0 %v85_v0  ;;  %v28_v2 = vld [vmem:[#allocation2] sm:$0xff]  ;;  %v29_v3 = vld [vmem:[#allocation2 + $0x8] sm:$0xff] }
   0x7   :  { %v30_v4 = vpack.c.bf16 %v29_v3, %v28_v2 }
   0xa   :  { %58 = vmatpush.bf16.msra.mxu0 %v84_v1 }
   0xd   :  { %83 = vmatmul.msk.bf16.vlgmr.msra.gmra.mxu0 %vm47_vm0, %v30_v4 }
  0x8a   :  { %v60_v5 = vpop.f32.mrf.mxu0 }
  0x8b   :  { %v65_v6 = vpack.c.bf16 %v60_v5, %v60_v5 }
  0x8d   :  { %68 = vst.msk [vmem:[%s150_s2] sm:$0xf] %vm67_vm1, %v65_v6 }
  0x92   :  { %v62_v7 = vpop.f32.mrf.mxu0 }
  0x93   :  { %v66_v8 = vpack.c.bf16 %v62_v7, %v62_v7 }
  0x95   :  { %69 = vst.msk [vmem:[%s150_s2 + $0x4] sm:$0xf] %vm67_vm1, %v66_v8 }
  0x96   :  { %74 = vsyncpa [#allocation3], 1 }

// kernel: decoder_layer_forward.6
= control target key start
LH: loop header
LB: loop body
LE: loop exit
PB: predicated region body
PF: predicated region fallthrough
CT: control target
= control target key end

     0   :  { %s1010_s18 = smov 0   ;;  %s1012_s19 = smov 0   ;;  %s1265_s0 = inlined_call_operand.vmem [shape: bf16[2,16,48], index: 0, kind: input, shape index: {}, may-alias: {0,1}]   ;;  %s1266_s1 = inlined_call_operand.vmem [shape: bf16[2,16,48], index: 1, kind: input, shape index: {}, may-alias: {0,1}]   ;;  %s1267_s2 = inlined_call_operand.vmem [shape: bf16[16,16], index: 2, kind: input, shape index: {}]   ;;  %s1268_s3 = inlined_call_operand.vmem [shape: f32[1,16], index: 3, kind: input, shape index: {}]   ;;  %s1269_s4 = inlined_call_operand.vmem [shape: f32[1,16], index: 4, kind: input, shape index: {}]   ;;  %s1270_s5 = inlined_call_operand.vmem [shape: bf16[2,16,16], index: 5, kind: output, shape index: {}]  }
   0x1   :  { %s1014_s20 = smov 0  }
   0x2 LB: > { %s27_s21 = sadd.s32 1, %s962_s19  ;;  %p844_p0 = scmp.ge.s32.totalorder %s966_s20, 1  ;;  %s966_s20 = sphi %s1014_s20, %s15_s20   ;;  %s962_s19 = sphi %s1012_s19, %s1276_s19   ;;  %s958_s18 = sphi %s1010_s18, %s1275_s18  }
   0x3   : > { %p29_p1 = scmp.ge.s32.totalorder %s27_s21, 2  ;;  %p218_p2 = scmp.lt.s32.totalorder %s966_s20, 3 }
   0x5   : > { %s1278_s21 = smov (%p29_p1, %s27_s21), 0  ;;  %p219_p3 = pnand %p844_p0, %p218_p2 }
   0x6   : > { %p260_p4 = scmp.lt.s32.totalorder (!%p219_p3), %s958_s18, 1  ;;  %s968_s8 = smov (!%p219_p3), 112  }
   0x7   : > { %222 = sbr.rel (%p219_p3) target bundleno = 1776 (0x6f0), region = 40  ;;  %s969_s9 = smov (!%p219_p3), 127  }
   0x8   : > { %s970_s10 = smov (!%p219_p3), 15   ;;  %s971_s11 = smov (!%p219_p3), 126  }
   0x9   : > { %s972_s12 = smov (!%p219_p3), 14   ;;  %s973_s15 = smov (!%p219_p3), 120  }
   0xa   : > { %s974_s16 = smov (!%p219_p3), 124   ;;  %s975_s17 = smov (!%p219_p3), 12  }
   0xb   : > { %s976_s23 = smov (!%p219_p3), 8   ;;  %s977_s25 = smov (!%p219_p3), 96  }
   0xc   : > { %v879_v0 = vld [vmem:[%s1267_s2] sm:$0xff]  ;;  %vm325_vm0 = vcmask 64512   ;;  %s1280_s18 = smov (!%p260_p4, %s958_s18), 1  ;;  %v286_v14 = vlaneseq  ;;  %vm360_vm1 = vcmask 121856   ;;  %vm387_vm4 = vcmask 113664   ;;  %s978_s26 = smov 104  }
   0xd   : > { %v330_v1 = vsel %vm325_vm0, %v879_v0, 0  ;;  %s1032_s24 = sshll.u32 %s1280_s18, 3  ;;  %v926_v2 = vld [vmem:[%s1269_s4] ss:$0 sm:$0xff]  ;;  %vm416_vm7 = vcmask 97280   ;;  %vm488_vm12 = vcmask 130048  }
   0xe   : > { %339 = vmatpush.bf16.xpose.msra.mxu0 %v330_v1  ;;  %s267_s27 = scalar_lea.vmem %s1265_s0, %s1032_s24  ;;  %s1045_s7 = scalar_lea.vmem %s1266_s1, %s1032_s24  ;;  %v1066_v15 = vshrl.u32 %v286_v14, 7  ;;  %v881_v31 = vld [vmem:[%s1267_s2] sm:$0xff]  ;;  %v1155_v1 = vand.u32 127, %v286_v14  ;;  %vm534_vm15 = vcmask 60416  }
   0xf   : > { %v1047_v3 = vld [vmem:[%s267_s27] sm:$0xff]   ;;  %s1216_s29 = scalar_lea.vmem %s1270_s5, %s1032_s24  ;;  %s979_s24 = smov 88  }
  0x10   : > { %v1050_v4 = vld [vmem:[%s1045_s7] sm:$0xff]  ;;  %v884_v5 = vunpack.c.l.bf16 %v1047_v3  ;;  %v885_v6 = vunpack.c.h.bf16 %v1047_v3  ;;  %v1069_v16 = vadd.s32 8, %v1066_v15  ;;  %v1080_v20 = vsub.s32 15, %v1066_v15 }
  0x11   : > { %464 = vrot.lane.b32.xlu0 %v1050_v4, %s968_s8  ;;  %v927_v44 = vld [vmem:[%s1268_s3] ss:$0 sm:$0xff]  ;;  %vm294_vm11 = vcmp.gt.s32.totalorder %v1155_v1, %v1066_v15 }
  0x12   : > { %v317_v7 = vadd.f32 %v926_v2, %v884_v5  ;;  %v318_v8 = vadd.f32 %v926_v2, %v885_v6  ;;  %v1072_v17 = vsub.s32 15, %v1069_v16  ;;  %v363_v25 = vand.u32 1, %v1080_v20 }
  0x13   : > { %v390_v35 = vshra.s32 %v1080_v20, 1  ;;  %v311_v45 = vadd.f32 %v927_v44, %v884_v5  ;;  %v312_v46 = vadd.f32 %v927_v44, %v885_v6  ;;  %v419_v52 = vshra.s32 %v1080_v20, 2 }
  0x14   : > { %v319_v9 = vpack.c.bf16 %v318_v8, %v317_v7  ;;  %v364_v18 = vand.u32 1, %v1072_v17  ;;  %vm1087_vm3 = vcmp.eq.s32.totalorder %v363_v25, 1  ;;  %v391_v33 = vshra.s32 %v1072_v17, 1 }
  0x15   : > { %v1110_v40 = vand.u32 1, %v390_v35  ;;  %v1127_v47 = vpack.c.bf16 %v312_v46, %v311_v45  ;;  %v1134_v53 = vand.u32 1, %v419_v52  ;;  %v420_v54 = vshra.s32 %v1072_v17, 2 }
  0x16   : > { %855 = vmatmul.msk.bf16.vlgmr.msra.gmra.mxu0 %vm325_vm0, %v319_v9  ;;  %vm1075_vm2 = vcmp.eq.s32.totalorder %v364_v18, 1  ;;  %v1102_v34 = vand.u32 1, %v391_v33  ;;  %v447_v63 = vshra.s32 %v1080_v20, 3  ;;  %v448_v3 = vshra.s32 %v1072_v17, 3 }
  0x17   : > { %vm394_vm6 = vcmp.eq.s32.totalorder %v1110_v40, 1  ;;  %vm423_vm8 = vcmp.eq.s32.totalorder %v1134_v53, 1  ;;  %v1143_v59 = vand.u32 1, %v420_v54  ;;  %vm295_vm14 = vcmp.gt.s32.totalorder %v1155_v1, %v1069_v16 }
  0x18   : > { %vm395_vm5 = vcmp.eq.s32.totalorder %v1102_v34, 1  ;;  %v1152_v0 = vand.u32 1, %v447_v63 }
  0x19   : > { %vm424_vm9 = vcmp.eq.s32.totalorder %v1143_v59, 1 }
  0x1a   : > { %vm451_vm10 = vcmp.eq.s32.totalorder %v1152_v0, 1 }
  0x83   : > { %v465_v12 = vpop.permute.xlu0 %464 }
  0x84   : > { %v470_v13 = vsel %vm325_vm0, %v465_v12, 0 }
  0x85   : > { %479 = vmatpush.bf16.xpose.msra.mxu1 %v470_v13 }
  0x8c   : > { %860 = vmatmul.msk.bf16.vlgmr.msra.gmra.mxu1 %vm325_vm0, %v1127_v47 }
  0x93   : > { %v341_v10 = vpop.f32.mrf.mxu0 }
  0x94   : > { %348 = vrot.lane.b32.xlu0 %v341_v10, %s969_s9 }
  0x9b   : > { %v343_v11 = vpop.f32.mrf.mxu0 }
  0x9c   : > { %356 = vrot.lane.b32.xlu2 %v343_v11, %s970_s10  ;;  %350 = vrot.lane.b32.xlu1 %v343_v11, %s969_s9 }
  0xa4   : > { %354 = vrot.lane.b32.xlu1 %v341_v10, %s970_s10 }
  0xf6   : > { %v357_v21 = vpop.permute.xlu2 %356 }
 0x106   : > { %v349_v27 = vpop.permute.xlu0 %348 }
 0x109   : > { %v481_v2 = vpop.f32.mrf.mxu1 }
 0x10e   : > { %v351_v22 = vpop.permute.xlu1 %350 }
 0x10f   : > { %v362_v23 = vsel %vm360_vm1, %v351_v22, %v357_v21 }
 0x110   : > { %v372_v24 = vsel %vm1075_vm2, %v362_v23, %v343_v11 }
 0x111   : > { %377 = vrot.lane.b32.xlu0 %v372_v24, %s971_s11  ;;  %v483_v18 = vpop.f32.mrf.mxu1 }
 0x116   : > { %v355_v28 = vpop.permute.xlu1 %354 }
 0x117   : > { %v361_v29 = vsel %vm360_vm1, %v349_v27, %v355_v28 }
 0x118   : > { %v371_v30 = vsel %vm1087_vm3, %v361_v29, %v341_v10  ;;  %v1164_v10 = vand.u32 1, %v448_v3 }
 0x119   : > { %381 = vrot.lane.b32.xlu1 %v371_v30, %s972_s12  ;;  %375 = vrot.lane.b32.xlu2 %v371_v30, %s971_s11 }
 0x11a   : > { %559 = vrot.lane.b32.xlu0 %v881_v31, %s973_s15  ;;  %vm452_vm13 = vcmp.eq.s32.totalorder %v1164_v10, 1 }
 0x121   : > { %383 = vrot.lane.b32.xlu2 %v372_v24, %s972_s12 }
 0x173   : > { %v376_v32 = vpop.permute.xlu2 %375 }
 0x17b   : > { %v384_v36 = vpop.permute.xlu2 %383 }
 0x183   : > { %v378_v37 = vpop.permute.xlu0 %377 }
 0x184   : > { %v389_v38 = vsel %vm387_vm4, %v378_v37, %v384_v36 }
 0x185   : > { %v401_v39 = vsel %vm395_vm5, %v389_v38, %v372_v24  ;;  %v1189_v38 = vld [vmem:[%s1045_s7] sm:$0xff] }
 0x186   : > { %406 = vrot.lane.b32.xlu2 %v401_v39, %s974_s16 }
 0x18b   : > { %v382_v41 = vpop.permute.xlu1 %381 }
 0x18c   : > { %v388_v42 = vsel %vm387_vm4, %v376_v32, %v382_v41  ;;  %v560_v48 = vpop.permute.xlu0 %559 }
 0x18d   : > { %v400_v43 = vsel %vm394_vm6, %v388_v42, %v371_v30  ;;  %v565_v49 = vsel %vm325_vm0, %v560_v48, 0 }
 0x18e   : > { %410 = vrot.lane.b32.xlu0 %v400_v43, %s975_s17  ;;  %404 = vrot.lane.b32.xlu1 %v400_v43, %s974_s16 }
 0x18f   : > { %552 = vrot.lane.b32.xlu2 %v319_v9, %s973_s15  ;;  %574 = vmatpush.bf16.xpose.msra.mxu3 %v565_v49 }
 0x196   : > { %412 = vrot.lane.b32.xlu1 %v401_v39, %s975_s17 }
 0x1e0   : > { %v407_v50 = vpop.permute.xlu2 %406 }
 0x1e9   : > { %v553_v51 = vpop.permute.xlu2 %552 }
 0x1ea   : > { %866 = vmatmul.msk.bf16.vlgmr.msra.gmra.mxu3 %vm325_vm0, %v553_v51 }
 0x200   : > { %v411_v55 = vpop.permute.xlu0 %410  ;;  %v405_v56 = vpop.permute.xlu1 %404 }
 0x201   : > { %v417_v57 = vsel %vm416_vm7, %v405_v56, %v411_v55 }
 0x202   : > { %v429_v58 = vsel %vm423_vm8, %v417_v57, %v400_v43 }
 0x203   : > { %433 = vrot.lane.b32.xlu0 %v429_v58, %s973_s15  ;;  %439 = vrot.lane.b32.xlu2 %v429_v58, %s976_s23 }
 0x208   : > { %v413_v60 = vpop.permute.xlu1 %412 }
 0x209   : > { %v418_v61 = vsel %vm416_vm7, %v407_v50, %v413_v60 }
 0x20a   : > { %v430_v62 = vsel %vm424_vm9, %v418_v61, %v401_v39 }
 0x20b   : > { %441 = vrot.lane.b32.xlu0 %v430_v62, %s976_s23  ;;  %435 = vrot.lane.b32.xlu1 %v430_v62, %s973_s15 }
 0x25d   : > { %v440_v5 = vpop.permute.xlu2 %439 }
 0x26d   : > { %v576_v24 = vpop.f32.mrf.mxu3 }
 0x275   : > { %v434_v6 = vpop.permute.xlu0 %433  ;;  %v578_v25 = vpop.f32.mrf.mxu3 }
 0x276   : > { %v445_v7 = vsel %vm325_vm0, %v434_v6, %v440_v5 }
 0x277   : > { %v457_v8 = vsel %vm451_vm10, %v445_v7, %v429_v58 }
 0x278   : > { %v482_v9 = vadd.f32 %v481_v2, %v457_v8 }
 0x27a   : > { %v486_v11 = vsel %vm294_vm11, -1e+30, %v482_v9 }
 0x27b   : > { %v489_v12 = vsel %vm488_vm12, %v486_v11, -inf }
 0x27c   : > { %490 = vmax.xlane.f32.xlu1 %v489_v12 }
 0x27d   : > { %v442_v13 = vpop.permute.xlu0 %441  ;;  %v436_v14 = vpop.permute.xlu1 %435 }
 0x27e   : > { %v446_v17 = vsel %vm325_vm0, %v436_v14, %v442_v13 }
 0x27f   : > { %v458_v20 = vsel %vm452_vm13, %v446_v17, %v430_v62 }
 0x280   : > { %v484_v21 = vadd.f32 %v483_v18, %v458_v20 }
 0x282   : > { %v487_v22 = vsel %vm295_vm14, -1e+30, %v484_v21 }
 0x283   : > { %v492_v23 = vsel %vm488_vm12, %v487_v22, -inf }
 0x284   : > { %493 = vmax.xlane.f32.xlu2 %v492_v23 }
 0x295   : > { %512 = vrot.lane.b32.xlu1 %v1050_v4, %s977_s25 }
 0x29d   : > { %583 = vrot.lane.b32.xlu1 %v576_v24, %s969_s9 }
 0x2a5   : > { %591 = vrot.lane.b32.xlu1 %v578_v25, %s970_s10 }
 0x2ef   : > { %v491_v27 = vpop.xlane.xlu1 %490 }
 0x2f0   : > { %v495_v28 = vsub.f32 %v486_v11, %v491_v27 }
 0x2f2   : > { %v497_v29 = vmul.f32 1.442695, %v495_v28 }
 0x2f4   : > { %928 = vpow2.f32 %v497_v29 }
 0x2f7   : > { %v494_v30 = vpop.xlane.xlu2 %493 }
 0x2f8   : > { %v496_v31 = vsub.f32 %v487_v22, %v494_v30 }
 0x2fa   : > { %v929_v32 = vpop.eup %928  ;;  %v499_v33 = vmul.f32 1.442695, %v496_v31 }
 0x2fb   : > { %v501_v35 = vsel %vm488_vm12, %v929_v32, 0.0 }
 0x2fc   : > { %930 = vpow2.f32 %v499_v33  ;;  %502 = vadd.xlane.f32.xlu0 %v501_v35 }
 0x302   : > { %v931_v4 = vpop.eup %930 }
 0x303   : > { %v504_v36 = vsel %vm488_vm12, %v931_v4, 0.0 }
 0x304   : > { %505 = vadd.xlane.f32.xlu2 %v504_v36 }
 0x307   : > { %v513_v37 = vpop.permute.xlu1 %512 }
 0x308   : > { %525 = vmatpush.bf16.msra.mxu2 %v513_v37 }
 0x30f   : > { %v584_v48 = vpop.permute.xlu1 %583 }
 0x310   : > { %654 = vrot.lane.b32.xlu0 %v1127_v47, %s973_s15 }
 0x317   : > { %v592_v55 = vpop.permute.xlu1 %591 }
 0x318   : > { %585 = vrot.lane.b32.xlu0 %v578_v25, %s969_s9 }
 0x31c   : > { %661 = vrot.lane.b32.xlu2 %v1189_v38, %s978_s26 }
 0x324   : > { %589 = vrot.lane.b32.xlu2 %v576_v24, %s970_s10 }
 0x36f   : > { %v503_v39 = vpop.xlane.xlu0 %502 }
 0x370   : > { %932 = vrcp.f32 %v503_v39 }
 0x376   : > { %v933_v42 = vpop.eup %932 }
 0x377   : > { %v506_v41 = vpop.xlane.xlu2 %505  ;;  %v509_v45 = vmul.f32 %v933_v42, %v929_v32 }
 0x378   : > { %934 = vrcp.f32 %v506_v41 }
 0x37e   : > { %v935_v43 = vpop.eup %934 }
 0x37f   : > { %v662_v44 = vpop.permute.xlu2 %661  ;;  %v510_v46 = vmul.f32 %v935_v43, %v931_v4 }
 0x380   : > { %v667_v47 = vsel %vm325_vm0, %v662_v44, 0 }
 0x381   : > { %676 = vmatpush.bf16.xpose.msrb.mxu2 %v667_v47  ;;  %v511_v49 = vpack.c.bf16 %v510_v46, %v509_v45 }
 0x382   : > { %v655_v50 = vpop.permute.xlu0 %654 }
 0x383   : > { %861 = vmatmul.msk.bf16.vlgmr.msra.gmra.mxu2 %vm488_vm12, %v511_v49 }
 0x387   : > { %v590_v51 = vpop.permute.xlu2 %589 }
 0x388   : > { %v595_v52 = vsel %vm360_vm1, %v584_v48, %v590_v51 }
 0x389   : > { %v597_v54 = vsel %vm1087_vm3, %v595_v52, %v576_v24 }
 0x38a   : > { %v586_v56 = vpop.permute.xlu0 %585  ;;  %607 = vrot.lane.b32.xlu1 %v597_v54, %s972_s12  ;;  %601 = vrot.lane.b32.xlu0 %v597_v54, %s971_s11 }
 0x38b   : > { %v596_v57 = vsel %vm360_vm1, %v586_v56, %v592_v55 }
 0x38c   : > { %v598_v58 = vsel %vm1075_vm2, %v596_v57, %v578_v25 }
 0x38d   : > { %603 = vrot.lane.b32.xlu2 %v598_v58, %s971_s11 }
 0x392   : > { %609 = vrot.lane.b32.xlu0 %v598_v58, %s972_s12 }
 0x393   : > { %871 = vmatmul.msk.bf16.vlgmr.msrb.gmra.mxu2 %vm325_vm0, %v655_v50 }
 0x3e7   : > { %v604_v63 = vpop.permute.xlu2 %603 }
 0x3fc   : > { %v602_v26 = vpop.permute.xlu0 %601  ;;  %v608_v60 = vpop.permute.xlu1 %607 }
 0x3fd   : > { %v613_v61 = vsel %vm387_vm4, %v602_v26, %v608_v60 }
 0x3fe   : > { %v615_v62 = vsel %vm394_vm6, %v613_v61, %v597_v54 }
 0x3ff   : > { %625 = vrot.lane.b32.xlu0 %v615_v62, %s975_s17  ;;  %619 = vrot.lane.b32.xlu2 %v615_v62, %s974_s16 }
 0x404   : > { %v610_v19 = vpop.permute.xlu0 %609 }
 0x405   : > { %v614_v2 = vsel %vm387_vm4, %v604_v63, %v610_v19 }
 0x406   : > { %v527_v3 = vpop.f32.mrf.mxu2  ;;  %v616_v40 = vsel %vm395_vm5, %v614_v2, %v598_v58 }
 0x407   : > { %v532_v5 = vpack.c.bf16 %v527_v3, %v527_v3  ;;  %621 = vrot.lane.b32.xlu1 %v616_v40, %s974_s16  ;;  %627 = vrot.lane.b32.xlu2 %v616_v40, %s975_s17 }
 0x409   : > { %535 = vst.msk [vmem:[%s1216_s29] sm:$0xf] %vm534_vm15, %v532_v5 }
 0x40e   : > { %v529_v6 = vpop.f32.mrf.mxu2 }
 0x40f   : > { %v533_v7 = vpack.c.bf16 %v529_v6, %v529_v6 }
 0x411   : > { %536 = vst.msk [vmem:[%s1216_s29 + $0x4] sm:$0xf] %vm534_vm15, %v533_v7 }
 0x416   : > { %v678_v18 = vpop.f32.mrf.mxu2 }
 0x41e   : > { %v680_v29 = vpop.f32.mrf.mxu2 }
 0x459   : > { %v620_v8 = vpop.permute.xlu2 %619 }
 0x461   : > { %v628_v34 = vpop.permute.xlu2 %627 }
 0x471   : > { %v626_v9 = vpop.permute.xlu0 %625 }
 0x472   : > { %v631_v11 = vsel %vm416_vm7, %v620_v8, %v626_v9 }
 0x473   : > { %v633_v12 = vsel %vm423_vm8, %v631_v11, %v615_v62 }
 0x474   : > { %643 = vrot.lane.b32.xlu2 %v633_v12, %s976_s23  ;;  %637 = vrot.lane.b32.xlu1 %v633_v12, %s973_s15 }
 0x479   : > { %v622_v13 = vpop.permute.xlu1 %621 }
 0x47a   : > { %v632_v14 = vsel %vm416_vm7, %v622_v13, %v628_v34 }
 0x47b   : > { %v634_v17 = vsel %vm424_vm9, %v632_v14, %v616_v40 }
 0x47c   : > { %645 = vrot.lane.b32.xlu1 %v634_v17, %s976_s23  ;;  %639 = vrot.lane.b32.xlu0 %v634_v17, %s973_s15 }
 0x4ce   : > { %v644_v20 = vpop.permute.xlu2 %643 }
 0x4e6   : > { %v638_v21 = vpop.permute.xlu1 %637 }
 0x4e7   : > { %v649_v53 = vsel %vm325_vm0, %v638_v21, %v644_v20 }
 0x4e8   : > { %v651_v22 = vsel %vm451_vm10, %v649_v53, %v633_v12 }
 0x4e9   : > { %v679_v23 = vadd.f32 %v678_v18, %v651_v22 }
 0x4eb   : > { %v683_v24 = vsel %vm294_vm11, -1e+30, %v679_v23 }
 0x4ec   : > { %v685_v59 = vsel %vm488_vm12, %v683_v24, -inf }
 0x4ed   : > { %686 = vmax.xlane.f32.xlu0 %v685_v59 }
 0x4ee   : > { %v640_v25 = vpop.permute.xlu0 %639  ;;  %v646_v27 = vpop.permute.xlu1 %645 }
 0x4ef   : > { %v650_v28 = vsel %vm325_vm0, %v640_v25, %v646_v27  ;;  %vm738_vm0 = vcmask 126016  }
 0x4f0   : > { %v652_v30 = vsel %vm452_vm13, %v650_v28, %v634_v17 }
 0x4f1   : > { %v681_v31 = vadd.f32 %v680_v29, %v652_v30 }
 0x4f3   : > { %v684_v0 = vsel %vm295_vm14, -1e+30, %v681_v31 }
 0x4f4   : > { %v688_v32 = vsel %vm488_vm12, %v684_v0, -inf }
 0x4f5   : > { %689 = vmax.xlane.f32.xlu2 %v688_v32 }
 0x50d   : > { %708 = vrot.lane.b32.xlu2 %v1189_v38, %s979_s24 }
 0x560   : > { %v687_v15 = vpop.xlane.xlu0 %686 }
 0x561   : > { %v691_v33 = vsub.f32 %v683_v24, %v687_v15 }
 0x563   : > { %v693_v35 = vmul.f32 1.442695, %v691_v33 }
 0x565   : > { %936 = vpow2.f32 %v693_v35 }
 0x568   : > { %v690_v4 = vpop.xlane.xlu2 %689 }
 0x569   : > { %v692_v36 = vsub.f32 %v684_v0, %v690_v4 }
 0x56b   : > { %v937_v37 = vpop.eup %936  ;;  %v695_v10 = vmul.f32 1.442695, %v692_v36 }
 0x56c   : > { %v697_v39 = vsel %vm488_vm12, %v937_v37, 0.0 }
 0x56d   : > { %938 = vpow2.f32 %v695_v10  ;;  %698 = vadd.xlane.f32.xlu1 %v697_v39 }
 0x570   : > { %v709_v41 = vpop.permute.xlu2 %708 }
 0x571   : > { %721 = vmatpush.bf16.msrb.mxu0 %v709_v41 }
 0x573   : > { %v939_v16 = vpop.eup %938 }
 0x574   : > { %v700_v1 = vsel %vm488_vm12, %v939_v16, 0.0 }
 0x575   : > { %701 = vadd.xlane.f32.xlu0 %v700_v1 }
 0x5e0   : > { %v699_v42 = vpop.xlane.xlu1 %698 }
 0x5e1   : > { %940 = vrcp.f32 %v699_v42 }
 0x5e7   : > { %v941_v43 = vpop.eup %940 }
 0x5e8   : > { %v702_v38 = vpop.xlane.xlu0 %701  ;;  %v705_v45 = vmul.f32 %v941_v43, %v937_v37 }
 0x5e9   : > { %942 = vrcp.f32 %v702_v38 }
 0x5ef   : > { %v943_v44 = vpop.eup %942 }
 0x5f0   : > { %v706_v46 = vmul.f32 %v943_v44, %v939_v16 }
 0x5f2   : > { %v707_v48 = vpack.c.bf16 %v706_v46, %v705_v45 }
 0x5f4   : > { %872 = vmatmul.msk.bf16.vlgmr.msrb.gmra.mxu0 %vm488_vm12, %v707_v48 }
 0x671   : > { %v723_v47 = vpop.f32.mrf.mxu0 }
 0x672   : > { %v728_v49 = vpack.c.bf16 %v723_v47, %v723_v47 }
 0x674   : > { %732 = vrot.lane.b32.xlu1 %v728_v49, %s976_s23 }
 0x679   : > { %v725_v50 = vpop.f32.mrf.mxu0 }
 0x67a   : > { %v729_v51 = vpack.c.bf16 %v725_v50, %v725_v50 }
 0x67c   : > { %734 = vrot.lane.b32.xlu0 %v729_v51, %s976_s23 }
 0x6e6   : > { %v733_v52 = vpop.permute.xlu1 %732 }
 0x6e7   : > { %739 = vst.msk [vmem:[%s1216_s29] sm:$0xf] %vm738_vm0, %v733_v52 }
 0x6ee   : > { %v735_v54 = vpop.permute.xlu0 %734 }
 0x6ef   : > { %740 = vst.msk [vmem:[%s1216_s29 + $0x4] sm:$0xf] %vm738_vm0, %v735_v54 }
 0x6f0 PF: > { %s15_s20 = sadd.s32 1, %s966_s20   ;;  %s1275_s18 = smov %s962_s19 }
 0x6f1   : > { %p12_p5 = scmp.ge.s32.totalorder %s15_s20, 4   ;;  %s1276_s19 = smov %s1278_s21 }
 0x6f3   :  { %14 = sbr.rel (!%p12_p5) target bundleno = 2 (0x2), region = 73 }

// kernel: decoder_layer_forward.7
= control target key start
LH: loop header
LB: loop body
LE: loop exit
PB: predicated region body
PF: predicated region fallthrough
CT: control target
= control target key end

     0   :  { %vm61_vm0 = vcmask 130048   ;;  %vm95_vm1 = vcmask 261120   ;;  %v518_v19 = vmov 32.0   ;;  %vm296_vm15 = vcmask 523264   ;;  %s717_s2 = inlined_call_operand.vmem [shape: bf16[16,32], index: 2, kind: input, shape index: {}]   ;;  %s718_s0 = inlined_call_operand.vmem [shape: bf16[32,16], index: 0, kind: input, shape index: {}]   ;;  %s719_s1 = inlined_call_operand.vmem [shape: f32[32,32], index: 1, kind: input, shape index: {}]   ;;  %s720_s3 = inlined_call_operand.vmem [shape: f32[1,32], index: 3, kind: input, shape index: {}]   ;;  %s721_s4 = inlined_call_operand.vmem [shape: f32[1,32], index: 4, kind: input, shape index: {}]   ;;  %s722_s6 = inlined_call_operand.vmem [shape: f32[1,64], index: 6, kind: input, shape index: {}]   ;;  %s723_s5 = inlined_call_operand.vmem [shape: bf16[32,64], index: 5, kind: input, shape index: {}]   ;;  %s724_s8 = inlined_call_operand.vmem [shape: f32[1,32], index: 8, kind: input, shape index: {}]   ;;  %s725_s7 = inlined_call_operand.vmem [shape: bf16[64,32], index: 7, kind: input, shape index: {}]   ;;  %s726_s9 = inlined_call_operand.vmem [shape: f32[1,32], index: 9, kind: input, shape index: {}]   ;;  %s727_s10 = inlined_call_operand.vmem [shape: f32[1,32], index: 10, kind: input, shape index: {}]   ;;  %s728_s11 = inlined_call_operand.vmem [shape: f32[32,32], index: 11, kind: output, shape index: {}]  }
   0x1   :  { %v482_v0 = vld [vmem:[%s717_s2] sm:$0xff]  ;;  %v481_v2 = vld [vmem:[%s718_s0 + $0x8] sm:$0xff]  ;;  %v89_v11 = vld [vmem:[%s719_s1 + $0x10] sm:$0xff]  ;;  %500 = vrcp.f32 %v518_v19 }
   0x2   :  { %v480_v1 = vld [vmem:[%s718_s0] sm:$0xff]  ;;  %75 = vmatpush.bf16.msra.mxu0 %v482_v0  ;;  %v88_v7 = vld [vmem:[%s719_s1 + $0x8] sm:$0xff]  ;;  %v90_v15 = vld [vmem:[%s719_s1 + $0x18] sm:$0xff] }
   0x3   :  { %v87_v3 = vld [vmem:[%s719_s1] sm:$0xff]  ;;  %v484_v46 = vld [vmem:[%s723_s5 + $0x8] sm:$0xff] }
   0x4   :  { %241 = vmatpush.bf16.msra.mxu1 %v484_v46  ;;  %v483_v49 = vld [vmem:[%s723_s5] sm:$0xff] }
   0x5   :  { %450 = vmatmul.msk.bf16.vlgmr.msra.gmra.mxu0 %vm61_vm0, %v480_v1  ;;  %v496_v46 = vld [vmem:[%s722_s6] ss:$0 sm:$0xff] }
   0x7   :  { %v501_v20 = vpop.eup %500 }
   0x8   :  { %v109_v21 = vmul.f32 32.0, %v501_v20  ;;  %vm113_vm2 = vweird.f32 %v501_v20  ;;  %242 = vmatpush.bf16.msra.mxu1 %v483_v49 }
   0xa   :  { %v110_v22 = vsub.f32 1.0, %v109_v21 }
   0xc   :  { %v111_v23 = vmul.f32 %v501_v20, %v110_v22 }
   0xe   :  { %v112_v24 = vadd.f32 %v501_v20, %v111_v23 }
  0x10   :  { %v604_v25 = vsel %vm113_vm2, %v501_v20, %v112_v24 }
  0x15   :  { %451 = vmatmul.msk.bf16.gmra.mxu0 %vm61_vm0, %v481_v2 }
  0x82   :  { %v77_v4 = vpop.f32.mrf.mxu0 }
  0x83   :  { %v91_v5 = vadd.f32 %v87_v3, %v77_v4 }
  0x85   :  { %v96_v6 = vsel %vm95_vm1, %v91_v5, 0.0 }
  0x86   :  { %97 = vadd.xlane.f32.xlu0 %v96_v6 }
  0x8a   :  { %v79_v8 = vpop.f32.mrf.mxu0 }
  0x8b   :  { %v92_v9 = vadd.f32 %v88_v7, %v79_v8 }
  0x8d   :  { %v99_v10 = vsel %vm95_vm1, %v92_v9, 0.0 }
  0x8e   :  { %100 = vadd.xlane.f32.xlu0 %v99_v10  ;;  %v494_v10 = vld [vmem:[%s720_s3] ss:$0 sm:$0xff] }
  0x92   :  { %v82_v12 = vpop.f32.mrf.mxu0 }
  0x93   :  { %v93_v13 = vadd.f32 %v89_v11, %v82_v12 }
  0x95   :  { %v102_v14 = vsel %vm95_vm1, %v93_v13, 0.0 }
  0x96   :  { %103 = vadd.xlane.f32.xlu1 %v102_v14 }
  0x9a   :  { %v84_v16 = vpop.f32.mrf.mxu0 }
  0x9b   :  { %v94_v17 = vadd.f32 %v90_v15, %v84_v16 }
  0x9d   :  { %v105_v18 = vsel %vm95_vm1, %v94_v17, 0.0 }
  0x9e   :  { %106 = vadd.xlane.f32.xlu1 %v105_v18 }
  0xf9   :  { %v98_v26 = vpop.xlane.xlu0 %97 }
  0xfa   :  { %v115_v27 = vmul.f32 %v604_v25, %v98_v26 }
  0xfc   :  { %v119_v28 = vsub.f32 %v91_v5, %v115_v27 }
  0xfe   :  { %v123_v29 = vmul.f32 %v119_v28, %v119_v28 }
 0x100   :  { %v127_v30 = vsel %vm95_vm1, %v123_v29, 0.0 }
 0x101   :  { %128 = vadd.xlane.f32.xlu2 %v127_v30  ;;  %v101_v31 = vpop.xlane.xlu0 %100 }
 0x102   :  { %v116_v32 = vmul.f32 %v604_v25, %v101_v31 }
 0x104   :  { %v609_v33 = vsub.f32 %v92_v9, %v116_v32 }
 0x106   :  { %v124_v34 = vmul.f32 %v609_v33, %v609_v33 }
 0x108   :  { %v130_v35 = vsel %vm95_vm1, %v124_v34, 0.0 }
 0x109   :  { %131 = vadd.xlane.f32.xlu2 %v130_v35  ;;  %v104_v36 = vpop.xlane.xlu1 %103 }
 0x10a   :  { %v117_v37 = vmul.f32 %v604_v25, %v104_v36 }
 0x10c   :  { %v615_v38 = vsub.f32 %v93_v13, %v117_v37 }
 0x10e   :  { %v125_v39 = vmul.f32 %v615_v38, %v615_v38 }
 0x110   :  { %v133_v40 = vsel %vm95_vm1, %v125_v39, 0.0 }
 0x111   :  { %134 = vadd.xlane.f32.xlu0 %v133_v40  ;;  %v107_v41 = vpop.xlane.xlu1 %106 }
 0x112   :  { %v118_v42 = vmul.f32 %v604_v25, %v107_v41 }
 0x114   :  { %v621_v43 = vsub.f32 %v94_v17, %v118_v42  ;;  %v495_v17 = vld [vmem:[%s721_s4] ss:$0 sm:$0xff]  ;;  %v488_v42 = vld [vmem:[%s725_s7 + $0x18] sm:$0xff] }
 0x115   :  { %307 = vmatpush.bf16.msra.mxu2 %v488_v42  ;;  %489 = vmatpush.bf16.msra.mxu3 %v488_v42 }
 0x116   :  { %v126_v44 = vmul.f32 %v621_v43, %v621_v43 }
 0x118   :  { %v136_v45 = vsel %vm95_vm1, %v126_v44, 0.0  ;;  %v485_v44 = vld [vmem:[%s725_s7] sm:$0xff] }
 0x119   :  { %137 = vadd.xlane.f32.xlu1 %v136_v45 }
 0x174   :  { %v129_v47 = vpop.xlane.xlu2 %128 }
 0x175   :  { %v139_v48 = vmul.f32 %v129_v47, %v604_v25 }
 0x177   :  { %v143_v50 = vadd.f32 1e-05, %v139_v48 }
 0x179   :  { %502 = vrsqrt.f32 %v143_v50  ;;  %vm153_vm4 = vweird.f32 %v143_v50 }
 0x17c   :  { %v132_v51 = vpop.xlane.xlu2 %131 }
 0x17d   :  { %v140_v52 = vmul.f32 %v132_v51, %v604_v25 }
 0x17f   :  { %v503_v53 = vpop.eup %502  ;;  %v144_v54 = vadd.f32 1e-05, %v140_v52 }
 0x180   :  { %v148_v55 = vmul.f32 %v503_v53, %v143_v50  ;;  %vm154_vm3 = vweird.f32 %v503_v53 }
 0x181   :  { %504 = vrsqrt.f32 %v144_v54  ;;  %vm155_vm5 = vmor %vm153_vm4, %vm154_vm3  ;;  %vm163_vm7 = vweird.f32 %v144_v54 }
 0x182   :  { %v149_v56 = vmul.f32 %v503_v53, %v148_v55 }
 0x184   :  { %v150_v57 = vmul.f32 0.5, %v149_v56  ;;  %v135_v58 = vpop.xlane.xlu0 %134 }
 0x185   :  { %v141_v59 = vmul.f32 %v135_v58, %v604_v25 }
 0x186   :  { %v151_v60 = vsub.f32 1.5, %v150_v57 }
 0x187   :  { %v505_v61 = vpop.eup %504  ;;  %v145_v62 = vadd.f32 1e-05, %v141_v59 }
 0x188   :  { %v152_v63 = vmul.f32 %v503_v53, %v151_v60  ;;  %v158_v0 = vmul.f32 %v505_v61, %v144_v54  ;;  %vm164_vm6 = vweird.f32 %v505_v61  ;;  %v497_v60 = vld [vmem:[%s724_s8] ss:$0 sm:$0xff] }
 0x189   :  { %506 = vrsqrt.f32 %v145_v62  ;;  %vm165_vm8 = vmor %vm163_vm7, %vm164_vm6  ;;  %vm173_vm10 = vweird.f32 %v145_v62 }
 0x18a   :  { %v159_v1 = vmul.f32 %v505_v61, %v158_v0  ;;  %v156_v2 = vsel %vm155_vm5, %v503_v53, %v152_v63 }
 0x18b   :  { %v187_v8 = vmul.f32 %v156_v2, %v119_v28 }
 0x18c   :  { %v160_v3 = vmul.f32 0.5, %v159_v1  ;;  %v138_v4 = vpop.xlane.xlu1 %137 }
 0x18d   :  { %v142_v5 = vmul.f32 %v138_v4, %v604_v25  ;;  %v195_v16 = vmul.f32 %v494_v10, %v187_v8 }
 0x18e   :  { %v161_v6 = vsub.f32 1.5, %v160_v3 }
 0x18f   :  { %v507_v7 = vpop.eup %506  ;;  %v146_v9 = vadd.f32 1e-05, %v142_v5  ;;  %v203_v22 = vadd.f32 %v495_v17, %v195_v16 }
 0x190   :  { %v162_v11 = vmul.f32 %v505_v61, %v161_v6  ;;  %v168_v12 = vmul.f32 %v507_v7, %v145_v62  ;;  %vm174_vm9 = vweird.f32 %v507_v7 }
 0x191   :  { %508 = vrsqrt.f32 %v146_v9  ;;  %vm175_vm11 = vmor %vm173_vm10, %vm174_vm9  ;;  %vm183_vm13 = vweird.f32 %v146_v9 }
 0x192   :  { %v166_v13 = vsel %vm165_vm8, %v505_v61, %v162_v11  ;;  %v169_v14 = vmul.f32 %v507_v7, %v168_v12 }
 0x193   :  { %v188_v15 = vmul.f32 %v166_v13, %v609_v33 }
 0x194   :  { %v170_v18 = vmul.f32 0.5, %v169_v14 }
 0x195   :  { %v196_v19 = vmul.f32 %v494_v10, %v188_v15 }
 0x196   :  { %v171_v20 = vsub.f32 1.5, %v170_v18 }
 0x197   :  { %v509_v21 = vpop.eup %508  ;;  %v643_v23 = vadd.f32 %v495_v17, %v196_v19 }
 0x198   :  { %v172_v24 = vmul.f32 %v507_v7, %v171_v20  ;;  %v178_v26 = vmul.f32 %v509_v21, %v146_v9  ;;  %vm184_vm12 = vweird.f32 %v509_v21 }
 0x199   :  { %v207_v27 = vpack.c.bf16 %v643_v23, %v203_v22  ;;  %vm185_vm14 = vmor %vm183_vm13, %vm184_vm12 }
 0x19a   :  { %v179_v28 = vmul.f32 %v509_v21, %v178_v26  ;;  %v176_v29 = vsel %vm175_vm11, %v507_v7, %v172_v24 }
 0x19b   :  { %460 = vmatmul.msk.bf16.vlgmr.msra.gmra.mxu1 %vm95_vm1, %v207_v27  ;;  %v189_v32 = vmul.f32 %v176_v29, %v615_v38  ;;  %v487_v38 = vld [vmem:[%s725_s7 + $0x10] sm:$0xff] }
 0x19c   :  { %v180_v30 = vmul.f32 0.5, %v179_v28  ;;  %308 = vmatpush.bf16.msra.mxu2 %v487_v38  ;;  %490 = vmatpush.bf16.msra.mxu3 %v487_v38 }
 0x19d   :  { %v197_v36 = vmul.f32 %v494_v10, %v189_v32 }
 0x19e   :  { %v181_v31 = vsub.f32 1.5, %v180_v30 }
 0x19f   :  { %v205_v39 = vadd.f32 %v495_v17, %v197_v36 }
 0x1a0   :  { %v182_v33 = vmul.f32 %v509_v21, %v181_v31 }
 0x1a2   :  { %v186_v34 = vsel %vm185_vm14, %v509_v21, %v182_v33 }
 0x1a3   :  { %v190_v35 = vmul.f32 %v186_v34, %v621_v43  ;;  %v486_v43 = vld [vmem:[%s725_s7 + $0x8] sm:$0xff] }
 0x1a4   :  { %309 = vmatpush.bf16.msra.mxu2 %v486_v43  ;;  %491 = vmatpush.bf16.msra.mxu3 %v486_v43 }
 0x1a5   :  { %v198_v37 = vmul.f32 %v494_v10, %v190_v35 }
 0x1a7   :  { %v206_v40 = vadd.f32 %v495_v17, %v198_v37 }
 0x1a8   :  { %310 = vmatpush.bf16.msra.mxu2 %v485_v44  ;;  %492 = vmatpush.bf16.msra.mxu3 %v485_v44 }
 0x1a9   :  { %v208_v41 = vpack.c.bf16 %v206_v40, %v205_v39 }
 0x1ab   :  { %461 = vmatmul.msk.bf16.gmra.mxu1 %vm95_vm1, %v208_v41 }
 0x218   :  { %v244_v45 = vpop.f32.mrf.mxu1 }
 0x219   :  { %v245_v47 = vadd.f32 %v496_v46, %v244_v45 }
 0x21b   :  { %v254_v50 = vmax.f32 %v245_v47, 0.0 }
 0x220   :  { %v246_v48 = vpop.f32.mrf.mxu1 }
 0x221   :  { %v247_v49 = vadd.f32 %v496_v46, %v246_v48 }
 0x223   :  { %v255_v51 = vmax.f32 %v247_v49, 0.0 }
 0x225   :  { %v258_v52 = vpack.c.bf16 %v255_v51, %v254_v50  ;;  %v498_v51 = vld [vmem:[%s726_s9] ss:$0 sm:$0xff] }
 0x227   :  { %478 = vmatmul.msk.bf16.vlgmr.msra.gmra.mxu2 %vm296_vm15, %v258_v52 }
 0x228   :  { %v249_v53 = vpop.f32.mrf.mxu1 }
 0x229   :  { %v250_v54 = vadd.f32 %v496_v46, %v249_v53 }
 0x22b   :  { %v256_v57 = vmax.f32 %v250_v54, 0.0  ;;  %v499_v54 = vld [vmem:[%s727_s10] ss:$0 sm:$0xff] }
 0x230   :  { %v251_v55 = vpop.f32.mrf.mxu1 }
 0x231   :  { %v252_v56 = vadd.f32 %v496_v46, %v251_v55 }
 0x233   :  { %v257_v58 = vmax.f32 %v252_v56, 0.0 }
 0x235   :  { %v259_v59 = vpack.c.bf16 %v257_v58, %v256_v57 }
 0x237   :  { %479 = vmatmul.msk.bf16.vlgmr.msra.gmra.mxu3 %vm296_vm15, %v259_v59 }
 0x2aa   :  { %v312_v61 = vpop.f32.mrf.mxu2 }
 0x2ab   :  { %v313_v62 = vadd.f32 %v497_v60, %v312_v61 }
 0x2ad   :  { %v322_v63 = vadd.f32 %v313_v62, %v203_v22 }
 0x2af   :  { %v326_v0 = vsel %vm95_vm1, %v322_v63, 0.0 }
 0x2b0   :  { %327 = vadd.xlane.f32.xlu2 %v326_v0 }
 0x2b2   :  { %v314_v1 = vpop.f32.mrf.mxu2 }
 0x2b3   :  { %v315_v2 = vadd.f32 %v497_v60, %v314_v1 }
 0x2b5   :  { %v323_v3 = vadd.f32 %v315_v2, %v643_v23 }
 0x2b7   :  { %v329_v4 = vsel %vm95_vm1, %v323_v3, 0.0 }
 0x2b8   :  { %330 = vadd.xlane.f32.xlu0 %v329_v4 }
 0x2ba   :  { %v317_v5 = vpop.f32.mrf.mxu3 }
 0x2bb   :  { %v318_v6 = vadd.f32 %v497_v60, %v317_v5 }
 0x2bd   :  { %v324_v7 = vadd.f32 %v318_v6, %v205_v39 }
 0x2bf   :  { %v332_v8 = vsel %vm95_vm1, %v324_v7, 0.0 }
 0x2c0   :  { %333 = vadd.xlane.f32.xlu1 %v332_v8 }
 0x2c2   :  { %v319_v9 = vpop.f32.mrf.mxu3 }
 0x2c3   :  { %v320_v10 = vadd.f32 %v497_v60, %v319_v9 }
 0x2c5   :  { %v325_v11 = vadd.f32 %v320_v10, %v206_v40 }
 0x2c7   :  { %v335_v12 = vsel %vm95_vm1, %v325_v11, 0.0 }
 0x2c8   :  { %336 = vadd.xlane.f32.xlu2 %v335_v12 }
 0x323   :  { %v328_v13 = vpop.xlane.xlu2 %327 }
 0x324   :  { %v338_v14 = vmul.f32 %v328_v13, %v604_v25 }
 0x326   :  { %v342_v15 = vsub.f32 %v322_v63, %v338_v14 }
 0x328   :  { %v346_v16 = vmul.f32 %v342_v15, %v342_v15 }
 0x32a   :  { %v350_v17 = vsel %vm95_vm1, %v346_v16, 0.0 }
 0x32b   :  { %351 = vadd.xlane.f32.xlu0 %v350_v17  ;;  %v331_v18 = vpop.xlane.xlu0 %330 }
 0x32c   :  { %v339_v19 = vmul.f32 %v331_v18, %v604_v25 }
 0x32e   :  { %v343_v20 = vsub.f32 %v323_v3, %v339_v19 }
 0x330   :  { %v347_v21 = vmul.f32 %v343_v20, %v343_v20 }
 0x332   :  { %v353_v22 = vsel %vm95_vm1, %v347_v21, 0.0 }
 0x333   :  { %354 = vadd.xlane.f32.xlu1 %v353_v22  ;;  %v334_v23 = vpop.xlane.xlu1 %333 }
 0x334   :  { %v340_v24 = vmul.f32 %v334_v23, %v604_v25 }
 0x336   :  { %v678_v26 = vsub.f32 %v324_v7, %v340_v24 }
 0x338   :  { %v348_v27 = vmul.f32 %v678_v26, %v678_v26 }
 0x33a   :  { %v356_v28 = vsel %vm95_vm1, %v348_v27, 0.0 }
 0x33b   :  { %v337_v29 = vpop.xlane.xlu2 %336  ;;  %357 = vadd.xlane.f32.xlu2 %v356_v28 }
 0x33c   :  { %v341_v30 = vmul.f32 %v337_v29, %v604_v25 }
 0x33e   :  { %v684_v31 = vsub.f32 %v325_v11, %v341_v30 }
 0x340   :  { %v349_v32 = vmul.f32 %v684_v31, %v684_v31 }
 0x342   :  { %v359_v33 = vsel %vm95_vm1, %v349_v32, 0.0 }
 0x343   :  { %360 = vadd.xlane.f32.xlu0 %v359_v33 }
 0x39e   :  { %v352_v34 = vpop.xlane.xlu0 %351 }
 0x39f   :  { %v362_v35 = vmul.f32 %v352_v34, %v604_v25 }
 0x3a1   :  { %v366_v36 = vadd.f32 1e-05, %v362_v35 }
 0x3a3   :  { %510 = vrsqrt.f32 %v366_v36  ;;  %vm376_vm2 = vweird.f32 %v366_v36 }
 0x3a6   :  { %v355_v37 = vpop.xlane.xlu1 %354 }
 0x3a7   :  { %v363_v39 = vmul.f32 %v355_v37, %v604_v25 }
 0x3a9   :  { %v511_v40 = vpop.eup %510  ;;  %v367_v41 = vadd.f32 1e-05, %v363_v39 }
 0x3aa   :  { %v371_v42 = vmul.f32 %v511_v40, %v366_v36  ;;  %vm377_vm0 = vweird.f32 %v511_v40 }
 0x3ab   :  { %512 = vrsqrt.f32 %v367_v41  ;;  %vm378_vm3 = vmor %vm376_vm2, %vm377_vm0  ;;  %vm386_vm5 = vweird.f32 %v367_v41 }
 0x3ac   :  { %v372_v38 = vmul.f32 %v511_v40, %v371_v42 }
 0x3ae   :  { %v373_v43 = vmul.f32 0.5, %v372_v38  ;;  %v358_v44 = vpop.xlane.xlu2 %357 }
 0x3af   :  { %v364_v45 = vmul.f32 %v358_v44, %v604_v25 }
 0x3b0   :  { %v374_v46 = vsub.f32 1.5, %v373_v43 }
 0x3b1   :  { %v513_v47 = vpop.eup %512  ;;  %v368_v48 = vadd.f32 1e-05, %v364_v45 }
 0x3b2   :  { %v375_v49 = vmul.f32 %v511_v40, %v374_v46  ;;  %v381_v50 = vmul.f32 %v513_v47, %v367_v41  ;;  %vm387_vm4 = vweird.f32 %v513_v47 }
 0x3b3   :  { %514 = vrsqrt.f32 %v368_v48  ;;  %vm388_vm6 = vmor %vm386_vm5, %vm387_vm4  ;;  %vm396_vm8 = vweird.f32 %v368_v48 }
 0x3b4   :  { %v379_v52 = vsel %vm378_vm3, %v511_v40, %v375_v49  ;;  %v382_v53 = vmul.f32 %v513_v47, %v381_v50 }
 0x3b5   :  { %v410_v55 = vmul.f32 %v379_v52, %v342_v15 }
 0x3b6   :  { %v383_v56 = vmul.f32 0.5, %v382_v53  ;;  %v361_v57 = vpop.xlane.xlu0 %360 }
 0x3b7   :  { %v418_v58 = vmul.f32 %v498_v51, %v410_v55  ;;  %v365_v59 = vmul.f32 %v361_v57, %v604_v25 }
 0x3b8   :  { %v384_v60 = vsub.f32 1.5, %v383_v56 }
 0x3b9   :  { %v515_v61 = vpop.eup %514  ;;  %v426_v62 = vadd.f32 %v499_v54, %v418_v58  ;;  %v369_v63 = vadd.f32 1e-05, %v365_v59 }
 0x3ba   :  { %v385_v0 = vmul.f32 %v513_v47, %v384_v60  ;;  %v391_v1 = vmul.f32 %v515_v61, %v368_v48  ;;  %vm397_vm7 = vweird.f32 %v515_v61 }
 0x3bb   :  { %430 = vst.msk [vmem:[%s728_s11] sm:$0xff] %vm95_vm1, %v426_v62  ;;  %516 = vrsqrt.f32 %v369_v63  ;;  %vm398_vm9 = vmor %vm396_vm8, %vm397_vm7  ;;  %vm406_vm11 = vweird.f32 %v369_v63 }
 0x3bc   :  { %v389_v2 = vsel %vm388_vm6, %v513_v47, %v385_v0  ;;  %v392_v3 = vmul.f32 %v515_v61, %v391_v1 }
 0x3bd   :  { %v411_v4 = vmul.f32 %v389_v2, %v343_v20 }
 0x3be   :  { %v393_v5 = vmul.f32 0.5, %v392_v3 }
 0x3bf   :  { %v419_v25 = vmul.f32 %v498_v51, %v411_v4 }
 0x3c0   :  { %v394_v6 = vsub.f32 1.5, %v393_v5 }
 0x3c1   :  { %v517_v7 = vpop.eup %516  ;;  %v427_v8 = vadd.f32 %v499_v54, %v419_v25 }
 0x3c2   :  { %v395_v9 = vmul.f32 %v515_v61, %v394_v6  ;;  %v401_v10 = vmul.f32 %v517_v7, %v369_v63  ;;  %vm407_vm10 = vweird.f32 %v517_v7 }
 0x3c3   :  { %431 = vst.msk [vmem:[%s728_s11 + $0x8] sm:$0xff] %vm95_vm1, %v427_v8  ;;  %vm408_vm12 = vmor %vm406_vm11, %vm407_vm10 }
 0x3c4   :  { %v399_v11 = vsel %vm398_vm9, %v515_v61, %v395_v9  ;;  %v402_v12 = vmul.f32 %v517_v7, %v401_v10 }
 0x3c5   :  { %v412_v13 = vmul.f32 %v399_v11, %v678_v26 }
 0x3c6   :  { %v403_v14 = vmul.f32 0.5, %v402_v12 }
 0x3c7   :  { %v420_v15 = vmul.f32 %v498_v51, %v412_v13 }
 0x3c8   :  { %v404_v16 = vsub.f32 1.5, %v403_v14 }
 0x3c9   :  { %v428_v17 = vadd.f32 %v499_v54, %v420_v15 }
 0x3ca   :  { %v405_v18 = vmul.f32 %v517_v7, %v404_v16 }
 0x3cb   :  { %432 = vst.msk [vmem:[%s728_s11 + $0x10] sm:$0xff] %vm95_vm1, %v428_v17 }
 0x3cc   :  { %v409_v19 = vsel %vm408_vm12, %v517_v7, %v405_v18 }
 0x3cd   :  { %v413_v20 = vmul.f32 %v409_v19, %v684_v31 }
 0x3cf   :  { %v421_v21 = vmul.f32 %v498_v51, %v413_v20 }
 0x3d1   :  { %v429_v22 = vadd.f32 %v499_v54, %v421_v21 }
 0x3d3   :  { %433 = vst.msk [vmem:[%s728_s11 + $0x18] sm:$0xff] %vm95_vm1, %v429_v22 }

</bundles_post_ra>
